<compile_context>
chip_gen: v5e
topology: v5e:2x2
jax: 0.10.0
libtpu: 0.0.40
codegen_flags: <defaults>
</compile_context>

<pallas_src>
import functools

import jax
import jax.numpy as jnp
from jax import lax
from jax.experimental import pallas as pl
from jax.experimental.pallas import tpu as pltpu


# ---------------------------------------------------------------------------
# Kernel 1: fused object combination (softmax over K masks ++ 0.1 row,
# sigmoid feature reducer, mask-weighted sum) + background composition.
# All rows keep HW on the lane axis (lane-dense, 256 lanes at the test size).
# ---------------------------------------------------------------------------
def _combine_compose_kernel(masks_ref, imgs_ref, prev_ref, bg_ref,
                            post_ref, cmask_ref, cimg_ref,
                            smask_ref, nbg_ref, pre_ref):
    m = masks_ref[0]                                                # (K, HW)
    pad = jnp.float32(0.1)
    mx = jnp.maximum(jnp.max(m, axis=0, keepdims=True), pad)        # (1, HW)
    e = jnp.exp(m - mx)                                             # (K, HW)
    denom = jnp.sum(e, axis=0, keepdims=True) + jnp.exp(pad - mx)   # (1, HW)
    inv = pl.reciprocal(denom, approx=True)                         # EUP slot, 1 row
    post = e * inv                                                  # softmax[:-1]
    post_ref[0] = post
    cmask = jnp.sum(post, axis=0, keepdims=True)                    # (1, HW)
    cmask_ref[0] = cmask
    cimg = jnp.sum(jax.nn.sigmoid(imgs_ref[0]) * post[:, None, :], axis=0)   # (3, HW)
    cimg_ref[0] = cimg
    bg = bg_ref[0]                                                  # (1, HW)
    smask_ref[0] = jnp.clip(1.0 - bg - cmask, 0.0, 1.0)
    nbg = jnp.clip(bg - cmask, 0.0, 1.0)
    nbg_ref[0] = nbg
    pre_ref[0] = prev_ref[0] * nbg + cimg                           # (3, HW)


def combine_and_compose(masks, imgs, prev_f, bg_f):
    B, K, HW = masks.shape
    return pl.pallas_call(
        _combine_compose_kernel,
        out_shape=(jax.ShapeDtypeStruct((B, K, HW), jnp.float32),   # post
                   jax.ShapeDtypeStruct((B, 1, HW), jnp.float32),   # comb_mask
                   jax.ShapeDtypeStruct((B, 3, HW), jnp.float32),   # comb_img
                   jax.ShapeDtypeStruct((B, 1, HW), jnp.float32),   # smask
                   jax.ShapeDtypeStruct((B, 1, HW), jnp.float32),   # new bg
                   jax.ShapeDtypeStruct((B, 3, HW), jnp.float32)),  # pre
        grid_spec=pltpu.PrefetchScalarGridSpec(
            num_scalar_prefetch=0,
            grid=(B,),
            in_specs=[pl.BlockSpec((1, K, HW), lambda b: (b, 0, 0)),
                      pl.BlockSpec((1, K, 3, HW), lambda b: (b, 0, 0, 0)),
                      pl.BlockSpec((1, 3, HW), lambda b: (b, 0, 0)),
                      pl.BlockSpec((1, 1, HW), lambda b: (b, 0, 0))],
            out_specs=(pl.BlockSpec((1, K, HW), lambda b: (b, 0, 0)),
                       pl.BlockSpec((1, 1, HW), lambda b: (b, 0, 0)),
                       pl.BlockSpec((1, 3, HW), lambda b: (b, 0, 0)),
                       pl.BlockSpec((1, 1, HW), lambda b: (b, 0, 0)),
                       pl.BlockSpec((1, 1, HW), lambda b: (b, 0, 0)),
                       pl.BlockSpec((1, 3, HW), lambda b: (b, 0, 0)))),
        compiler_params=pltpu.CompilerParams(dimension_semantics=("parallel",)),
    )(masks, imgs, prev_f, bg_f)


# ---------------------------------------------------------------------------
# Kernel 2/3: 3x3 "same" conv as ONE MXU matmul over 9 in-kernel taps.
#
# The wrapper passes the activation as a flat halo-padded block (Cin_p, Lp)
# with Lp = (H+3)*(W+2).  Inside the kernel, tap (dh, dw) is the lane-shifted
# slice [dh*Wp + dw : dh*Wp + dw + H*Wp]; the 9 taps are concatenated along the
# (sublane-aligned) channel axis and contracted against the (Cout, 9*Cin_p)
# weight in a single bf16 MXU matmul with f32 accumulation.  The output is the
# lane-dense "wide" layout (Cout, H*Wp); the 2 garbage columns per row are
# stripped in the wrapper (fuses into the next layer's glue).
# ---------------------------------------------------------------------------
def _conv_taps_matmul(x, w, b, H, W):
    Wp = W + 2
    L = H * Wp
    taps = jnp.concatenate(
        [x[:, dh * Wp + dw: dh * Wp + dw + L] for dh in range(3) for dw in range(3)],
        axis=0)                                                     # (9*Cin_p, L) bf16
    acc = jnp.dot(w, taps, preferred_element_type=jnp.float32)      # one MXU matmul
    return acc + b                                                  # (Cout, L) f32


def _conv3x3_kernel(xf_ref, w_ref, b_ref, o_ref, *, H, W, activation):
    acc = _conv_taps_matmul(xf_ref[0], w_ref[...], b_ref[...], H, W)
    if activation == "relu":
        acc = jnp.maximum(acc, 0.0)
    elif activation == "sigmoid":
        acc = jax.nn.sigmoid(acc)
    o_ref[0] = acc


def _conv3x3_blend_kernel(xf_ref, w_ref, b_ref, pre_ref, sm_ref,
                          final_ref, synth_ref, *, H, W):
    # Last hourglass conv fused with the final blend.
    synth = jax.nn.sigmoid(_conv_taps_matmul(xf_ref[0], w_ref[...], b_ref[...], H, W))
    synth_ref[0] = synth
    final_ref[0] = pre_ref[0] + sm_ref[0] * synth


_CONV_PARAMS = pltpu.CompilerParams(dimension_semantics=("parallel",),
                                    vmem_limit_bytes=64 * 1024 * 1024)


def _conv_prep(x, w_hwio, b):
    """Pad channels to the bf16 sublane tile, add the conv halo, flatten, cast."""
    B, Cin, H, W = x.shape
    Cout = w_hwio.shape[-1]
    Wp = W + 2
    L = H * Wp
    Lp = (H + 3) * Wp                       # +1 top halo, +2 bottom rows of slack
    Cin_p = ((Cin + 15) // 16) * 16         # align tap concat to the bf16 (16,128) tile
    xp = jnp.pad(x, ((0, 0), (0, Cin_p - Cin), (1, 2), (1, 1)))
    xf = xp.reshape(B, Cin_p, Lp).astype(jnp.bfloat16)
    wp = jnp.pad(w_hwio, ((0, 0), (0, 0), (0, Cin_p - Cin), (0, 0)))
    w2 = wp.transpose(3, 0, 1, 2).reshape(Cout, 9 * Cin_p).astype(jnp.bfloat16)
    b2 = b.reshape(Cout, 1).astype(jnp.float32)
    return xf, w2, b2, (B, Cin_p, Cout, H, W, Wp, L, Lp)


def conv3x3_pallas(x, w_hwio, b, activation="none"):
    xf, w2, b2, (B, Cin_p, Cout, H, W, Wp, L, Lp) = _conv_prep(x, w_hwio, b)
    out_wide = pl.pallas_call(
        functools.partial(_conv3x3_kernel, H=H, W=W, activation=activation),
        out_shape=jax.ShapeDtypeStruct((B, Cout, L), jnp.float32),
        grid_spec=pltpu.PrefetchScalarGridSpec(
            num_scalar_prefetch=0,
            grid=(B,),
            in_specs=[pl.BlockSpec((1, Cin_p, Lp), lambda i: (i, 0, 0)),
                      # constant block index -> weights/bias fetched once, stay resident
                      pl.BlockSpec((Cout, 9 * Cin_p), lambda i: (0, 0)),
                      pl.BlockSpec((Cout, 1), lambda i: (0, 0))],
            out_specs=pl.BlockSpec((1, Cout, L), lambda i: (i, 0, 0))),
        compiler_params=_CONV_PARAMS,
    )(xf, w2, b2)
    # strip the 2 garbage columns of the wide layout (fuses with next-layer glue in XLA)
    return out_wide.reshape(B, Cout, H, Wp)[:, :, :, :W]


def conv3x3_blend_pallas(x, w_hwio, b, pre, smask):
    """final = pre + smask * sigmoid(conv(x)); also returns synth = sigmoid(conv(x))."""
    xf, w2, b2, (B, Cin_p, Cout, H, W, Wp, L, Lp) = _conv_prep(x, w_hwio, b)
    pre_w = jnp.pad(pre, ((0, 0), (0, 0), (0, 0), (0, 2))).reshape(B, 3, L)
    sm_w = jnp.pad(smask, ((0, 0), (0, 0), (0, 0), (0, 2))).reshape(B, 1, L)
    final_w, synth_w = pl.pallas_call(
        functools.partial(_conv3x3_blend_kernel, H=H, W=W),
        out_shape=(jax.ShapeDtypeStruct((B, Cout, L), jnp.float32),
                   jax.ShapeDtypeStruct((B, Cout, L), jnp.float32)),
        grid_spec=pltpu.PrefetchScalarGridSpec(
            num_scalar_prefetch=0,
            grid=(B,),
            in_specs=[pl.BlockSpec((1, Cin_p, Lp), lambda i: (i, 0, 0)),
                      pl.BlockSpec((Cout, 9 * Cin_p), lambda i: (0, 0)),
                      pl.BlockSpec((Cout, 1), lambda i: (0, 0)),
                      pl.BlockSpec((1, 3, L), lambda i: (i, 0, 0)),
                      pl.BlockSpec((1, 1, L), lambda i: (i, 0, 0))],
            out_specs=(pl.BlockSpec((1, Cout, L), lambda i: (i, 0, 0)),
                       pl.BlockSpec((1, Cout, L), lambda i: (i, 0, 0)))),
        compiler_params=_CONV_PARAMS,
    )(xf, w2, b2, pre_w, sm_w)
    final = final_w.reshape(B, Cout, H, Wp)[:, :, :, :W]
    synth = synth_w.reshape(B, Cout, H, Wp)[:, :, :, :W]
    return final, synth


# ---------------------------------------------------------------------------
# Hourglass(n=2, in=3, out=3, n_features=32) + Sigmoid, channels-first (NCHW).
# TODO(synk): the Hourglass module's source is not in the reference file; it is
# implemented here as a 2-level conv encoder/decoder (3x3 convs, avg-pool down,
# nearest up, additive skips, 32 features).  Pool / upsample / skip-add / halo
# pads are cheap XLA glue (requires H, W divisible by 4); conv compute is Pallas.
# ---------------------------------------------------------------------------
def _avg_pool2(x):
    B, C, H, W = x.shape
    return x.reshape(B, C, H // 2, 2, W // 2, 2).mean(axis=(3, 5))


def _upsample2(x):
    return jnp.repeat(jnp.repeat(x, 2, axis=2), 2, axis=3)


def hourglass_blend_apply(pre, smask, p):
    e1 = conv3x3_pallas(pre, p["w_enc1"], p["b_enc1"], "relu")               # H
    e2 = conv3x3_pallas(_avg_pool2(e1), p["w_enc2"], p["b_enc2"], "relu")    # H/2
    bt = conv3x3_pallas(_avg_pool2(e2), p["w_bot"], p["b_bot"], "relu")      # H/4
    d2 = conv3x3_pallas(_upsample2(bt), p["w_dec2"], p["b_dec2"], "relu") + e2
    d1 = conv3x3_pallas(_upsample2(d2), p["w_dec1"], p["b_dec1"], "relu") + e1
    return conv3x3_blend_pallas(d1, p["w_out"], p["b_out"], pre, smask)


# ---------------------------------------------------------------------------
# Full forward (reduce_features=False, final_synth=False).
# Note: self.conv from __init__ is never used in the PyTorch forward -> omitted.
# ---------------------------------------------------------------------------
def addition_generator_forward(graph_x, graph_batch, prev_image,
                               background_masks, params):
    del graph_batch  # TODO(synk): assumes an equal number (K = N // B) of contiguous
                     # graph nodes per batch element, instead of the variable-length
                     # graph.batch grouping loop in the PyTorch code.
    N, C, H, W = graph_x.shape
    B = prev_image.shape[0]
    K = N // B
    HW = H * W

    x = graph_x.reshape(B, K, C, HW).astype(jnp.float32)
    masks = x[:, :, 0, :]                                   # (B, K, HW)
    imgs = x[:, :, 1:, :]                                   # (B, K, 3, HW)
    prev_f = prev_image.reshape(B, 3, HW).astype(jnp.float32)
    bg_f = background_masks.reshape(B, 1, HW).astype(jnp.float32)

    post, cmask, cimg, smask, nbg, pre = combine_and_compose(masks, imgs, prev_f, bg_f)

    pre_img = pre.reshape(B, 3, H, W)
    smask_img = smask.reshape(B, 1, H, W)
    final, synth = hourglass_blend_apply(pre_img, smask_img, params)

    nbg_img = nbg.reshape(B, 1, H, W)
    diagnostics = {
        "images": {
            "synthetic_masks": smask_img,
            "combined_object_masks": cmask.reshape(B, 1, H, W),
            "object_pixels": cimg.reshape(B, 3, H, W),
            "background_masks": nbg_img,
            "masked_background_pixels": prev_image.astype(jnp.float32) * nbg_img,
            "synthetic_pixels": synth,
            "masked_synthetic_pixels": smask_img * synth,
            "object_and_background": pre_img,
            "post_softmax_object_masks": post.reshape(B * K, H, W),
        },
        "metrics": {},
    }
    return final, diagnostics


# ---------------------------------------------------------------------------
# Pure-JAX reference (same math; convs mirror the bf16 MXU input rounding).
# ---------------------------------------------------------------------------
def _conv3x3_ref(x, w_hwio, b, activation="none"):
    xq = x.astype(jnp.bfloat16).astype(jnp.float32)
    wq = w_hwio.astype(jnp.bfloat16).astype(jnp.float32)
    y = lax.conv_general_dilated(xq, wq, (1, 1), "SAME",
                                 dimension_numbers=("NCHW", "HWIO", "NCHW"),
                                 precision=lax.Precision.HIGHEST)
    y = y + b.reshape(1, -1, 1, 1)
    if activation == "relu":
        y = jnp.maximum(y, 0.0)
    elif activation == "sigmoid":
        y = jax.nn.sigmoid(y)
    return y


def reference_forward(graph_x, prev_image, background_masks, p):
    N, C, H, W = graph_x.shape
    B = prev_image.shape[0]
    K = N // B
    x = graph_x.reshape(B, K, C, H, W)
    masks = x[:, :, 0]
    imgs = x[:, :, 1:]
    padded = jnp.concatenate(
        [masks, jnp.full((B, 1, H, W), 0.1, jnp.float32)], axis=1)
    post = jax.nn.softmax(padded, axis=1)[:, :K]
    comb_mask = jnp.sum(post, axis=1, keepdims=True)
    comb_img = jnp.sum(jax.nn.sigmoid(imgs) * post[:, :, None], axis=1)
    smask = jnp.clip(1.0 - background_masks - comb_mask, 0.0, 1.0)
    nbg = jnp.clip(background_masks - comb_mask, 0.0, 1.0)
    pre = prev_image * nbg + comb_img
    e1 = _conv3x3_ref(pre, p["w_enc1"], p["b_enc1"], "relu")
    e2 = _conv3x3_ref(_avg_pool2(e1), p["w_enc2"], p["b_enc2"], "relu")
    bt = _conv3x3_ref(_avg_pool2(e2), p["w_bot"], p["b_bot"], "relu")
    d2 = _conv3x3_ref(_upsample2(bt), p["w_dec2"], p["b_dec2"], "relu") + e2
    d1 = _conv3x3_ref(_upsample2(d2), p["w_dec1"], p["b_dec1"], "relu") + e1
    synth = _conv3x3_ref(d1, p["w_out"], p["b_out"], "sigmoid")
    return pre + smask * synth


def init_params(key):
    names = [("enc1", 3, 32), ("enc2", 32, 32), ("bot", 32, 32),
             ("dec2", 32, 32), ("dec1", 32, 32), ("out", 32, 3)]
    ks = jax.random.split(key, 2 * len(names))
    p = {}
    for i, (n, cin, cout) in enumerate(names):
        p[f"w_{n}"] = 0.1 * jax.random.normal(ks[2 * i], (3, 3, cin, cout),
                                              jnp.float32)
        p[f"b_{n}"] = 0.01 * jax.random.normal(ks[2 * i + 1], (cout,),
                                               jnp.float32)
    return p


if __name__ == "__main__":
    key = jax.random.PRNGKey(0)
    k1, k2, k3 = jax.random.split(key, 3)
    B, K, H, W = 2, 3, 16, 16
    graph_x = jax.random.normal(k1, (B * K, 4, H, W), jnp.float32)
    graph_batch = jnp.repeat(jnp.arange(B, dtype=jnp.int32), K)
    prev_image = jax.random.uniform(k2, (B, 3, H, W), dtype=jnp.float32)
    background_masks = jax.random.uniform(k3, (B, 1, H, W), dtype=jnp.float32)
    params = init_params(jax.random.PRNGKey(42))

    fwd = jax.jit(addition_generator_forward)
    out, diags = fwd(graph_x, graph_batch, prev_image, background_masks, params)
    out = jax.block_until_ready(out)

    ref = jax.block_until_ready(
        reference_forward(graph_x, prev_image, background_masks, params))
    err = float(jnp.max(jnp.abs(out - ref)))
    assert out.shape == (B, 3, H, W), out.shape
    # bf16 MXU inputs + approx reciprocal in the softmax -> modest tolerance.
    assert err < 2e-2, f"max abs error vs reference: {err}"
    print("KERNEL_OK")
</pallas_src>

<mosaic_0001>
module attributes {stable_mosaic.version = 11 : i64} {
  func.func @_combine_compose_kernel(%arg0: i32, %arg1: memref<1x3x256xf32, #tpu.memory_space<vmem>>, %arg2: memref<1x3x3x256xf32, #tpu.memory_space<vmem>>, %arg3: memref<1x3x256xf32, #tpu.memory_space<vmem>>, %arg4: memref<1x1x256xf32, #tpu.memory_space<vmem>>, %arg5: memref<1x3x256xf32, #tpu.memory_space<vmem>>, %arg6: memref<1x1x256xf32, #tpu.memory_space<vmem>>, %arg7: memref<1x3x256xf32, #tpu.memory_space<vmem>>, %arg8: memref<1x1x256xf32, #tpu.memory_space<vmem>>, %arg9: memref<1x1x256xf32, #tpu.memory_space<vmem>>, %arg10: memref<1x3x256xf32, #tpu.memory_space<vmem>>) attributes {dimension_semantics = [#tpu.dimension_semantics<parallel>], iteration_bounds = array<i64: 2>, scalar_prefetch = 0 : i64, scratch_operands = 0 : i64, tpu.core_type = #tpu.core_type<tc>, window_params = [{transform_indices = @transform_0, window_bounds = array<i64: 1, 3, 256>}, {transform_indices = @transform_1, window_bounds = array<i64: 1, 3, 3, 256>}, {transform_indices = @transform_2, window_bounds = array<i64: 1, 3, 256>}, {transform_indices = @transform_3, window_bounds = array<i64: 1, 1, 256>}, {transform_indices = @transform_4, window_bounds = array<i64: 1, 3, 256>}, {transform_indices = @transform_5, window_bounds = array<i64: 1, 1, 256>}, {transform_indices = @transform_6, window_bounds = array<i64: 1, 3, 256>}, {transform_indices = @transform_7, window_bounds = array<i64: 1, 1, 256>}, {transform_indices = @transform_8, window_bounds = array<i64: 1, 1, 256>}, {transform_indices = @transform_9, window_bounds = array<i64: 1, 3, 256>}]} {
    %c0 = arith.constant 0 : index
    %c0_0 = arith.constant 0 : index
    %c0_1 = arith.constant 0 : index
    %0 = vector.load %arg1[%c0, %c0_0, %c0_1] : memref<1x3x256xf32, #tpu.memory_space<vmem>>, vector<1x3x256xf32>
    %1 = vector.shape_cast %0 : vector<1x3x256xf32> to vector<3x256xf32>
    %cst = arith.constant dense<0xFF800000> : vector<256xf32>
    %2 = vector.multi_reduction <maximumf>, %1, %cst [0] : vector<3x256xf32> to vector<256xf32>
    %3 = vector.shape_cast %2 : vector<256xf32> to vector<1x256xf32>
    %cst_2 = arith.constant 1.000000e-01 : f32
    %4 = vector.broadcast %cst_2 : f32 to vector<1x256xf32>
    %5 = arith.maximumf %3, %4 : vector<1x256xf32>
    %6 = vector.broadcast %5 : vector<1x256xf32> to vector<3x256xf32>
    %7 = arith.subf %1, %6 : vector<3x256xf32>
    %8 = math.exp %7 : vector<3x256xf32>
    %cst_3 = arith.constant dense<0.000000e+00> : vector<256xf32>
    %9 = vector.multi_reduction <add>, %8, %cst_3 [0] : vector<3x256xf32> to vector<256xf32>
    %10 = vector.shape_cast %9 : vector<256xf32> to vector<1x256xf32>
    %cst_4 = arith.constant 1.000000e-01 : f32
    %11 = vector.broadcast %cst_4 : f32 to vector<1x256xf32>
    %12 = arith.subf %11, %5 : vector<1x256xf32>
    %13 = math.exp %12 : vector<1x256xf32>
    %14 = arith.addf %10, %13 : vector<1x256xf32>
    %15 = tpu.reciprocal %14 {approx = true} : vector<1x256xf32> -> vector<1x256xf32>
    %16 = vector.broadcast %15 : vector<1x256xf32> to vector<3x256xf32>
    %17 = arith.mulf %8, %16 : vector<3x256xf32>
    %c0_5 = arith.constant 0 : index
    %c0_6 = arith.constant 0 : index
    %c0_7 = arith.constant 0 : index
    %18 = vector.load %arg5[%c0_5, %c0_6, %c0_7] : memref<1x3x256xf32, #tpu.memory_space<vmem>>, vector<1x3x256xf32>
    %19 = vector.shape_cast %18 : vector<1x3x256xf32> to vector<3x256xf32>
    %20 = vector.shape_cast %17 : vector<3x256xf32> to vector<1x3x256xf32>
    tpu.vector_store %arg5[%c0_5, %c0_6, %c0_7], %20 {strides = array<i32>} : memref<1x3x256xf32, #tpu.memory_space<vmem>>, vector<1x3x256xf32>,
    %cst_8 = arith.constant dense<0.000000e+00> : vector<256xf32>
    %21 = vector.multi_reduction <add>, %17, %cst_8 [0] : vector<3x256xf32> to vector<256xf32>
    %22 = vector.shape_cast %21 : vector<256xf32> to vector<1x256xf32>
    %c0_9 = arith.constant 0 : index
    %c0_10 = arith.constant 0 : index
    %c0_11 = arith.constant 0 : index
    %23 = vector.load %arg6[%c0_9, %c0_10, %c0_11] : memref<1x1x256xf32, #tpu.memory_space<vmem>>, vector<1x1x256xf32>
    %24 = vector.shape_cast %23 : vector<1x1x256xf32> to vector<1x256xf32>
    %25 = vector.shape_cast %22 : vector<1x256xf32> to vector<1x1x256xf32>
    tpu.vector_store %arg6[%c0_9, %c0_10, %c0_11], %25 {strides = array<i32>} : memref<1x1x256xf32, #tpu.memory_space<vmem>>, vector<1x1x256xf32>,
    %c0_12 = arith.constant 0 : index
    %c0_13 = arith.constant 0 : index
    %c0_14 = arith.constant 0 : index
    %c0_15 = arith.constant 0 : index
    %26 = vector.load %arg2[%c0_12, %c0_13, %c0_14, %c0_15] : memref<1x3x3x256xf32, #tpu.memory_space<vmem>>, vector<1x3x3x256xf32>
    %27 = vector.shape_cast %26 : vector<1x3x3x256xf32> to vector<3x3x256xf32>
    %28 = arith.negf %27 : vector<3x3x256xf32>
    %29 = math.exp %28 : vector<3x3x256xf32>
    %cst_16 = arith.constant 1.000000e+00 : f32
    %30 = vector.broadcast %cst_16 : f32 to vector<3x3x256xf32>
    %31 = arith.addf %30, %29 : vector<3x3x256xf32>
    %32 = arith.divf %30, %31 : vector<3x3x256xf32>
    %33 = vector.shape_cast %17 : vector<3x256xf32> to vector<3x1x256xf32>
    %34 = vector.broadcast %33 : vector<3x1x256xf32> to vector<3x3x256xf32>
    %35 = arith.mulf %32, %34 : vector<3x3x256xf32>
    %cst_17 = arith.constant dense<0.000000e+00> : vector<3x256xf32>
    %36 = vector.multi_reduction <add>, %35, %cst_17 [0] : vector<3x3x256xf32> to vector<3x256xf32>
    %c0_18 = arith.constant 0 : index
    %c0_19 = arith.constant 0 : index
    %c0_20 = arith.constant 0 : index
    %37 = vector.load %arg7[%c0_18, %c0_19, %c0_20] : memref<1x3x256xf32, #tpu.memory_space<vmem>>, vector<1x3x256xf32>
    %38 = vector.shape_cast %37 : vector<1x3x256xf32> to vector<3x256xf32>
    %39 = vector.shape_cast %36 : vector<3x256xf32> to vector<1x3x256xf32>
    tpu.vector_store %arg7[%c0_18, %c0_19, %c0_20], %39 {strides = array<i32>} : memref<1x3x256xf32, #tpu.memory_space<vmem>>, vector<1x3x256xf32>,
    %c0_21 = arith.constant 0 : index
    %c0_22 = arith.constant 0 : index
    %c0_23 = arith.constant 0 : index
    %40 = vector.load %arg4[%c0_21, %c0_22, %c0_23] : memref<1x1x256xf32, #tpu.memory_space<vmem>>, vector<1x1x256xf32>
    %41 = vector.shape_cast %40 : vector<1x1x256xf32> to vector<1x256xf32>
    %cst_24 = arith.constant 1.000000e+00 : f32
    %42 = vector.broadcast %cst_24 : f32 to vector<1x256xf32>
    %43 = arith.subf %42, %41 : vector<1x256xf32>
    %44 = arith.subf %43, %22 : vector<1x256xf32>
    %cst_25 = arith.constant 0.000000e+00 : f32
    %cst_26 = arith.constant 1.000000e+00 : f32
    %45 = vector.broadcast %cst_25 : f32 to vector<1x256xf32>
    %46 = arith.maximumf %45, %44 : vector<1x256xf32>
    %47 = vector.broadcast %cst_26 : f32 to vector<1x256xf32>
    %48 = arith.minimumf %47, %46 : vector<1x256xf32>
    %c0_27 = arith.constant 0 : index
    %c0_28 = arith.constant 0 : index
    %c0_29 = arith.constant 0 : index
    %49 = vector.load %arg8[%c0_27, %c0_28, %c0_29] : memref<1x1x256xf32, #tpu.memory_space<vmem>>, vector<1x1x256xf32>
    %50 = vector.shape_cast %49 : vector<1x1x256xf32> to vector<1x256xf32>
    %51 = vector.shape_cast %48 : vector<1x256xf32> to vector<1x1x256xf32>
    tpu.vector_store %arg8[%c0_27, %c0_28, %c0_29], %51 {strides = array<i32>} : memref<1x1x256xf32, #tpu.memory_space<vmem>>, vector<1x1x256xf32>,
    %52 = arith.subf %41, %22 : vector<1x256xf32>
    %cst_30 = arith.constant 0.000000e+00 : f32
    %cst_31 = arith.constant 1.000000e+00 : f32
    %53 = vector.broadcast %cst_30 : f32 to vector<1x256xf32>
    %54 = arith.maximumf %53, %52 : vector<1x256xf32>
    %55 = vector.broadcast %cst_31 : f32 to vector<1x256xf32>
    %56 = arith.minimumf %55, %54 : vector<1x256xf32>
    %c0_32 = arith.constant 0 : index
    %c0_33 = arith.constant 0 : index
    %c0_34 = arith.constant 0 : index
    %57 = vector.load %arg9[%c0_32, %c0_33, %c0_34] : memref<1x1x256xf32, #tpu.memory_space<vmem>>, vector<1x1x256xf32>
    %58 = vector.shape_cast %57 : vector<1x1x256xf32> to vector<1x256xf32>
    %59 = vector.shape_cast %56 : vector<1x256xf32> to vector<1x1x256xf32>
    tpu.vector_store %arg9[%c0_32, %c0_33, %c0_34], %59 {strides = array<i32>} : memref<1x1x256xf32, #tpu.memory_space<vmem>>, vector<1x1x256xf32>,
    %c0_35 = arith.constant 0 : index
    %c0_36 = arith.constant 0 : index
    %c0_37 = arith.constant 0 : index
    %60 = vector.load %arg3[%c0_35, %c0_36, %c0_37] : memref<1x3x256xf32, #tpu.memory_space<vmem>>, vector<1x3x256xf32>
    %61 = vector.shape_cast %60 : vector<1x3x256xf32> to vector<3x256xf32>
    %62 = vector.broadcast %56 : vector<1x256xf32> to vector<3x256xf32>
    %63 = arith.mulf %61, %62 : vector<3x256xf32>
    %64 = arith.addf %63, %36 : vector<3x256xf32>
    %c0_38 = arith.constant 0 : index
    %c0_39 = arith.constant 0 : index
    %c0_40 = arith.constant 0 : index
    %65 = vector.load %arg10[%c0_38, %c0_39, %c0_40] : memref<1x3x256xf32, #tpu.memory_space<vmem>>, vector<1x3x256xf32>
    %66 = vector.shape_cast %65 : vector<1x3x256xf32> to vector<3x256xf32>
    %67 = vector.shape_cast %64 : vector<3x256xf32> to vector<1x3x256xf32>
    tpu.vector_store %arg10[%c0_38, %c0_39, %c0_40], %67 {strides = array<i32>} : memref<1x3x256xf32, #tpu.memory_space<vmem>>, vector<1x3x256xf32>,
    return
  }
  func.func @transform_0(%arg0: i32) -> (i32, i32, i32) {
    %c0_i32 = arith.constant 0 : i32
    %c0_i32_0 = arith.constant 0 : i32
    %c0_i32_1 = arith.constant 0 : i32
    return %arg0, %c0_i32, %c0_i32_0 : i32, i32, i32
  }
  func.func @transform_1(%arg0: i32) -> (i32, i32, i32, i32) {
    %c0_i32 = arith.constant 0 : i32
    %c0_i32_0 = arith.constant 0 : i32
    %c0_i32_1 = arith.constant 0 : i32
    %c0_i32_2 = arith.constant 0 : i32
    return %arg0, %c0_i32, %c0_i32_0, %c0_i32_1 : i32, i32, i32, i32
  }
  func.func @transform_2(%arg0: i32) -> (i32, i32, i32) {
    %c0_i32 = arith.constant 0 : i32
    %c0_i32_0 = arith.constant 0 : i32
    %c0_i32_1 = arith.constant 0 : i32
    return %arg0, %c0_i32, %c0_i32_0 : i32, i32, i32
  }
  func.func @transform_3(%arg0: i32) -> (i32, i32, i32) {
    %c0_i32 = arith.constant 0 : i32
    %c0_i32_0 = arith.constant 0 : i32
    %c0_i32_1 = arith.constant 0 : i32
    return %arg0, %c0_i32, %c0_i32_0 : i32, i32, i32
  }
  func.func @transform_4(%arg0: i32) -> (i32, i32, i32) {
    %c0_i32 = arith.constant 0 : i32
    %c0_i32_0 = arith.constant 0 : i32
    %c0_i32_1 = arith.constant 0 : i32
    return %arg0, %c0_i32, %c0_i32_0 : i32, i32, i32
  }
  func.func @transform_5(%arg0: i32) -> (i32, i32, i32) {
    %c0_i32 = arith.constant 0 : i32
    %c0_i32_0 = arith.constant 0 : i32
    %c0_i32_1 = arith.constant 0 : i32
    return %arg0, %c0_i32, %c0_i32_0 : i32, i32, i32
  }
  func.func @transform_6(%arg0: i32) -> (i32, i32, i32) {
    %c0_i32 = arith.constant 0 : i32
    %c0_i32_0 = arith.constant 0 : i32
    %c0_i32_1 = arith.constant 0 : i32
    return %arg0, %c0_i32, %c0_i32_0 : i32, i32, i32
  }
  func.func @transform_7(%arg0: i32) -> (i32, i32, i32) {
    %c0_i32 = arith.constant 0 : i32
    %c0_i32_0 = arith.constant 0 : i32
    %c0_i32_1 = arith.constant 0 : i32
    return %arg0, %c0_i32, %c0_i32_0 : i32, i32, i32
  }
  func.func @transform_8(%arg0: i32) -> (i32, i32, i32) {
    %c0_i32 = arith.constant 0 : i32
    %c0_i32_0 = arith.constant 0 : i32
    %c0_i32_1 = arith.constant 0 : i32
    return %arg0, %c0_i32, %c0_i32_0 : i32, i32, i32
  }
  func.func @transform_9(%arg0: i32) -> (i32, i32, i32) {
    %c0_i32 = arith.constant 0 : i32
    %c0_i32_0 = arith.constant 0 : i32
    %c0_i32_1 = arith.constant 0 : i32
    return %arg0, %c0_i32, %c0_i32_0 : i32, i32, i32
  }
}

module attributes {stable_mosaic.version = 11 : i64} {
  func.func @_conv3x3_kernel(%arg0: i32, %arg1: memref<1x16x342xbf16, #tpu.memory_space<vmem>>, %arg2: memref<32x144xbf16, #tpu.memory_space<vmem>>, %arg3: memref<32x1xf32, #tpu.memory_space<vmem>>, %arg4: memref<1x32x288xf32, #tpu.memory_space<vmem>>) attributes {dimension_semantics = [#tpu.dimension_semantics<parallel>], iteration_bounds = array<i64: 2>, scalar_prefetch = 0 : i64, scratch_operands = 0 : i64, tpu.core_type = #tpu.core_type<tc>, window_params = [{transform_indices = @transform_0, window_bounds = array<i64: 1, 16, 342>}, {pipeline_mode = #tpu.pipeline_mode<synchronous>, transform_indices = @transform_1, window_bounds = array<i64: 32, 144>}, {pipeline_mode = #tpu.pipeline_mode<synchronous>, transform_indices = @transform_2, window_bounds = array<i64: 32, 1>}, {transform_indices = @transform_3, window_bounds = array<i64: 1, 32, 288>}]} {
    %c0 = arith.constant 0 : index
    %c0_0 = arith.constant 0 : index
    %c0_1 = arith.constant 0 : index
    %0 = vector.load %arg1[%c0, %c0_0, %c0_1] : memref<1x16x342xbf16, #tpu.memory_space<vmem>>, vector<1x16x342xbf16>
    %1 = vector.shape_cast %0 : vector<1x16x342xbf16> to vector<16x342xbf16>
    %c0_2 = arith.constant 0 : index
    %c0_3 = arith.constant 0 : index
    %2 = vector.load %arg2[%c0_2, %c0_3] : memref<32x144xbf16, #tpu.memory_space<vmem>>, vector<32x144xbf16>
    %c0_4 = arith.constant 0 : index
    %c0_5 = arith.constant 0 : index
    %3 = vector.load %arg3[%c0_4, %c0_5] : memref<32x1xf32, #tpu.memory_space<vmem>>, vector<32x1xf32>
    %4 = vector.extract_strided_slice %1 {offsets = [0, 0], sizes = [16, 288], strides = [1, 1]} : vector<16x342xbf16> to vector<16x288xbf16>
    %5 = vector.extract_strided_slice %1 {offsets = [0, 1], sizes = [16, 288], strides = [1, 1]} : vector<16x342xbf16> to vector<16x288xbf16>
    %6 = vector.extract_strided_slice %1 {offsets = [0, 2], sizes = [16, 288], strides = [1, 1]} : vector<16x342xbf16> to vector<16x288xbf16>
    %7 = vector.extract_strided_slice %1 {offsets = [0, 18], sizes = [16, 288], strides = [1, 1]} : vector<16x342xbf16> to vector<16x288xbf16>
    %8 = vector.extract_strided_slice %1 {offsets = [0, 19], sizes = [16, 288], strides = [1, 1]} : vector<16x342xbf16> to vector<16x288xbf16>
    %9 = vector.extract_strided_slice %1 {offsets = [0, 20], sizes = [16, 288], strides = [1, 1]} : vector<16x342xbf16> to vector<16x288xbf16>
    %10 = vector.extract_strided_slice %1 {offsets = [0, 36], sizes = [16, 288], strides = [1, 1]} : vector<16x342xbf16> to vector<16x288xbf16>
    %11 = vector.extract_strided_slice %1 {offsets = [0, 37], sizes = [16, 288], strides = [1, 1]} : vector<16x342xbf16> to vector<16x288xbf16>
    %12 = vector.extract_strided_slice %1 {offsets = [0, 38], sizes = [16, 288], strides = [1, 1]} : vector<16x342xbf16> to vector<16x288xbf16>
    %13 = tpu.concatenate %4, %5, %6, %7, %8, %9, %10, %11, %12 in 0 : vector<16x288xbf16>, vector<16x288xbf16>, vector<16x288xbf16>, vector<16x288xbf16>, vector<16x288xbf16>, vector<16x288xbf16>, vector<16x288xbf16>, vector<16x288xbf16>, vector<16x288xbf16> -> vector<144x288xbf16>
    %cst = arith.constant dense<0.000000e+00> : vector<32x288xf32>
    %14 = tpu.matmul %2, %13, %cst {dimension_numbers = #tpu.dot_dimension_numbers<[1], [0], [0], [1], [0, 0, 1, 1], [], []>} : vector<32x144xbf16>, vector<144x288xbf16>, vector<32x288xf32> -> vector<32x288xf32>
    %15 = vector.broadcast %3 : vector<32x1xf32> to vector<32x288xf32>
    %16 = arith.addf %14, %15 : vector<32x288xf32>
    %cst_6 = arith.constant 0.000000e+00 : f32
    %17 = vector.broadcast %cst_6 : f32 to vector<32x288xf32>
    %18 = arith.maximumf %16, %17 : vector<32x288xf32>
    %c0_7 = arith.constant 0 : index
    %c0_8 = arith.constant 0 : index
    %c0_9 = arith.constant 0 : index
    %19 = vector.load %arg4[%c0_7, %c0_8, %c0_9] : memref<1x32x288xf32, #tpu.memory_space<vmem>>, vector<1x32x288xf32>
    %20 = vector.shape_cast %19 : vector<1x32x288xf32> to vector<32x288xf32>
    %21 = vector.shape_cast %18 : vector<32x288xf32> to vector<1x32x288xf32>
    tpu.vector_store %arg4[%c0_7, %c0_8, %c0_9], %21 {strides = array<i32>} : memref<1x32x288xf32, #tpu.memory_space<vmem>>, vector<1x32x288xf32>,
    return
  }
  func.func @transform_0(%arg0: i32) -> (i32, i32, i32) {
    %c0_i32 = arith.constant 0 : i32
    %c0_i32_0 = arith.constant 0 : i32
    %c0_i32_1 = arith.constant 0 : i32
    return %arg0, %c0_i32, %c0_i32_0 : i32, i32, i32
  }
  func.func @transform_1(%arg0: i32) -> (i32, i32) {
    %c0_i32 = arith.constant 0 : i32
    %c0_i32_0 = arith.constant 0 : i32
    %c0_i32_1 = arith.constant 0 : i32
    return %c0_i32, %c0_i32_0 : i32, i32
  }
  func.func @transform_2(%arg0: i32) -> (i32, i32) {
    %c0_i32 = arith.constant 0 : i32
    %c0_i32_0 = arith.constant 0 : i32
    %c0_i32_1 = arith.constant 0 : i32
    return %c0_i32, %c0_i32_0 : i32, i32
  }
  func.func @transform_3(%arg0: i32) -> (i32, i32, i32) {
    %c0_i32 = arith.constant 0 : i32
    %c0_i32_0 = arith.constant 0 : i32
    %c0_i32_1 = arith.constant 0 : i32
    return %arg0, %c0_i32, %c0_i32_0 : i32, i32, i32
  }
}

module attributes {stable_mosaic.version = 11 : i64} {
  func.func @_conv3x3_kernel(%arg0: i32, %arg1: memref<1x32x110xbf16, #tpu.memory_space<vmem>>, %arg2: memref<32x288xbf16, #tpu.memory_space<vmem>>, %arg3: memref<32x1xf32, #tpu.memory_space<vmem>>, %arg4: memref<1x32x80xf32, #tpu.memory_space<vmem>>) attributes {dimension_semantics = [#tpu.dimension_semantics<parallel>], iteration_bounds = array<i64: 2>, scalar_prefetch = 0 : i64, scratch_operands = 0 : i64, tpu.core_type = #tpu.core_type<tc>, window_params = [{transform_indices = @transform_0, window_bounds = array<i64: 1, 32, 110>}, {pipeline_mode = #tpu.pipeline_mode<synchronous>, transform_indices = @transform_1, window_bounds = array<i64: 32, 288>}, {pipeline_mode = #tpu.pipeline_mode<synchronous>, transform_indices = @transform_2, window_bounds = array<i64: 32, 1>}, {transform_indices = @transform_3, window_bounds = array<i64: 1, 32, 80>}]} {
    %c0 = arith.constant 0 : index
    %c0_0 = arith.constant 0 : index
    %c0_1 = arith.constant 0 : index
    %0 = vector.load %arg1[%c0, %c0_0, %c0_1] : memref<1x32x110xbf16, #tpu.memory_space<vmem>>, vector<1x32x110xbf16>
    %1 = vector.shape_cast %0 : vector<1x32x110xbf16> to vector<32x110xbf16>
    %c0_2 = arith.constant 0 : index
    %c0_3 = arith.constant 0 : index
    %2 = vector.load %arg2[%c0_2, %c0_3] : memref<32x288xbf16, #tpu.memory_space<vmem>>, vector<32x288xbf16>
    %c0_4 = arith.constant 0 : index
    %c0_5 = arith.constant 0 : index
    %3 = vector.load %arg3[%c0_4, %c0_5] : memref<32x1xf32, #tpu.memory_space<vmem>>, vector<32x1xf32>
    %4 = vector.extract_strided_slice %1 {offsets = [0, 0], sizes = [32, 80], strides = [1, 1]} : vector<32x110xbf16> to vector<32x80xbf16>
    %5 = vector.extract_strided_slice %1 {offsets = [0, 1], sizes = [32, 80], strides = [1, 1]} : vector<32x110xbf16> to vector<32x80xbf16>
    %6 = vector.extract_strided_slice %1 {offsets = [0, 2], sizes = [32, 80], strides = [1, 1]} : vector<32x110xbf16> to vector<32x80xbf16>
    %7 = vector.extract_strided_slice %1 {offsets = [0, 10], sizes = [32, 80], strides = [1, 1]} : vector<32x110xbf16> to vector<32x80xbf16>
    %8 = vector.extract_strided_slice %1 {offsets = [0, 11], sizes = [32, 80], strides = [1, 1]} : vector<32x110xbf16> to vector<32x80xbf16>
    %9 = vector.extract_strided_slice %1 {offsets = [0, 12], sizes = [32, 80], strides = [1, 1]} : vector<32x110xbf16> to vector<32x80xbf16>
    %10 = vector.extract_strided_slice %1 {offsets = [0, 20], sizes = [32, 80], strides = [1, 1]} : vector<32x110xbf16> to vector<32x80xbf16>
    %11 = vector.extract_strided_slice %1 {offsets = [0, 21], sizes = [32, 80], strides = [1, 1]} : vector<32x110xbf16> to vector<32x80xbf16>
    %12 = vector.extract_strided_slice %1 {offsets = [0, 22], sizes = [32, 80], strides = [1, 1]} : vector<32x110xbf16> to vector<32x80xbf16>
    %13 = tpu.concatenate %4, %5, %6, %7, %8, %9, %10, %11, %12 in 0 : vector<32x80xbf16>, vector<32x80xbf16>, vector<32x80xbf16>, vector<32x80xbf16>, vector<32x80xbf16>, vector<32x80xbf16>, vector<32x80xbf16>, vector<32x80xbf16>, vector<32x80xbf16> -> vector<288x80xbf16>
    %cst = arith.constant dense<0.000000e+00> : vector<32x80xf32>
    %14 = tpu.matmul %2, %13, %cst {dimension_numbers = #tpu.dot_dimension_numbers<[1], [0], [0], [1], [0, 0, 1, 1], [], []>} : vector<32x288xbf16>, vector<288x80xbf16>, vector<32x80xf32> -> vector<32x80xf32>
    %15 = vector.broadcast %3 : vector<32x1xf32> to vector<32x80xf32>
    %16 = arith.addf %14, %15 : vector<32x80xf32>
    %cst_6 = arith.constant 0.000000e+00 : f32
    %17 = vector.broadcast %cst_6 : f32 to vector<32x80xf32>
    %18 = arith.maximumf %16, %17 : vector<32x80xf32>
    %c0_7 = arith.constant 0 : index
    %c0_8 = arith.constant 0 : index
    %c0_9 = arith.constant 0 : index
    %19 = vector.load %arg4[%c0_7, %c0_8, %c0_9] : memref<1x32x80xf32, #tpu.memory_space<vmem>>, vector<1x32x80xf32>
    %20 = vector.shape_cast %19 : vector<1x32x80xf32> to vector<32x80xf32>
    %21 = vector.shape_cast %18 : vector<32x80xf32> to vector<1x32x80xf32>
    tpu.vector_store %arg4[%c0_7, %c0_8, %c0_9], %21 {strides = array<i32>} : memref<1x32x80xf32, #tpu.memory_space<vmem>>, vector<1x32x80xf32>,
    return
  }
  func.func @transform_0(%arg0: i32) -> (i32, i32, i32) {
    %c0_i32 = arith.constant 0 : i32
    %c0_i32_0 = arith.constant 0 : i32
    %c0_i32_1 = arith.constant 0 : i32
    return %arg0, %c0_i32, %c0_i32_0 : i32, i32, i32
  }
  func.func @transform_1(%arg0: i32) -> (i32, i32) {
    %c0_i32 = arith.constant 0 : i32
    %c0_i32_0 = arith.constant 0 : i32
    %c0_i32_1 = arith.constant 0 : i32
    return %c0_i32, %c0_i32_0 : i32, i32
  }
  func.func @transform_2(%arg0: i32) -> (i32, i32) {
    %c0_i32 = arith.constant 0 : i32
    %c0_i32_0 = arith.constant 0 : i32
    %c0_i32_1 = arith.constant 0 : i32
    return %c0_i32, %c0_i32_0 : i32, i32
  }
  func.func @transform_3(%arg0: i32) -> (i32, i32, i32) {
    %c0_i32 = arith.constant 0 : i32
    %c0_i32_0 = arith.constant 0 : i32
    %c0_i32_1 = arith.constant 0 : i32
    return %arg0, %c0_i32, %c0_i32_0 : i32, i32, i32
  }
}

module attributes {stable_mosaic.version = 11 : i64} {
  func.func @_conv3x3_kernel(%arg0: i32, %arg1: memref<1x32x42xbf16, #tpu.memory_space<vmem>>, %arg2: memref<32x288xbf16, #tpu.memory_space<vmem>>, %arg3: memref<32x1xf32, #tpu.memory_space<vmem>>, %arg4: memref<1x32x24xf32, #tpu.memory_space<vmem>>) attributes {dimension_semantics = [#tpu.dimension_semantics<parallel>], iteration_bounds = array<i64: 2>, scalar_prefetch = 0 : i64, scratch_operands = 0 : i64, tpu.core_type = #tpu.core_type<tc>, window_params = [{transform_indices = @transform_0, window_bounds = array<i64: 1, 32, 42>}, {pipeline_mode = #tpu.pipeline_mode<synchronous>, transform_indices = @transform_1, window_bounds = array<i64: 32, 288>}, {pipeline_mode = #tpu.pipeline_mode<synchronous>, transform_indices = @transform_2, window_bounds = array<i64: 32, 1>}, {transform_indices = @transform_3, window_bounds = array<i64: 1, 32, 24>}]} {
    %c0 = arith.constant 0 : index
    %c0_0 = arith.constant 0 : index
    %c0_1 = arith.constant 0 : index
    %0 = vector.load %arg1[%c0, %c0_0, %c0_1] : memref<1x32x42xbf16, #tpu.memory_space<vmem>>, vector<1x32x42xbf16>
    %1 = vector.shape_cast %0 : vector<1x32x42xbf16> to vector<32x42xbf16>
    %c0_2 = arith.constant 0 : index
    %c0_3 = arith.constant 0 : index
    %2 = vector.load %arg2[%c0_2, %c0_3] : memref<32x288xbf16, #tpu.memory_space<vmem>>, vector<32x288xbf16>
    %c0_4 = arith.constant 0 : index
    %c0_5 = arith.constant 0 : index
    %3 = vector.load %arg3[%c0_4, %c0_5] : memref<32x1xf32, #tpu.memory_space<vmem>>, vector<32x1xf32>
    %4 = vector.extract_strided_slice %1 {offsets = [0, 0], sizes = [32, 24], strides = [1, 1]} : vector<32x42xbf16> to vector<32x24xbf16>
    %5 = vector.extract_strided_slice %1 {offsets = [0, 1], sizes = [32, 24], strides = [1, 1]} : vector<32x42xbf16> to vector<32x24xbf16>
    %6 = vector.extract_strided_slice %1 {offsets = [0, 2], sizes = [32, 24], strides = [1, 1]} : vector<32x42xbf16> to vector<32x24xbf16>
    %7 = vector.extract_strided_slice %1 {offsets = [0, 6], sizes = [32, 24], strides = [1, 1]} : vector<32x42xbf16> to vector<32x24xbf16>
    %8 = vector.extract_strided_slice %1 {offsets = [0, 7], sizes = [32, 24], strides = [1, 1]} : vector<32x42xbf16> to vector<32x24xbf16>
    %9 = vector.extract_strided_slice %1 {offsets = [0, 8], sizes = [32, 24], strides = [1, 1]} : vector<32x42xbf16> to vector<32x24xbf16>
    %10 = vector.extract_strided_slice %1 {offsets = [0, 12], sizes = [32, 24], strides = [1, 1]} : vector<32x42xbf16> to vector<32x24xbf16>
    %11 = vector.extract_strided_slice %1 {offsets = [0, 13], sizes = [32, 24], strides = [1, 1]} : vector<32x42xbf16> to vector<32x24xbf16>
    %12 = vector.extract_strided_slice %1 {offsets = [0, 14], sizes = [32, 24], strides = [1, 1]} : vector<32x42xbf16> to vector<32x24xbf16>
    %13 = tpu.concatenate %4, %5, %6, %7, %8, %9, %10, %11, %12 in 0 : vector<32x24xbf16>, vector<32x24xbf16>, vector<32x24xbf16>, vector<32x24xbf16>, vector<32x24xbf16>, vector<32x24xbf16>, vector<32x24xbf16>, vector<32x24xbf16>, vector<32x24xbf16> -> vector<288x24xbf16>
    %cst = arith.constant dense<0.000000e+00> : vector<32x24xf32>
    %14 = tpu.matmul %2, %13, %cst {dimension_numbers = #tpu.dot_dimension_numbers<[1], [0], [0], [1], [0, 0, 1, 1], [], []>} : vector<32x288xbf16>, vector<288x24xbf16>, vector<32x24xf32> -> vector<32x24xf32>
    %15 = vector.broadcast %3 : vector<32x1xf32> to vector<32x24xf32>
    %16 = arith.addf %14, %15 : vector<32x24xf32>
    %cst_6 = arith.constant 0.000000e+00 : f32
    %17 = vector.broadcast %cst_6 : f32 to vector<32x24xf32>
    %18 = arith.maximumf %16, %17 : vector<32x24xf32>
    %c0_7 = arith.constant 0 : index
    %c0_8 = arith.constant 0 : index
    %c0_9 = arith.constant 0 : index
    %19 = vector.load %arg4[%c0_7, %c0_8, %c0_9] : memref<1x32x24xf32, #tpu.memory_space<vmem>>, vector<1x32x24xf32>
    %20 = vector.shape_cast %19 : vector<1x32x24xf32> to vector<32x24xf32>
    %21 = vector.shape_cast %18 : vector<32x24xf32> to vector<1x32x24xf32>
    tpu.vector_store %arg4[%c0_7, %c0_8, %c0_9], %21 {strides = array<i32>} : memref<1x32x24xf32, #tpu.memory_space<vmem>>, vector<1x32x24xf32>,
    return
  }
  func.func @transform_0(%arg0: i32) -> (i32, i32, i32) {
    %c0_i32 = arith.constant 0 : i32
    %c0_i32_0 = arith.constant 0 : i32
    %c0_i32_1 = arith.constant 0 : i32
    return %arg0, %c0_i32, %c0_i32_0 : i32, i32, i32
  }
  func.func @transform_1(%arg0: i32) -> (i32, i32) {
    %c0_i32 = arith.constant 0 : i32
    %c0_i32_0 = arith.constant 0 : i32
    %c0_i32_1 = arith.constant 0 : i32
    return %c0_i32, %c0_i32_0 : i32, i32
  }
  func.func @transform_2(%arg0: i32) -> (i32, i32) {
    %c0_i32 = arith.constant 0 : i32
    %c0_i32_0 = arith.constant 0 : i32
    %c0_i32_1 = arith.constant 0 : i32
    return %c0_i32, %c0_i32_0 : i32, i32
  }
  func.func @transform_3(%arg0: i32) -> (i32, i32, i32) {
    %c0_i32 = arith.constant 0 : i32
    %c0_i32_0 = arith.constant 0 : i32
    %c0_i32_1 = arith.constant 0 : i32
    return %arg0, %c0_i32, %c0_i32_0 : i32, i32, i32
  }
}

module attributes {stable_mosaic.version = 11 : i64} {
  func.func @_conv3x3_kernel(%arg0: i32, %arg1: memref<1x32x342xbf16, #tpu.memory_space<vmem>>, %arg2: memref<32x288xbf16, #tpu.memory_space<vmem>>, %arg3: memref<32x1xf32, #tpu.memory_space<vmem>>, %arg4: memref<1x32x288xf32, #tpu.memory_space<vmem>>) attributes {dimension_semantics = [#tpu.dimension_semantics<parallel>], iteration_bounds = array<i64: 2>, scalar_prefetch = 0 : i64, scratch_operands = 0 : i64, tpu.core_type = #tpu.core_type<tc>, window_params = [{transform_indices = @transform_0, window_bounds = array<i64: 1, 32, 342>}, {pipeline_mode = #tpu.pipeline_mode<synchronous>, transform_indices = @transform_1, window_bounds = array<i64: 32, 288>}, {pipeline_mode = #tpu.pipeline_mode<synchronous>, transform_indices = @transform_2, window_bounds = array<i64: 32, 1>}, {transform_indices = @transform_3, window_bounds = array<i64: 1, 32, 288>}]} {
    %c0 = arith.constant 0 : index
    %c0_0 = arith.constant 0 : index
    %c0_1 = arith.constant 0 : index
    %0 = vector.load %arg1[%c0, %c0_0, %c0_1] : memref<1x32x342xbf16, #tpu.memory_space<vmem>>, vector<1x32x342xbf16>
    %1 = vector.shape_cast %0 : vector<1x32x342xbf16> to vector<32x342xbf16>
    %c0_2 = arith.constant 0 : index
    %c0_3 = arith.constant 0 : index
    %2 = vector.load %arg2[%c0_2, %c0_3] : memref<32x288xbf16, #tpu.memory_space<vmem>>, vector<32x288xbf16>
    %c0_4 = arith.constant 0 : index
    %c0_5 = arith.constant 0 : index
    %3 = vector.load %arg3[%c0_4, %c0_5] : memref<32x1xf32, #tpu.memory_space<vmem>>, vector<32x1xf32>
    %4 = vector.extract_strided_slice %1 {offsets = [0, 0], sizes = [32, 288], strides = [1, 1]} : vector<32x342xbf16> to vector<32x288xbf16>
    %5 = vector.extract_strided_slice %1 {offsets = [0, 1], sizes = [32, 288], strides = [1, 1]} : vector<32x342xbf16> to vector<32x288xbf16>
    %6 = vector.extract_strided_slice %1 {offsets = [0, 2], sizes = [32, 288], strides = [1, 1]} : vector<32x342xbf16> to vector<32x288xbf16>
    %7 = vector.extract_strided_slice %1 {offsets = [0, 18], sizes = [32, 288], strides = [1, 1]} : vector<32x342xbf16> to vector<32x288xbf16>
    %8 = vector.extract_strided_slice %1 {offsets = [0, 19], sizes = [32, 288], strides = [1, 1]} : vector<32x342xbf16> to vector<32x288xbf16>
    %9 = vector.extract_strided_slice %1 {offsets = [0, 20], sizes = [32, 288], strides = [1, 1]} : vector<32x342xbf16> to vector<32x288xbf16>
    %10 = vector.extract_strided_slice %1 {offsets = [0, 36], sizes = [32, 288], strides = [1, 1]} : vector<32x342xbf16> to vector<32x288xbf16>
    %11 = vector.extract_strided_slice %1 {offsets = [0, 37], sizes = [32, 288], strides = [1, 1]} : vector<32x342xbf16> to vector<32x288xbf16>
    %12 = vector.extract_strided_slice %1 {offsets = [0, 38], sizes = [32, 288], strides = [1, 1]} : vector<32x342xbf16> to vector<32x288xbf16>
    %13 = tpu.concatenate %4, %5, %6, %7, %8, %9, %10, %11, %12 in 0 : vector<32x288xbf16>, vector<32x288xbf16>, vector<32x288xbf16>, vector<32x288xbf16>, vector<32x288xbf16>, vector<32x288xbf16>, vector<32x288xbf16>, vector<32x288xbf16>, vector<32x288xbf16> -> vector<288x288xbf16>
    %cst = arith.constant dense<0.000000e+00> : vector<32x288xf32>
    %14 = tpu.matmul %2, %13, %cst {dimension_numbers = #tpu.dot_dimension_numbers<[1], [0], [0], [1], [0, 0, 1, 1], [], []>} : vector<32x288xbf16>, vector<288x288xbf16>, vector<32x288xf32> -> vector<32x288xf32>
    %15 = vector.broadcast %3 : vector<32x1xf32> to vector<32x288xf32>
    %16 = arith.addf %14, %15 : vector<32x288xf32>
    %cst_6 = arith.constant 0.000000e+00 : f32
    %17 = vector.broadcast %cst_6 : f32 to vector<32x288xf32>
    %18 = arith.maximumf %16, %17 : vector<32x288xf32>
    %c0_7 = arith.constant 0 : index
    %c0_8 = arith.constant 0 : index
    %c0_9 = arith.constant 0 : index
    %19 = vector.load %arg4[%c0_7, %c0_8, %c0_9] : memref<1x32x288xf32, #tpu.memory_space<vmem>>, vector<1x32x288xf32>
    %20 = vector.shape_cast %19 : vector<1x32x288xf32> to vector<32x288xf32>
    %21 = vector.shape_cast %18 : vector<32x288xf32> to vector<1x32x288xf32>
    tpu.vector_store %arg4[%c0_7, %c0_8, %c0_9], %21 {strides = array<i32>} : memref<1x32x288xf32, #tpu.memory_space<vmem>>, vector<1x32x288xf32>,
    return
  }
  func.func @transform_0(%arg0: i32) -> (i32, i32, i32) {
    %c0_i32 = arith.constant 0 : i32
    %c0_i32_0 = arith.constant 0 : i32
    %c0_i32_1 = arith.constant 0 : i32
    return %arg0, %c0_i32, %c0_i32_0 : i32, i32, i32
  }
  func.func @transform_1(%arg0: i32) -> (i32, i32) {
    %c0_i32 = arith.constant 0 : i32
    %c0_i32_0 = arith.constant 0 : i32
    %c0_i32_1 = arith.constant 0 : i32
    return %c0_i32, %c0_i32_0 : i32, i32
  }
  func.func @transform_2(%arg0: i32) -> (i32, i32) {
    %c0_i32 = arith.constant 0 : i32
    %c0_i32_0 = arith.constant 0 : i32
    %c0_i32_1 = arith.constant 0 : i32
    return %c0_i32, %c0_i32_0 : i32, i32
  }
  func.func @transform_3(%arg0: i32) -> (i32, i32, i32) {
    %c0_i32 = arith.constant 0 : i32
    %c0_i32_0 = arith.constant 0 : i32
    %c0_i32_1 = arith.constant 0 : i32
    return %arg0, %c0_i32, %c0_i32_0 : i32, i32, i32
  }
}

module attributes {stable_mosaic.version = 11 : i64} {
  func.func @_conv3x3_blend_kernel(%arg0: i32, %arg1: memref<1x32x342xbf16, #tpu.memory_space<vmem>>, %arg2: memref<3x288xbf16, #tpu.memory_space<vmem>>, %arg3: memref<3x1xf32, #tpu.memory_space<vmem>>, %arg4: memref<1x3x288xf32, #tpu.memory_space<vmem>>, %arg5: memref<1x1x288xf32, #tpu.memory_space<vmem>>, %arg6: memref<1x3x288xf32, #tpu.memory_space<vmem>>, %arg7: memref<1x3x288xf32, #tpu.memory_space<vmem>>) attributes {dimension_semantics = [#tpu.dimension_semantics<parallel>], iteration_bounds = array<i64: 2>, scalar_prefetch = 0 : i64, scratch_operands = 0 : i64, tpu.core_type = #tpu.core_type<tc>, window_params = [{transform_indices = @transform_0, window_bounds = array<i64: 1, 32, 342>}, {pipeline_mode = #tpu.pipeline_mode<synchronous>, transform_indices = @transform_1, window_bounds = array<i64: 3, 288>}, {pipeline_mode = #tpu.pipeline_mode<synchronous>, transform_indices = @transform_2, window_bounds = array<i64: 3, 1>}, {transform_indices = @transform_3, window_bounds = array<i64: 1, 3, 288>}, {transform_indices = @transform_4, window_bounds = array<i64: 1, 1, 288>}, {transform_indices = @transform_5, window_bounds = array<i64: 1, 3, 288>}, {transform_indices = @transform_6, window_bounds = array<i64: 1, 3, 288>}]} {
    %c0 = arith.constant 0 : index
    %c0_0 = arith.constant 0 : index
    %c0_1 = arith.constant 0 : index
    %0 = vector.load %arg1[%c0, %c0_0, %c0_1] : memref<1x32x342xbf16, #tpu.memory_space<vmem>>, vector<1x32x342xbf16>
    %1 = vector.shape_cast %0 : vector<1x32x342xbf16> to vector<32x342xbf16>
    %c0_2 = arith.constant 0 : index
    %c0_3 = arith.constant 0 : index
    %2 = vector.load %arg2[%c0_2, %c0_3] : memref<3x288xbf16, #tpu.memory_space<vmem>>, vector<3x288xbf16>
    %c0_4 = arith.constant 0 : index
    %c0_5 = arith.constant 0 : index
    %3 = vector.load %arg3[%c0_4, %c0_5] : memref<3x1xf32, #tpu.memory_space<vmem>>, vector<3x1xf32>
    %4 = vector.extract_strided_slice %1 {offsets = [0, 0], sizes = [32, 288], strides = [1, 1]} : vector<32x342xbf16> to vector<32x288xbf16>
    %5 = vector.extract_strided_slice %1 {offsets = [0, 1], sizes = [32, 288], strides = [1, 1]} : vector<32x342xbf16> to vector<32x288xbf16>
    %6 = vector.extract_strided_slice %1 {offsets = [0, 2], sizes = [32, 288], strides = [1, 1]} : vector<32x342xbf16> to vector<32x288xbf16>
    %7 = vector.extract_strided_slice %1 {offsets = [0, 18], sizes = [32, 288], strides = [1, 1]} : vector<32x342xbf16> to vector<32x288xbf16>
    %8 = vector.extract_strided_slice %1 {offsets = [0, 19], sizes = [32, 288], strides = [1, 1]} : vector<32x342xbf16> to vector<32x288xbf16>
    %9 = vector.extract_strided_slice %1 {offsets = [0, 20], sizes = [32, 288], strides = [1, 1]} : vector<32x342xbf16> to vector<32x288xbf16>
    %10 = vector.extract_strided_slice %1 {offsets = [0, 36], sizes = [32, 288], strides = [1, 1]} : vector<32x342xbf16> to vector<32x288xbf16>
    %11 = vector.extract_strided_slice %1 {offsets = [0, 37], sizes = [32, 288], strides = [1, 1]} : vector<32x342xbf16> to vector<32x288xbf16>
    %12 = vector.extract_strided_slice %1 {offsets = [0, 38], sizes = [32, 288], strides = [1, 1]} : vector<32x342xbf16> to vector<32x288xbf16>
    %13 = tpu.concatenate %4, %5, %6, %7, %8, %9, %10, %11, %12 in 0 : vector<32x288xbf16>, vector<32x288xbf16>, vector<32x288xbf16>, vector<32x288xbf16>, vector<32x288xbf16>, vector<32x288xbf16>, vector<32x288xbf16>, vector<32x288xbf16>, vector<32x288xbf16> -> vector<288x288xbf16>
    %cst = arith.constant dense<0.000000e+00> : vector<3x288xf32>
    %14 = tpu.matmul %2, %13, %cst {dimension_numbers = #tpu.dot_dimension_numbers<[1], [0], [0], [1], [0, 0, 1, 1], [], []>} : vector<3x288xbf16>, vector<288x288xbf16>, vector<3x288xf32> -> vector<3x288xf32>
    %15 = vector.broadcast %3 : vector<3x1xf32> to vector<3x288xf32>
    %16 = arith.addf %14, %15 : vector<3x288xf32>
    %17 = arith.negf %16 : vector<3x288xf32>
    %18 = math.exp %17 : vector<3x288xf32>
    %cst_6 = arith.constant 1.000000e+00 : f32
    %19 = vector.broadcast %cst_6 : f32 to vector<3x288xf32>
    %20 = arith.addf %19, %18 : vector<3x288xf32>
    %21 = arith.divf %19, %20 : vector<3x288xf32>
    %c0_7 = arith.constant 0 : index
    %c0_8 = arith.constant 0 : index
    %c0_9 = arith.constant 0 : index
    %22 = vector.load %arg7[%c0_7, %c0_8, %c0_9] : memref<1x3x288xf32, #tpu.memory_space<vmem>>, vector<1x3x288xf32>
    %23 = vector.shape_cast %22 : vector<1x3x288xf32> to vector<3x288xf32>
    %24 = vector.shape_cast %21 : vector<3x288xf32> to vector<1x3x288xf32>
    tpu.vector_store %arg7[%c0_7, %c0_8, %c0_9], %24 {strides = array<i32>} : memref<1x3x288xf32, #tpu.memory_space<vmem>>, vector<1x3x288xf32>,
    %c0_10 = arith.constant 0 : index
    %c0_11 = arith.constant 0 : index
    %c0_12 = arith.constant 0 : index
    %25 = vector.load %arg4[%c0_10, %c0_11, %c0_12] : memref<1x3x288xf32, #tpu.memory_space<vmem>>, vector<1x3x288xf32>
    %26 = vector.shape_cast %25 : vector<1x3x288xf32> to vector<3x288xf32>
    %c0_13 = arith.constant 0 : index
    %c0_14 = arith.constant 0 : index
    %c0_15 = arith.constant 0 : index
    %27 = vector.load %arg5[%c0_13, %c0_14, %c0_15] : memref<1x1x288xf32, #tpu.memory_space<vmem>>, vector<1x1x288xf32>
    %28 = vector.shape_cast %27 : vector<1x1x288xf32> to vector<1x288xf32>
    %29 = vector.broadcast %28 : vector<1x288xf32> to vector<3x288xf32>
    %30 = arith.mulf %29, %21 : vector<3x288xf32>
    %31 = arith.addf %26, %30 : vector<3x288xf32>
    %c0_16 = arith.constant 0 : index
    %c0_17 = arith.constant 0 : index
    %c0_18 = arith.constant 0 : index
    %32 = vector.load %arg6[%c0_16, %c0_17, %c0_18] : memref<1x3x288xf32, #tpu.memory_space<vmem>>, vector<1x3x288xf32>
    %33 = vector.shape_cast %32 : vector<1x3x288xf32> to vector<3x288xf32>
    %34 = vector.shape_cast %31 : vector<3x288xf32> to vector<1x3x288xf32>
    tpu.vector_store %arg6[%c0_16, %c0_17, %c0_18], %34 {strides = array<i32>} : memref<1x3x288xf32, #tpu.memory_space<vmem>>, vector<1x3x288xf32>,
    return
  }
  func.func @transform_0(%arg0: i32) -> (i32, i32, i32) {
    %c0_i32 = arith.constant 0 : i32
    %c0_i32_0 = arith.constant 0 : i32
    %c0_i32_1 = arith.constant 0 : i32
    return %arg0, %c0_i32, %c0_i32_0 : i32, i32, i32
  }
  func.func @transform_1(%arg0: i32) -> (i32, i32) {
    %c0_i32 = arith.constant 0 : i32
    %c0_i32_0 = arith.constant 0 : i32
    %c0_i32_1 = arith.constant 0 : i32
    return %c0_i32, %c0_i32_0 : i32, i32
  }
  func.func @transform_2(%arg0: i32) -> (i32, i32) {
    %c0_i32 = arith.constant 0 : i32
    %c0_i32_0 = arith.constant 0 : i32
    %c0_i32_1 = arith.constant 0 : i32
    return %c0_i32, %c0_i32_0 : i32, i32
  }
  func.func @transform_3(%arg0: i32) -> (i32, i32, i32) {
    %c0_i32 = arith.constant 0 : i32
    %c0_i32_0 = arith.constant 0 : i32
    %c0_i32_1 = arith.constant 0 : i32
    return %arg0, %c0_i32, %c0_i32_0 : i32, i32, i32
  }
  func.func @transform_4(%arg0: i32) -> (i32, i32, i32) {
    %c0_i32 = arith.constant 0 : i32
    %c0_i32_0 = arith.constant 0 : i32
    %c0_i32_1 = arith.constant 0 : i32
    return %arg0, %c0_i32, %c0_i32_0 : i32, i32, i32
  }
  func.func @transform_5(%arg0: i32) -> (i32, i32, i32) {
    %c0_i32 = arith.constant 0 : i32
    %c0_i32_0 = arith.constant 0 : i32
    %c0_i32_1 = arith.constant 0 : i32
    return %arg0, %c0_i32, %c0_i32_0 : i32, i32, i32
  }
  func.func @transform_6(%arg0: i32) -> (i32, i32, i32) {
    %c0_i32 = arith.constant 0 : i32
    %c0_i32_0 = arith.constant 0 : i32
    %c0_i32_1 = arith.constant 0 : i32
    return %arg0, %c0_i32, %c0_i32_0 : i32, i32, i32
  }
}

</mosaic_0001>

<bundles_post_ra>
// kernel: addition_generator_forward.7
= control target key start
LH: loop header
LB: loop body
LE: loop exit
PB: predicated region body
PF: predicated region fallthrough
CT: control target
= control target key end

     0   :  { %s1057_s30 = smov 0   ;;  %s1219_s0 = inlined_call_operand.vmem [shape: f32[2,3,256], index: 0, kind: input, shape index: {}]   ;;  %s1220_s1 = inlined_call_operand.vmem [shape: f32[2,3,3,256], index: 1, kind: input, shape index: {}]   ;;  %s1221_s2 = inlined_call_operand.vmem [shape: f32[2,3,256], index: 2, kind: input, shape index: {}]   ;;  %s1222_s3 = inlined_call_operand.vmem [shape: f32[2,1,256], index: 3, kind: input, shape index: {}]   ;;  %s1223_s4 = inlined_call_operand.vmem [shape: f32[2,3,256], index: 4, kind: output, shape index: {0}]   ;;  %s1224_s5 = inlined_call_operand.vmem [shape: f32[2,1,256], index: 5, kind: output, shape index: {1}]   ;;  %s1225_s6 = inlined_call_operand.vmem [shape: f32[2,3,256], index: 6, kind: output, shape index: {2}]   ;;  %s1226_s7 = inlined_call_operand.vmem [shape: f32[2,1,256], index: 7, kind: output, shape index: {3}]   ;;  %s1227_s8 = inlined_call_operand.vmem [shape: f32[2,1,256], index: 8, kind: output, shape index: {4}]   ;;  %s1228_s9 = inlined_call_operand.vmem [shape: f32[2,3,256], index: 9, kind: output, shape index: {5}]  }
   0x1 LB: > { %s938_s10 = sadd.s32 4294967295, %s1005_s30   ;;  %p942_p0 = scmp.ge.s32.totalorder %s1005_s30, 1  ;;  %s1005_s30 = sphi %s1057_s30, %s20_s30  }
   0x2   : > { %p327_p1 = scmp.lt.s32.totalorder %s1005_s30, 3 }
   0x4   : > { %p328_p2 = pnand %p942_p0, %p327_p1 }
   0x5   : > { %p399_p3 = scmp.lt.s32.totalorder (!%p328_p2), %s938_s10, 1 }
   0x6   : > { %331 = sbr.rel (%p328_p2) target bundleno = 128 (0x80), region = 36 }
   0xb   : > { %s1238_s10 = smov (!%p399_p3, %s938_s10), 1  ;;  %vm452_vm0 = vcmask 1042432   ;;  %vm472_vm1 = vcmask 1043456   ;;  %vm538_vm7 = vcmask 1040384   ;;  %vm608_vm8 = vcmask 1041409  }
   0xc   : > { %s1068_s11 = sshll.u32 %s1238_s10, 3  ;;  %s968_s15 = smul.u32 24, %s1238_s10  ;;  %vm611_vm11 = vcmask 1042434  }
   0xd   : > { %s403_s14 = scalar_lea.vmem %s1219_s0, %s1068_s11  ;;  %s422_s21 = scalar_lea.vmem %s1223_s4, %s1068_s11 }
   0xe   : > { %v445_v0 = vld [vmem:[%s403_s14] sm:$0x77]  ;;  %s408_s18 = scalar_lea.vmem %s1220_s1, %s968_s15  ;;  %s1164_s22 = sshll.u32 %s1238_s10, 1 }
   0xf   : > { %447 = vst [vmem:[#allocation1] ss:$2 sm:$0xff] %v445_v0  ;;  %v546_v22 = vld [vmem:[%s408_s18] sm:$0x77]  ;;  %v547_v25 = vld [vmem:[%s408_s18 + $0x8] sm:$0x77]  ;;  %s417_s25 = scalar_lea.vmem %s1222_s3, %s1164_s22  ;;  %s426_s28 = scalar_lea.vmem %s1224_s5, %s1164_s22 }
  0x10   : > { %v958_v24 = vmul.f32 -1.442695, %v546_v22  ;;  %v548_v26 = vld [vmem:[%s408_s18 + $0x10] sm:$0x77]  ;;  %v959_v27 = vmul.f32 -1.442695, %v547_v25  ;;  %s431_s12 = scalar_lea.vmem %s1225_s6, %s1068_s11  ;;  %s435_s15 = scalar_lea.vmem %s1226_s7, %s1164_s22 }
  0x11   : > { %v960_v29 = vmul.f32 -1.442695, %v548_v26  ;;  %s439_s18 = scalar_lea.vmem %s1227_s8, %s1164_s22  ;;  %s444_s24 = scalar_lea.vmem %s1228_s9, %s1068_s11 }
  0x16   : > { %v448_v1 = vld.sshfl [vmem:[#allocation1] sm:$0xff pattern:$0x75316420]  ;;  %v449_v2 = vld.sshfl [vmem:[#allocation1 + $0x8] sm:$0xff pattern:$0x75316420] }
  0x17   : > { %v453_v3 = vsel %vm452_vm0, %v448_v1, -inf  ;;  %v460_v4 = vsel %vm452_vm0, %v449_v2, -inf }
  0x18   : > { %v454_v5 = vrot.slane %v453_v3, 4  ;;  %v461_v6 = vrot.slane %v460_v4, 4 }
  0x1a   : > { %v455_v7 = vmax.f32 %v453_v3, %v454_v5  ;;  %v462_v8 = vmax.f32 %v460_v4, %v461_v6 }
  0x1c   : > { %v456_v9 = vrot.slane %v455_v7, 2  ;;  %v463_v10 = vrot.slane %v462_v8, 2 }
  0x1e   : > { %v457_v11 = vmax.f32 %v455_v7, %v456_v9  ;;  %v464_v12 = vmax.f32 %v462_v8, %v463_v10 }
  0x20   : > { %v458_v13 = vrot.slane %v457_v11, 1  ;;  %v465_v14 = vrot.slane %v464_v12, 1 }
  0x22   : > { %v459_v15 = vmax.f32 %v457_v11, %v458_v13  ;;  %v466_v16 = vmax.f32 %v464_v12, %v465_v14 }
  0x24   : > { %v468_v17 = vmax.f32 %v466_v16, 0.1  ;;  %v467_v18 = vmax.f32 %v459_v15, 0.1 }
  0x26   : > { %v471_v19 = vrot.slane %v468_v17, 4  ;;  %v499_v31 = vsub.f32 0.1, %v468_v17  ;;  %v498_v32 = vsub.f32 0.1, %v467_v18 }
  0x28   : > { %v473_v20 = vsel %vm472_vm1, %v467_v18, %v471_v19  ;;  %v502_v40 = vmul.f32 1.442695, %v499_v31  ;;  %v500_v44 = vmul.f32 1.442695, %v498_v32 }
  0x29   : > { %v475_v21 = vsub.f32 %v445_v0, %v473_v20 }
  0x2b   : > { %v476_v23 = vmul.f32 1.442695, %v475_v21 }
  0x2d   : > { %977 = vpow2.f32 %v476_v23 }
  0x2e   : > { %979 = vpow2.f32 %v958_v24 }
  0x2f   : > { %981 = vpow2.f32 %v959_v27 }
  0x30   : > { %983 = vpow2.f32 %v960_v29 }
  0x33   : > { %v1081_v28 = vpop.eup %977 }
  0x34   : > { %479 = vst [vmem:[#allocation1] ss:$2 sm:$0xff] %v1081_v28  ;;  %v980_v30 = vpop.eup %979 }
  0x35   : > { %v1084_v33 = vadd.f32 1.0, %v980_v30  ;;  %v982_v34 = vpop.eup %981 }
  0x36   : > { %v984_v39 = vpop.eup %983  ;;  %v1088_v43 = vadd.f32 1.0, %v982_v34 }
  0x37   : > { %985 = vrcp.f32 %v1084_v33  ;;  %v1091_v47 = vadd.f32 1.0, %v984_v39  ;;  %vm566_vm2 = vweird.f32 %v1084_v33  ;;  %v570_v11 = vand.u32 2147483647, %v1084_v33 }
  0x38   : > { %987 = vpow2.f32 %v502_v40  ;;  %v572_v12 = vand.u32 2147483648, %v1084_v33  ;;  %v587_v13 = vand.u32 2147483648, %v1088_v43  ;;  %vm581_vm4 = vweird.f32 %v1088_v43 }
  0x39   : > { %989 = vrcp.f32 %v1088_v43  ;;  %v585_v18 = vand.u32 2147483647, %v1088_v43  ;;  %vm596_vm9 = vweird.f32 %v1091_v47  ;;  %v600_v23 = vand.u32 2147483647, %v1091_v47 }
  0x3a   : > { %991 = vpow2.f32 %v500_v44  ;;  %v573_v20 = vor.u32 1.1754944e-38, %v572_v12  ;;  %v602_v24 = vand.u32 2147483648, %v1091_v47  ;;  %vm571_vm13 = vcmp.eq.f32.partialorder %v570_v11, 8.507059e+37 }
  0x3b   : > { %v480_v35 = vld.sshfl [vmem:[#allocation1] sm:$0xff pattern:$0x75316420]  ;;  %v481_v36 = vld.sshfl [vmem:[#allocation1 + $0x8] sm:$0xff pattern:$0x75316420]  ;;  %993 = vrcp.f32 %v1091_v47 }
  0x3c   : > { %v484_v37 = vsel %vm452_vm0, %v480_v35, 0.0  ;;  %v491_v38 = vsel %vm452_vm0, %v481_v36, 0.0  ;;  %v588_v26 = vor.u32 1.1754944e-38, %v587_v13  ;;  %vm586_vm14 = vcmp.eq.f32.partialorder %v585_v18, 8.507059e+37 }
  0x3d   : > { %v485_v41 = vrot.slane %v484_v37, 4  ;;  %v492_v42 = vrot.slane %v491_v38, 4  ;;  %v1095_v52 = vpop.eup %985 }
  0x3e   : > { %v988_v55 = vpop.eup %987  ;;  %v562_v59 = vmul.f32 %v1095_v52, %v1084_v33  ;;  %vm567_vm3 = vweird.f32 %v1095_v52 }
  0x3f   : > { %v486_v45 = vadd.f32 %v485_v41, %v484_v37  ;;  %v493_v46 = vadd.f32 %v492_v42, %v491_v38  ;;  %v1097_v58 = vpop.eup %989  ;;  %vm1123_vm6 = vmor %vm566_vm2, %vm567_vm3  ;;  %vm601_vm2 = vcmp.eq.f32.partialorder %v600_v23, 8.507059e+37  ;;  %v603_v37 = vor.u32 1.1754944e-38, %v602_v24 }
  0x40   : > { %v992_v60 = vpop.eup %991  ;;  %v577_v0 = vmul.f32 %v1097_v58, %v1088_v43  ;;  %v563_v1 = vsub.f32 1.0, %v562_v59  ;;  %vm582_vm5 = vweird.f32 %v1097_v58 }
  0x41   : > { %v487_v48 = vrot.slane %v486_v45, 2  ;;  %v494_v49 = vrot.slane %v493_v46, 2  ;;  %v1101_v62 = vpop.eup %993  ;;  %vm1134_vm12 = vmor %vm581_vm4, %vm582_vm5 }
  0x42   : > { %v592_v2 = vmul.f32 %v1101_v62, %v1091_v47  ;;  %v578_v3 = vsub.f32 1.0, %v577_v0  ;;  %v564_v4 = vmul.f32 %v1095_v52, %v563_v1  ;;  %vm597_vm10 = vweird.f32 %v1101_v62  ;;  %v668_v1 = vld [vmem:[%s417_s25] sm:$0x3] }
  0x43   : > { %v488_v50 = vadd.f32 %v487_v48, %v486_v45  ;;  %v495_v51 = vadd.f32 %v494_v49, %v493_v46  ;;  %vm1150_vm15 = vmor %vm596_vm9, %vm597_vm10 }
  0x44   : > { %v593_v5 = vsub.f32 1.0, %v592_v2  ;;  %v579_v8 = vmul.f32 %v1097_v58, %v578_v3  ;;  %v565_v10 = vadd.f32 %v1095_v52, %v564_v4  ;;  %v541_v4 = vlaneseq }
  0x45   : > { %v489_v53 = vrot.slane %v488_v50, 1  ;;  %v496_v54 = vrot.slane %v495_v51, 1 }
  0x46   : > { %v594_v15 = vmul.f32 %v1101_v62, %v593_v5  ;;  %v580_v19 = vadd.f32 %v1097_v58, %v579_v8  ;;  %v569_v25 = vsel %vm1123_vm6, %v1095_v52, %v565_v10  ;;  %vm1181_vm3 = vcmp.lt.s32.totalorder %v541_v4, 256 }
  0x47   : > { %v490_v56 = vadd.f32 %v489_v53, %v488_v50  ;;  %v497_v57 = vadd.f32 %v496_v54, %v495_v51  ;;  %v574_v36 = vsel %vm571_vm13, %v573_v20, %v569_v25 }
  0x48   : > { %v595_v27 = vadd.f32 %v1101_v62, %v594_v15  ;;  %v584_v33 = vsel %vm1134_vm12, %v1097_v58, %v580_v19 }
  0x49   : > { %v505_v61 = vadd.f32 %v988_v55, %v497_v57  ;;  %v504_v63 = vadd.f32 %v992_v60, %v490_v56  ;;  %v589_v42 = vsel %vm586_vm14, %v588_v26, %v584_v33 }
  0x4a   : > { %v599_v41 = vsel %vm1150_vm15, %v1101_v62, %v595_v27 }
  0x4b   : > { %995 = vrcp.f32 %v505_v61  ;;  %v604_v51 = vsel %vm601_vm2, %v603_v37, %v599_v41 }
  0x4c   : > { %997 = vrcp.f32 %v504_v63 }
  0x51   : > { %v996_v6 = vpop.eup %995 }
  0x52   : > { %v510_v7 = vrot.slane %v996_v6, 4  ;;  %v998_v9 = vpop.eup %997 }
  0x54   : > { %v511_v14 = vsel %vm472_vm1, %v998_v9, %v510_v7  ;;  %v669_v9 = vsub.f32 1.0, %v668_v1 }
  0x55   : > { %v513_v17 = vmul.f32 %v1081_v28, %v511_v14 }
  0x57   : > { %514 = vst [vmem:[%s422_s21] sm:$0x77] %v513_v17  ;;  %v606_v21 = vrot.slane %v513_v17, 3  ;;  %s413_s21 = scalar_lea.vmem %s1221_s2, %s1068_s11 }
  0x58   : > { %516 = vst [vmem:[#allocation1] ss:$2 sm:$0xff] %v513_v17 }
  0x59   : > { %v607_v28 = vsel %vm538_vm7, %v513_v17, %v606_v21  ;;  %v609_v29 = vsel %vm608_vm8, %v513_v17, %v606_v21  ;;  %v612_v31 = vsel %vm611_vm11, %v513_v17, %v606_v21 }
  0x5a   : > { %v615_v32 = vperm.slane %v607_v28, 1  ;;  %v610_v34 = vrot.slane %v609_v29, 1  ;;  %v613_v35 = vrot.slane %v612_v31, 2  ;;  %v614_v38 = vperm.slane %v607_v28, 0 }
  0x5c   : > { %v620_v39 = vrot.slane %v615_v32, 4  ;;  %v617_v40 = vperm.slane %v610_v34, 1  ;;  %v619_v43 = vperm.slane %v613_v35, 1  ;;  %v616_v45 = vperm.slane %v610_v34, 0 }
  0x5d   : > { %v618_v47 = vperm.slane %v613_v35, 0 }
  0x5e   : > { %v623_v44 = vsel %vm472_vm1, %v614_v38, %v620_v39  ;;  %v621_v46 = vrot.slane %v617_v40, 4  ;;  %v622_v53 = vrot.slane %v619_v43, 4  ;;  %v678_v39 = vld [vmem:[%s413_s21] sm:$0x77] }
  0x5f   : > { %v517_v48 = vld.sshfl [vmem:[#allocation1] sm:$0xff pattern:$0x75316420]  ;;  %v518_v49 = vld.sshfl [vmem:[#allocation1 + $0x8] sm:$0xff pattern:$0x75316420]  ;;  %v629_v50 = vmul.f32 %v623_v44, %v574_v36 }
  0x60   : > { %v624_v52 = vsel %vm472_vm1, %v616_v45, %v621_v46  ;;  %v521_v54 = vsel %vm452_vm0, %v517_v48, 0.0  ;;  %v528_v55 = vsel %vm452_vm0, %v518_v49, 0.0  ;;  %v625_v59 = vsel %vm472_vm1, %v618_v47, %v622_v53 }
  0x61   : > { %635 = vst [vmem:[#allocation1] ss:$2 sm:$0xff] %v629_v50  ;;  %v630_v56 = vmul.f32 %v624_v52, %v589_v42  ;;  %v522_v57 = vrot.slane %v521_v54, 4  ;;  %v529_v58 = vrot.slane %v528_v55, 4  ;;  %v631_v60 = vmul.f32 %v625_v59, %v604_v51 }
  0x63   : > { %639 = vst [vmem:[#allocation1 + $0x10] ss:$2 sm:$0xff] %v630_v56  ;;  %v523_v61 = vadd.f32 %v522_v57, %v521_v54  ;;  %v530_v62 = vadd.f32 %v529_v58, %v528_v55 }
  0x64   : > { %643 = vst [vmem:[#allocation1 + $0x20] ss:$2 sm:$0xff] %v631_v60 }
  0x65   : > { %v524_v63 = vrot.slane %v523_v61, 2  ;;  %v531_v0 = vrot.slane %v530_v62, 2 }
  0x67   : > { %v525_v2 = vadd.f32 %v524_v63, %v523_v61  ;;  %v532_v3 = vadd.f32 %v531_v0, %v530_v62 }
  0x68   : > { %v636_v5 = vld.sshfl [vmem:[#allocation1] sm:$0xff pattern:$0x75316420]  ;;  %v637_v6 = vld.sshfl [vmem:[#allocation1 + $0x8] sm:$0xff pattern:$0x75316420] }
  0x69   : > { %v526_v7 = vrot.slane %v525_v2, 1  ;;  %v533_v8 = vrot.slane %v532_v3, 1  ;;  %v652_v10 = vsel %vm452_vm0, %v636_v5, 0.0  ;;  %v657_v15 = vsel %vm452_vm0, %v637_v6, 0.0 }
  0x6a   : > { %v640_v11 = vld.sshfl [vmem:[#allocation1 + $0x10] sm:$0xff pattern:$0x75316420]  ;;  %v641_v12 = vld.sshfl [vmem:[#allocation1 + $0x18] sm:$0xff pattern:$0x75316420] }
  0x6b   : > { %v534_v13 = vadd.f32 %v533_v8, %v532_v3  ;;  %v653_v14 = vsel %vm452_vm0, %v640_v11, 0.0  ;;  %v658_v16 = vsel %vm452_vm0, %v641_v12, 0.0  ;;  %v644_v17 = vld.sshfl [vmem:[#allocation1 + $0x20] sm:$0xff pattern:$0x75316420]  ;;  %v527_v21 = vadd.f32 %v526_v7, %v525_v2 }
  0x6c   : > { %v645_v18 = vld.sshfl [vmem:[#allocation1 + $0x28] sm:$0xff pattern:$0x75316420]  ;;  %v654_v19 = vadd.f32 %v653_v14, %v652_v10  ;;  %v659_v20 = vadd.f32 %v658_v16, %v657_v15  ;;  %v655_v27 = vsel %vm452_vm0, %v644_v17, 0.0 }
  0x6d   : > { %v537_v22 = vrot.slane %v534_v13, 7  ;;  %v660_v24 = vsel %vm452_vm0, %v645_v18, 0.0 }
  0x6e   : > { %v661_v25 = vadd.f32 %v660_v24, %v659_v20  ;;  %v656_v30 = vadd.f32 %v655_v27, %v654_v19 }
  0x6f   : > { %v539_v26 = vsel %vm538_vm7, %v527_v21, %v537_v22 }
  0x70   : > { %545 = vst.msk [vmem:[%s426_s28] sm:$0x3] %vm1181_vm3, %v539_v26  ;;  %v670_v28 = vsub.f32 %v669_v9, %v539_v26  ;;  %v674_v29 = vsub.f32 %v668_v1, %v539_v26  ;;  %v664_v31 = vrot.slane %v661_v25, 4 }
  0x72   : > { %v665_v32 = vsel %vm472_vm1, %v656_v30, %v664_v31  ;;  %v671_v33 = vmax.f32 %v670_v28, 0.0  ;;  %v675_v34 = vmax.f32 %v674_v29, 0.0 }
  0x73   : > { %667 = vst [vmem:[%s431_s12] sm:$0x77] %v665_v32 }
  0x74   : > { %v672_v35 = vmin.f32 %v671_v33, 1.0  ;;  %v676_v36 = vmin.f32 %v675_v34, 1.0 }
  0x76   : > { %673 = vst.msk [vmem:[%s435_s15] sm:$0x3] %vm1181_vm3, %v672_v35  ;;  %v681_v37 = vperm.slane %v676_v36, 1  ;;  %v680_v38 = vperm.slane %v676_v36, 0 }
  0x77   : > { %677 = vst.msk [vmem:[%s439_s18] sm:$0x3] %vm1181_vm3, %v676_v36 }
  0x78   : > { %v682_v40 = vrot.slane %v681_v37, 4 }
  0x7a   : > { %v683_v41 = vsel %vm472_vm1, %v680_v38, %v682_v40 }
  0x7b   : > { %v685_v42 = vmul.f32 %v683_v41, %v678_v39 }
  0x7d   : > { %v686_v43 = vadd.f32 %v685_v42, %v665_v32 }
  0x7f   : > { %687 = vst [vmem:[%s444_s24] sm:$0x77] %v686_v43 }
  0x80 PF: > { %s20_s30 = sadd.s32 1, %s1005_s30  }
  0x81   : > { %p17_p4 = scmp.ge.s32.totalorder %s20_s30, 4  }
  0x83   :  { %19 = sbr.rel (!%p17_p4) target bundleno = 1 (0x1), region = 137 }

// kernel: addition_generator_forward.8
= control target key start
LH: loop header
LB: loop body
LE: loop exit
PB: predicated region body
PF: predicated region fallthrough
CT: control target
= control target key end

     0   :  { %s644_s12 = smov 0   ;;  %s779_s0 = inlined_call_operand.vmem [shape: bf16[2,16,342], index: 0, kind: input, shape index: {}]   ;;  %s780_s1 = inlined_call_operand.vmem [shape: bf16[32,144], index: 1, kind: input, shape index: {}]   ;;  %s781_s2 = inlined_call_operand.vmem [shape: f32[32,1], index: 2, kind: input, shape index: {}]   ;;  %s782_s3 = inlined_call_operand.vmem [shape: f32[2,32,288], index: 3, kind: output, shape index: {}]  }
   0x1 LB: > { %s535_s13 = sadd.s32 4294967295, %s613_s12   ;;  %p539_p0 = scmp.ge.s32.totalorder %s613_s12, 1  ;;  %s613_s12 = sphi %s644_s12, %s13_s12  }
   0x2   : > { %p137_p1 = scmp.lt.s32.totalorder %s613_s12, 3 }
   0x4   : > { %p138_p2 = pnand %p539_p0, %p137_p1 }
   0x5   : > { %p161_p3 = scmp.lt.s32.totalorder (!%p138_p2), %s535_s13, 1  ;;  %s615_s18 = smov (!%p138_p2), 91  }
   0x6   : > { %141 = sbr.rel (%p138_p2) target bundleno = 360 (0x168), region = 32  ;;  %s616_s19 = smov (!%p138_p2), 90  }
   0x7   : > { %s617_s20 = smov (!%p138_p2), 92   ;;  %s618_s21 = smov (!%p138_p2), 108  }
   0x8   : > { %s619_s22 = smov (!%p138_p2), 109   ;;  %s620_s23 = smov (!%p138_p2), 110  }
   0x9   : > { %s621_s24 = smov (!%p138_p2), 126   ;;  %s622_s25 = smov (!%p138_p2), 127  }
   0xb   : > { %s784_s13 = smov (!%p161_p3, %s535_s13), 1  ;;  %vm290_vm0 = vcmask 736256   ;;  %v581_v13 = vld [vmem:[%s780_s1 + $0x4] sm:$0xf]  ;;  %v558_v14 = vld [vmem:[%s780_s1 + $0x8] sm:$0xf0] }
   0xc   : > { %s585_s14 = smul.u32 24, %s784_s13  ;;  %v561_v16 = vor.u32 %v581_v13, %v558_v14  ;;  %vm334_vm1 = vcmask 130048   ;;  %vm278_vm2 = vcmask 744448   ;;  %vm266_vm3 = vcmask 752640   ;;  %v583_v24 = vld [vmem:[%s780_s1 + $0x14] sm:$0xf] }
   0xd   : > { %v566_v25 = vld [vmem:[%s780_s1 + $0x18] sm:$0xf0]  ;;  %vm254_vm4 = vcmask 883712   ;;  %vm242_vm5 = vcmask 891904   ;;  %v180_v40 = vld [vmem:[%s781_s2] sm:$0xff]  ;;  %vm230_vm6 = vcmask 900096  }
   0xe   : > { %s165_s17 = scalar_lea.vmem %s779_s0, %s585_s14  ;;  %v705_v29 = vor.u32 %v583_v24, %v566_v25  ;;  %v623_v41 = vmov 0   ;;  %vm218_vm7 = vcmask 1031168   ;;  %v181_v51 = vld [vmem:[%s781_s2 + $0x8] sm:$0xff]  ;;  %v182_v52 = vld [vmem:[%s781_s2 + $0x10] sm:$0xff]  ;;  %vm206_vm8 = vcmask 1039360   ;;  %v183_v55 = vld [vmem:[%s781_s2 + $0x18] sm:$0xff] }
   0xf   : > { %v578_v0 = vld [vmem:[%s165_s17 + $0x4] sm:$0xf]  ;;  %v546_v1 = vld [vmem:[%s165_s17 + $0xc] sm:$0xf0]  ;;  %v544_v3 = vld [vmem:[%s165_s17] sm:$0xf]  ;;  %604 = vset.pattern.permute.xlu0 %v623_v41  ;;  %605 = vset.pattern.permute.xlu1 %v623_v41 }
  0x10   : > { %v658_v2 = vor.u32 %v578_v0, %v546_v1  ;;  %v579_v4 = vld [vmem:[%s165_s17 + $0x8] sm:$0xf0]  ;;  %v552_v6 = vld [vmem:[%s165_s17 + $0x8] sm:$0xf]  ;;  %v580_v7 = vld [vmem:[%s165_s17 + $0x10] sm:$0xf0]  ;;  %606 = vset.pattern.permute.xlu2 %v623_v41 }
  0x11   : > { %v660_v5 = vor.u32 %v579_v4, %v544_v3  ;;  %v665_v8 = vor.u32 %v580_v7, %v552_v6  ;;  %v556_v58 = vld [vmem:[%s780_s1] sm:$0xf]  ;;  %v582_v59 = vld [vmem:[%s780_s1 + $0x4] sm:$0xf0]  ;;  %v564_v63 = vld [vmem:[%s780_s1 + $0x10] sm:$0xf] }
  0x12   : > { %274 = vrot.lane.b32.xlu1 %v658_v2, %s615_s18  ;;  %286 = vrot.lane.b32.xlu0 %v658_v2, %s616_s19  ;;  %v557_v61 = vor.u32 %v582_v59, %v556_v58  ;;  %v584_v0 = vld [vmem:[%s780_s1 + $0x14] sm:$0xf0]  ;;  %vm469_vm9 = vcmask 261120  }
  0x13   : > { %284 = vrot.lane.b32.xlu2 %v660_v5, %s616_s19  ;;  %v565_v1 = vor.u32 %v584_v0, %v564_v63 }
  0x1a   : > { %276 = vrot.lane.b32.xlu1 %v665_v8, %s615_s18  ;;  %288 = vrot.lane.b32.xlu0 %v665_v8, %s616_s19 }
  0x1b   : > { %262 = vrot.lane.b32.xlu2 %v658_v2, %s617_s20 }
  0x22   : > { %272 = vrot.lane.b32.xlu1 %v660_v5, %s615_s18  ;;  %264 = vrot.lane.b32.xlu0 %v665_v8, %s617_s20 }
  0x23   : > { %250 = vrot.lane.b32.xlu2 %v658_v2, %s618_s21 }
  0x2a   : > { %260 = vrot.lane.b32.xlu1 %v660_v5, %s617_s20  ;;  %252 = vrot.lane.b32.xlu0 %v665_v8, %s618_s21 }
  0x2b   : > { %238 = vrot.lane.b32.xlu2 %v658_v2, %s619_s22 }
  0x32   : > { %248 = vrot.lane.b32.xlu1 %v660_v5, %s618_s21  ;;  %240 = vrot.lane.b32.xlu0 %v665_v8, %s619_s22 }
  0x33   : > { %226 = vrot.lane.b32.xlu2 %v658_v2, %s620_s23 }
  0x3a   : > { %236 = vrot.lane.b32.xlu1 %v660_v5, %s619_s22  ;;  %228 = vrot.lane.b32.xlu0 %v665_v8, %s620_s23 }
  0x3b   : > { %214 = vrot.lane.b32.xlu2 %v658_v2, %s621_s24 }
  0x42   : > { %224 = vrot.lane.b32.xlu1 %v660_v5, %s620_s23  ;;  %216 = vrot.lane.b32.xlu0 %v665_v8, %s621_s24 }
  0x43   : > { %202 = vrot.lane.b32.xlu2 %v658_v2, %s622_s25 }
  0x4a   : > { %212 = vrot.lane.b32.xlu1 %v660_v5, %s621_s24  ;;  %204 = vrot.lane.b32.xlu0 %v665_v8, %s622_s25 }
  0x4b   : > { %200 = vrot.lane.b32.xlu2 %v660_v5, %s622_s25  ;;  %s586_s25 = smul.u32 96, %s784_s13 }
  0x4d   : > { %s756_s28 = scalar_lea.vmem %s782_s3, %s586_s25 }
  0x52   : > { %298 = vperm.xlu0 %604, %v180_v40   ;;  %303 = vperm.xlu1 %605, %v181_v51  }
  0x53   : > { %308 = vperm.xlu2 %606, %v182_v52  }
  0x5a   : > { %313 = vperm.xlu1 %605, %v183_v55  }
  0x6d   : > { %v285_v9 = vpop.permute.xlu2 %284 }
  0x75   : > { %v263_v10 = vpop.permute.xlu2 %262 }
  0x7d   : > { %v251_v17 = vpop.permute.xlu2 %250 }
  0x84   : > { %v275_v11 = vpop.permute.xlu1 %274  ;;  %v287_v12 = vpop.permute.xlu0 %286 }
  0x85   : > { %v291_v15 = vsel %vm290_vm0, %v285_v9, %v287_v12  ;;  %v239_v28 = vpop.permute.xlu2 %238 }
  0x86   : > { %367 = vmatpush.bf16.msra.mxu1 %v291_v15 }
  0x89   : > { %570 = vmatmul.msk.bf16.vlgmr.msra.gmra.mxu1 %vm334_vm1, %v561_v16 }
  0x8c   : > { %v277_v18 = vpop.permute.xlu1 %276  ;;  %v289_v19 = vpop.permute.xlu0 %288 }
  0x8d   : > { %v280_v20 = vsel %vm278_vm2, %v275_v11, %v277_v18  ;;  %v292_v21 = vsel %vm290_vm0, %v287_v12, %v289_v19  ;;  %417 = vmatpush.bf16.msrb.mxu1 %v277_v18  ;;  %v227_v34 = vpop.permute.xlu2 %226 }
  0x8e   : > { %379 = vmatpush.bf16.msra.mxu2 %v280_v20  ;;  %405 = vmatpush.bf16.msra.mxu3 %v292_v21 }
  0x91   : > { %572 = vmatmul.msk.bf16.vlgmr.msra.gmra.mxu3 %vm334_vm1, %v561_v16 }
  0x92   : > { %443 = vmatpush.bf16.msrb.mxu3 %v289_v19 }
  0x94   : > { %v273_v22 = vpop.permute.xlu1 %272  ;;  %v265_v23 = vpop.permute.xlu0 %264 }
  0x95   : > { %418 = vmatpush.bf16.msrb.mxu1 %v265_v23  ;;  %v279_v26 = vsel %vm278_vm2, %v273_v22, %v275_v11  ;;  %v268_v27 = vsel %vm266_vm3, %v263_v10, %v265_v23  ;;  %v215_v39 = vpop.permute.xlu2 %214 }
  0x96   : > { %341 = vmatpush.bf16.msra.mxu0 %v279_v26  ;;  %380 = vmatpush.bf16.msra.mxu2 %v268_v27 }
  0x99   : > { %571 = vmatmul.msk.bf16.gmra.mxu1 %vm334_vm1, %v705_v29 }
  0x9c   : > { %v261_v30 = vpop.permute.xlu1 %260  ;;  %v253_v31 = vpop.permute.xlu0 %252 }
  0x9d   : > { %419 = vmatpush.bf16.msrb.mxu1 %v253_v31  ;;  %v267_v32 = vsel %vm266_vm3, %v261_v30, %v263_v10  ;;  %v256_v33 = vsel %vm254_vm4, %v251_v17, %v253_v31  ;;  %v203_v46 = vpop.permute.xlu2 %202 }
  0x9e   : > { %342 = vmatpush.bf16.msra.mxu0 %v267_v32  ;;  %381 = vmatpush.bf16.msra.mxu2 %v256_v33 }
  0xa1   : > { %573 = vmatmul.msk.bf16.gmra.mxu3 %vm334_vm1, %v705_v29 }
  0xa4   : > { %v249_v35 = vpop.permute.xlu1 %248  ;;  %v241_v36 = vpop.permute.xlu0 %240 }
  0xa5   : > { %420 = vmatpush.bf16.msrb.mxu1 %v241_v36  ;;  %v255_v37 = vsel %vm254_vm4, %v249_v35, %v251_v17  ;;  %v244_v38 = vsel %vm242_vm5, %v239_v28, %v241_v36  ;;  %v201_v60 = vpop.permute.xlu2 %200 }
  0xa6   : > { %343 = vmatpush.bf16.msra.mxu0 %v255_v37  ;;  %382 = vmatpush.bf16.msra.mxu2 %v244_v38  ;;  %v207_v62 = vsel %vm206_vm8, %v201_v60, %v203_v46 }
  0xac   : > { %v237_v42 = vpop.permute.xlu1 %236  ;;  %v229_v43 = vpop.permute.xlu0 %228 }
  0xad   : > { %421 = vmatpush.bf16.msrb.mxu1 %v229_v43  ;;  %v243_v44 = vsel %vm242_vm5, %v237_v42, %v239_v28  ;;  %v232_v45 = vsel %vm230_vm6, %v227_v34, %v229_v43  ;;  %v309_v37 = vpop.permute.xlu2 %308 }
  0xae   : > { %344 = vmatpush.bf16.msra.mxu0 %v243_v44  ;;  %383 = vmatpush.bf16.msra.mxu2 %v232_v45 }
  0xb1   : > { %574 = vmatmul.msk.bf16.vlgmr.msrb.gmra.mxu3 %vm334_vm1, %v561_v16 }
  0xb4   : > { %v225_v47 = vpop.permute.xlu1 %224  ;;  %v217_v48 = vpop.permute.xlu0 %216 }
  0xb5   : > { %422 = vmatpush.bf16.msrb.mxu1 %v217_v48  ;;  %v231_v49 = vsel %vm230_vm6, %v225_v47, %v227_v34  ;;  %v220_v50 = vsel %vm218_vm7, %v215_v39, %v217_v48 }
  0xb6   : > { %345 = vmatpush.bf16.msra.mxu0 %v231_v49  ;;  %384 = vmatpush.bf16.msra.mxu2 %v220_v50 }
  0xbc   : > { %v213_v53 = vpop.permute.xlu1 %212  ;;  %v205_v54 = vpop.permute.xlu0 %204 }
  0xbd   : > { %423 = vmatpush.bf16.msrb.mxu1 %v205_v54  ;;  %v219_v56 = vsel %vm218_vm7, %v213_v53, %v215_v39  ;;  %v208_v57 = vsel %vm206_vm8, %v203_v46, %v205_v54 }
  0xbe   : > { %346 = vmatpush.bf16.msra.mxu0 %v219_v56  ;;  %385 = vmatpush.bf16.msra.mxu2 %v208_v57 }
  0xc1   : > { %424 = vmatpush.bf16.msrb.mxu1 %v665_v8  ;;  %575 = vmatmul.msk.bf16.gmra.mxu3 %vm334_vm1, %v705_v29 }
  0xc2   : > { %347 = vmatpush.bf16.msra.mxu0 %v207_v62  ;;  %386 = vmatpush.bf16.msra.mxu2 %v658_v2 }
  0xc4   : > { %425 = vmatmul.bf16.vlgmr.msrb.gmra.mxu1 %v557_v61  ;;  %v299_v12 = vpop.permute.xlu0 %298  ;;  %v304_v19 = vpop.permute.xlu1 %303 }
  0xc5   : > { %387 = vmatmul.bf16.vlgmr.msra.gmra.mxu2 %v557_v61 }
  0xc6   : > { %348 = vmatpush.bf16.msra.mxu0 %v660_v5 }
  0xc9   : > { %349 = vmatmul.bf16.vlgmr.msra.gmra.mxu0 %v557_v61 }
  0xcc   : > { %v314_v46 = vpop.permute.xlu1 %313 }
  0xd4   : > { %430 = vmatmul.bf16.gmra.mxu1 %v565_v1 }
  0xd5   : > { %392 = vmatmul.bf16.gmra.mxu2 %v565_v1 }
  0xd9   : > { %354 = vmatmul.bf16.gmra.mxu0 %v565_v1 }
 0x106   : > { %v369_v2 = vpop.f32.mrf.mxu1 }
 0x10e   : > { %v371_v6 = vpop.f32.mrf.mxu1 }
 0x114   : > { %v407_v3 = vpop.f32.mrf.mxu3 }
 0x116   : > { %v374_v5 = vpop.f32.mrf.mxu1 }
 0x11c   : > { %v409_v4 = vpop.f32.mrf.mxu3 }
 0x11e   : > { %v750_v9 = vpop.f32.mrf.mxu1 }
 0x124   : > { %v412_v7 = vpop.f32.mrf.mxu3 }
 0x12c   : > { %v748_v8 = vpop.f32.mrf.mxu3 }
 0x134   : > { %v445_v10 = vpop.f32.mrf.mxu3 }
 0x13c   : > { %v447_v15 = vpop.f32.mrf.mxu3 }
 0x141   : > { %v426_v11 = vpop.f32.mrf.mxu1 }
 0x142   : > { %v427_v13 = vadd.f32 %v426_v11, %v299_v12 }
 0x144   : > { %v446_v14 = vadd.f32 %v445_v10, %v427_v13  ;;  %v450_v32 = vpop.f32.mrf.mxu3 }
 0x146   : > { %v350_v16 = vpop.f32.mrf.mxu0  ;;  %v457_v17 = vmax.f32 %v446_v14, 0.0 }
 0x147   : > { %v351_v18 = vadd.f32 %v350_v16, %v299_v12 }
 0x148   : > { %470 = vst.msk [vmem:[%s756_s28 + $0x10] sm:$0xff] %vm469_vm9, %v457_v17  ;;  %v388_v20 = vpop.f32.mrf.mxu2 }
 0x149   : > { %v370_v21 = vadd.f32 %v369_v2, %v351_v18  ;;  %v389_v22 = vadd.f32 %v388_v20, %v299_v12  ;;  %v428_v23 = vpop.f32.mrf.mxu1 }
 0x14a   : > { %v429_v24 = vadd.f32 %v428_v23, %v304_v19 }
 0x14b   : > { %v455_v25 = vmax.f32 %v370_v21, 0.0  ;;  %v408_v26 = vadd.f32 %v407_v3, %v389_v22 }
 0x14c   : > { %v448_v27 = vadd.f32 %v447_v15, %v429_v24  ;;  %v452_v51 = vpop.f32.mrf.mxu3 }
 0x14d   : > { %467 = vst [vmem:[%s756_s28] sm:$0xff] %v455_v25  ;;  %v456_v28 = vmax.f32 %v408_v26, 0.0 }
 0x14e   : > { %v460_v29 = vmax.f32 %v448_v27, 0.0  ;;  %v352_v30 = vpop.f32.mrf.mxu0 }
 0x14f   : > { %468 = vst [vmem:[%s756_s28 + $0x8] sm:$0xff] %v456_v28  ;;  %v353_v31 = vadd.f32 %v352_v30, %v304_v19 }
 0x150   : > { %473 = vst.msk [vmem:[%s756_s28 + $0x28] sm:$0xff] %vm469_vm9, %v460_v29  ;;  %v390_v33 = vpop.f32.mrf.mxu2 }
 0x151   : > { %v372_v34 = vadd.f32 %v371_v6, %v353_v31  ;;  %v391_v35 = vadd.f32 %v390_v33, %v304_v19  ;;  %v431_v36 = vpop.f32.mrf.mxu1 }
 0x152   : > { %v432_v38 = vadd.f32 %v431_v36, %v309_v37 }
 0x153   : > { %v458_v39 = vmax.f32 %v372_v34, 0.0  ;;  %v410_v40 = vadd.f32 %v409_v4, %v391_v35 }
 0x154   : > { %v451_v41 = vadd.f32 %v450_v32, %v432_v38 }
 0x155   : > { %471 = vst [vmem:[%s756_s28 + $0x18] sm:$0xff] %v458_v39  ;;  %v459_v42 = vmax.f32 %v410_v40, 0.0 }
 0x156   : > { %v463_v43 = vmax.f32 %v451_v41, 0.0  ;;  %v355_v44 = vpop.f32.mrf.mxu0 }
 0x157   : > { %472 = vst [vmem:[%s756_s28 + $0x20] sm:$0xff] %v459_v42  ;;  %v356_v45 = vadd.f32 %v355_v44, %v309_v37 }
 0x158   : > { %476 = vst.msk [vmem:[%s756_s28 + $0x40] sm:$0xff] %vm469_vm9, %v463_v43  ;;  %v393_v47 = vpop.f32.mrf.mxu2 }
 0x159   : > { %v375_v48 = vadd.f32 %v374_v5, %v356_v45  ;;  %v394_v49 = vadd.f32 %v393_v47, %v309_v37  ;;  %v433_v50 = vpop.f32.mrf.mxu1 }
 0x15a   : > { %v434_v52 = vadd.f32 %v433_v50, %v314_v46 }
 0x15b   : > { %v461_v53 = vmax.f32 %v375_v48, 0.0  ;;  %v413_v54 = vadd.f32 %v412_v7, %v394_v49 }
 0x15c   : > { %v453_v55 = vadd.f32 %v452_v51, %v434_v52 }
 0x15d   : > { %474 = vst [vmem:[%s756_s28 + $0x30] sm:$0xff] %v461_v53  ;;  %v462_v56 = vmax.f32 %v413_v54, 0.0 }
 0x15e   : > { %v466_v57 = vmax.f32 %v453_v55, 0.0  ;;  %v357_v58 = vpop.f32.mrf.mxu0 }
 0x15f   : > { %475 = vst [vmem:[%s756_s28 + $0x38] sm:$0xff] %v462_v56  ;;  %v358_v59 = vadd.f32 %v357_v58, %v314_v46 }
 0x160   : > { %479 = vst.msk [vmem:[%s756_s28 + $0x58] sm:$0xff] %vm469_vm9, %v466_v57  ;;  %v395_v60 = vpop.f32.mrf.mxu2 }
 0x161   : > { %v377_v61 = vadd.f32 %v750_v9, %v358_v59  ;;  %v396_v62 = vadd.f32 %v395_v60, %v314_v46 }
 0x163   : > { %v464_v63 = vmax.f32 %v377_v61, 0.0  ;;  %v415_v0 = vadd.f32 %v748_v8, %v396_v62 }
 0x165   : > { %477 = vst [vmem:[%s756_s28 + $0x48] sm:$0xff] %v464_v63  ;;  %v465_v1 = vmax.f32 %v415_v0, 0.0 }
 0x167   : > { %478 = vst [vmem:[%s756_s28 + $0x50] sm:$0xff] %v465_v1 }
 0x168 PF: > { %s13_s12 = sadd.s32 1, %s613_s12  }
 0x169   : > { %p10_p4 = scmp.ge.s32.totalorder %s13_s12, 4  }
 0x16b   :  { %12 = sbr.rel (!%p10_p4) target bundleno = 1 (0x1), region = 62 }

// kernel: addition_generator_forward.9
= control target key start
LH: loop header
LB: loop body
LE: loop exit
PB: predicated region body
PF: predicated region fallthrough
CT: control target
= control target key end

     0   :  { %s546_s12 = smov 0   ;;  %s645_s0 = inlined_call_operand.vmem [shape: bf16[2,32,110], index: 0, kind: input, shape index: {}]   ;;  %s646_s1 = inlined_call_operand.vmem [shape: bf16[32,288], index: 1, kind: input, shape index: {}]   ;;  %s647_s2 = inlined_call_operand.vmem [shape: f32[32,1], index: 2, kind: input, shape index: {}]   ;;  %s648_s3 = inlined_call_operand.vmem [shape: f32[2,32,80], index: 3, kind: output, shape index: {}]  }
   0x1 LB: > { %s426_s13 = sadd.s32 4294967295, %s515_s12   ;;  %p430_p0 = scmp.ge.s32.totalorder %s515_s12, 1  ;;  %s515_s12 = sphi %s546_s12, %s13_s12  }
   0x2   : > { %p137_p1 = scmp.lt.s32.totalorder %s515_s12, 3 }
   0x4   : > { %p138_p2 = pnand %p430_p0, %p137_p1 }
   0x5   : > { %p161_p3 = scmp.lt.s32.totalorder (!%p138_p2), %s426_s13, 1  ;;  %s517_s18 = smov (!%p138_p2), 118  }
   0x6   : > { %141 = sbr.rel (%p138_p2) target bundleno = 330 (0x14a), region = 32  ;;  %s518_s19 = smov (!%p138_p2), 107  }
   0x7   : > { %s519_s20 = smov (!%p138_p2), 108   ;;  %s520_s21 = smov (!%p138_p2), 116  }
   0x8   : > { %s521_s22 = smov (!%p138_p2), 126   ;;  %s522_s23 = smov (!%p138_p2), 106  }
   0x9   : > { %s523_s24 = smov (!%p138_p2), 127   ;;  %s524_s25 = smov (!%p138_p2), 117  }
   0xb   : > { %s650_s13 = smov (!%p161_p3, %s426_s13), 1  ;;  %v525_v9 = vmov 0   ;;  %v184_v13 = vld [vmem:[%s647_s2] sm:$0xff]  ;;  %v187_v17 = vld [vmem:[%s647_s2 + $0x18] sm:$0xff]  ;;  %v186_v18 = vld [vmem:[%s647_s2 + $0x10] sm:$0xff]  ;;  %vm298_vm0 = vcmask 261120  }
   0xc   : > { %s471_s14 = sshll.u32 %s650_s13, 4  ;;  %506 = vset.pattern.permute.xlu1 %v525_v9  ;;  %508 = vset.pattern.permute.xlu0 %v525_v9  ;;  %v185_v19 = vld [vmem:[%s647_s2 + $0x8] sm:$0xff]  ;;  %v477_v21 = vld [vmem:[%s646_s1 + $0x10] sm:$0xf0]  ;;  %v445_v25 = vld [vmem:[%s646_s1] sm:$0xf] }
   0xd   : > { %s165_s17 = scalar_lea.vmem %s645_s0, %s471_s14  ;;  %507 = vset.pattern.permute.xlu2 %v525_v9  ;;  %v453_v20 = vld [vmem:[%s646_s1 + $0x8] sm:$0xf]  ;;  %v476_v26 = vld [vmem:[%s646_s1 + $0x8] sm:$0xf0]  ;;  %v457_v27 = vld [vmem:[%s646_s1 + $0x18] sm:$0xf] }
   0xe   : > { %v560_v0 = vld [vmem:[%s165_s17 + $0x8] sm:$0xff]  ;;  %v562_v1 = vld [vmem:[%s165_s17] sm:$0xff]  ;;  %v454_v24 = vor.u32 %v477_v21, %v453_v20  ;;  %v446_v29 = vor.u32 %v476_v26, %v445_v25  ;;  %v447_v31 = vld [vmem:[%s646_s1 + $0xc] sm:$0xf0]  ;;  %s472_s6 = sshll.u32 %s650_s13, 5  ;;  %vm366_vm1 = vcmask 654336  }
   0xf   : > { %214 = vrot.lane.b32.xlu1 %v560_v0, %s517_s18  ;;  %238 = vrot.lane.b32.xlu0 %v560_v0, %s518_s19  ;;  %v479_v28 = vld [vmem:[%s646_s1 + $0x20] sm:$0xf0]  ;;  %v465_v35 = vld [vmem:[%s646_s1 + $0x20] sm:$0xf]  ;;  %s170_s9 = scalar_lea.vmem %s648_s3, %s472_s6 }
  0x10   : > { %212 = vrot.lane.b32.xlu2 %v562_v1, %s517_s18  ;;  %v475_v30 = vld [vmem:[%s646_s1 + $0x4] sm:$0xf]  ;;  %v458_v32 = vor.u32 %v479_v28, %v457_v27  ;;  %v480_v36 = vld [vmem:[%s646_s1 + $0x28] sm:$0xf0]  ;;  %v478_v38 = vld [vmem:[%s646_s1 + $0x1c] sm:$0xf] }
  0x11   : > { %v450_v34 = vor.u32 %v475_v30, %v447_v31  ;;  %v466_v37 = vor.u32 %v480_v36, %v465_v35  ;;  %v459_v39 = vld [vmem:[%s646_s1 + $0x24] sm:$0xf0] }
  0x12   : > { %v462_v40 = vor.u32 %v478_v38, %v459_v39 }
  0x17   : > { %232 = vrot.lane.b32.xlu1 %v560_v0, %s519_s20  ;;  %236 = vrot.lane.b32.xlu0 %v562_v1, %s518_s19 }
  0x18   : > { %230 = vrot.lane.b32.xlu2 %v562_v1, %s519_s20 }
  0x1f   : > { %226 = vrot.lane.b32.xlu1 %v560_v0, %s520_s21  ;;  %208 = vrot.lane.b32.xlu0 %v560_v0, %s521_s22 }
  0x20   : > { %206 = vrot.lane.b32.xlu2 %v562_v1, %s521_s22 }
  0x27   : > { %244 = vrot.lane.b32.xlu1 %v560_v0, %s522_s23  ;;  %224 = vrot.lane.b32.xlu0 %v562_v1, %s520_s21 }
  0x28   : > { %202 = vrot.lane.b32.xlu2 %v560_v0, %s523_s24 }
  0x2f   : > { %242 = vrot.lane.b32.xlu1 %v562_v1, %s522_s23  ;;  %220 = vrot.lane.b32.xlu0 %v560_v0, %s524_s25 }
  0x30   : > { %200 = vrot.lane.b32.xlu2 %v562_v1, %s523_s24 }
  0x37   : > { %218 = vrot.lane.b32.xlu0 %v562_v1, %s524_s25  ;;  %250 = vperm.xlu1 %506, %v184_v13  }
  0x38   : > { %255 = vperm.xlu2 %507, %v185_v19  }
  0x3f   : > { %265 = vperm.xlu1 %506, %v187_v17   ;;  %260 = vperm.xlu0 %508, %v186_v18  }
  0x6a   : > { %v213_v2 = vpop.permute.xlu2 %212 }
  0x72   : > { %v231_v3 = vpop.permute.xlu2 %230 }
  0x7a   : > { %v207_v6 = vpop.permute.xlu2 %206 }
  0x81   : > { %v215_v4 = vpop.permute.xlu1 %214  ;;  %v239_v5 = vpop.permute.xlu0 %238 }
  0x82   : > { %324 = vmatpush.bf16.msra.mxu1 %v239_v5  ;;  %305 = vmatpush.bf16.msra.mxu0 %v215_v4  ;;  %v203_v10 = vpop.permute.xlu2 %202 }
  0x83   : > { %481 = vmatpush.bf16.msra.mxu3 %v215_v4 }
  0x86   : > { %306 = vmatpush.bf16.msra.mxu0 %v213_v2 }
  0x87   : > { %482 = vmatpush.bf16.msra.mxu3 %v213_v2 }
  0x89   : > { %v233_v7 = vpop.permute.xlu1 %232  ;;  %v237_v8 = vpop.permute.xlu0 %236 }
  0x8a   : > { %325 = vmatpush.bf16.msra.mxu1 %v237_v8  ;;  %v201_v16 = vpop.permute.xlu2 %200 }
  0x8e   : > { %326 = vmatpush.bf16.msra.mxu1 %v233_v7 }
  0x91   : > { %v227_v11 = vpop.permute.xlu1 %226  ;;  %v209_v12 = vpop.permute.xlu0 %208 }
  0x92   : > { %307 = vmatpush.bf16.msra.mxu0 %v209_v12  ;;  %483 = vmatpush.bf16.msra.mxu3 %v209_v12  ;;  %v256_v48 = vpop.permute.xlu2 %255 }
  0x93   : > { %327 = vmatpush.bf16.msra.mxu1 %v231_v3 }
  0x96   : > { %308 = vmatpush.bf16.msra.mxu0 %v207_v6  ;;  %484 = vmatpush.bf16.msra.mxu3 %v207_v6 }
  0x97   : > { %328 = vmatpush.bf16.msra.mxu1 %v227_v11 }
  0x99   : > { %v245_v14 = vpop.permute.xlu1 %244  ;;  %v225_v15 = vpop.permute.xlu0 %224 }
  0x9a   : > { %309 = vmatpush.bf16.msra.mxu0 %v203_v10  ;;  %485 = vmatpush.bf16.msra.mxu3 %v203_v10 }
  0x9b   : > { %329 = vmatpush.bf16.msra.mxu1 %v225_v15  ;;  %349 = vmatpush.bf16.msra.mxu2 %v245_v14 }
  0x9e   : > { %310 = vmatpush.bf16.msra.mxu0 %v201_v16  ;;  %486 = vmatpush.bf16.msra.mxu3 %v201_v16 }
  0xa1   : > { %v243_v22 = vpop.permute.xlu1 %242  ;;  %v221_v23 = vpop.permute.xlu0 %220 }
  0xa2   : > { %330 = vmatpush.bf16.msra.mxu1 %v221_v23  ;;  %350 = vmatpush.bf16.msra.mxu2 %v243_v22 }
  0xa3   : > { %311 = vmatpush.bf16.msra.mxu0 %v560_v0  ;;  %487 = vmatpush.bf16.msra.mxu3 %v560_v0 }
  0xa5   : > { %467 = vmatmul.msk.bf16.vlgmr.msra.gmra.mxu2 %vm298_vm0, %v454_v24 }
  0xa7   : > { %312 = vmatpush.bf16.msra.mxu0 %v562_v1  ;;  %488 = vmatpush.bf16.msra.mxu3 %v562_v1 }
  0xa9   : > { %v219_v33 = vpop.permute.xlu0 %218  ;;  %v251_v41 = vpop.permute.xlu1 %250 }
  0xaa   : > { %331 = vmatpush.bf16.msra.mxu1 %v219_v33  ;;  %313 = vmatmul.bf16.vlgmr.msra.gmra.mxu0 %v446_v29 }
  0xab   : > { %318 = vmatmul.bf16.vlgmr.msra.gmra.mxu3 %v458_v32 }
  0xad   : > { %332 = vmatmul.bf16.vlgmr.msra.gmra.mxu1 %v450_v34 }
  0xb1   : > { %v261_v56 = vpop.permute.xlu0 %260  ;;  %v266_v0 = vpop.permute.xlu1 %265 }
  0xb5   : > { %468 = vmatmul.msk.bf16.gmra.mxu2 %vm298_vm0, %v466_v37 }
  0xbd   : > { %337 = vmatmul.bf16.gmra.mxu1 %v462_v40 }
 0x127   : > { %v314_v42 = vpop.f32.mrf.mxu0 }
 0x128   : > { %v352_v43 = vpop.f32.mrf.mxu2  ;;  %v315_v44 = vadd.f32 %v314_v42, %v251_v41 }
 0x12a   : > { %v333_v45 = vpop.f32.mrf.mxu1 }
 0x12b   : > { %v334_v46 = vadd.f32 %v333_v45, %v315_v44 }
 0x12d   : > { %v353_v47 = vadd.f32 %v352_v43, %v334_v46 }
 0x12e   : > { %v319_v55 = vpop.f32.mrf.mxu3 }
 0x12f   : > { %v362_v49 = vmax.f32 %v353_v47, 0.0  ;;  %v316_v50 = vpop.f32.mrf.mxu0  ;;  %v320_v59 = vadd.f32 %v319_v55, %v261_v56 }
 0x130   : > { %v354_v51 = vpop.f32.mrf.mxu2  ;;  %v317_v52 = vadd.f32 %v316_v50, %v256_v48 }
 0x131   : > { %367 = vst.msk [vmem:[%s170_s9] sm:$0xff] %vm366_vm1, %v362_v49 }
 0x132   : > { %v335_v53 = vpop.f32.mrf.mxu1 }
 0x133   : > { %v336_v54 = vadd.f32 %v335_v53, %v317_v52 }
 0x135   : > { %v355_v57 = vadd.f32 %v354_v51, %v336_v54 }
 0x136   : > { %v321_v1 = vpop.f32.mrf.mxu3 }
 0x137   : > { %v363_v58 = vmax.f32 %v355_v57, 0.0  ;;  %v322_v3 = vadd.f32 %v321_v1, %v266_v0 }
 0x138   : > { %v357_v60 = vpop.f32.mrf.mxu2 }
 0x139   : > { %368 = vst.msk [vmem:[%s170_s9 + $0x8] sm:$0xff] %vm366_vm1, %v363_v58 }
 0x13a   : > { %v338_v61 = vpop.f32.mrf.mxu1 }
 0x13b   : > { %v339_v62 = vadd.f32 %v338_v61, %v320_v59 }
 0x13d   : > { %v358_v63 = vadd.f32 %v357_v60, %v339_v62 }
 0x13f   : > { %v364_v2 = vmax.f32 %v358_v63, 0.0 }
 0x140   : > { %v359_v6 = vpop.f32.mrf.mxu2 }
 0x141   : > { %369 = vst.msk [vmem:[%s170_s9 + $0x10] sm:$0xff] %vm366_vm1, %v364_v2 }
 0x142   : > { %v340_v4 = vpop.f32.mrf.mxu1 }
 0x143   : > { %v341_v5 = vadd.f32 %v340_v4, %v322_v3 }
 0x145   : > { %v360_v7 = vadd.f32 %v359_v6, %v341_v5 }
 0x147   : > { %v365_v8 = vmax.f32 %v360_v7, 0.0 }
 0x149   : > { %370 = vst.msk [vmem:[%s170_s9 + $0x18] sm:$0xff] %vm366_vm1, %v365_v8 }
 0x14a PF: > { %s13_s12 = sadd.s32 1, %s515_s12  }
 0x14b   : > { %p10_p4 = scmp.ge.s32.totalorder %s13_s12, 4  }
 0x14d   :  { %12 = sbr.rel (!%p10_p4) target bundleno = 1 (0x1), region = 62 }

// kernel: addition_generator_forward.10
= control target key start
LH: loop header
LB: loop body
LE: loop exit
PB: predicated region body
PF: predicated region fallthrough
CT: control target
= control target key end

     0   :  { %s546_s12 = smov 0   ;;  %s645_s0 = inlined_call_operand.vmem [shape: bf16[2,32,42], index: 0, kind: input, shape index: {}]   ;;  %s646_s1 = inlined_call_operand.vmem [shape: bf16[32,288], index: 1, kind: input, shape index: {}]   ;;  %s647_s2 = inlined_call_operand.vmem [shape: f32[32,1], index: 2, kind: input, shape index: {}]   ;;  %s648_s3 = inlined_call_operand.vmem [shape: f32[2,32,24], index: 3, kind: output, shape index: {}]  }
   0x1 LB: > { %s426_s13 = sadd.s32 4294967295, %s515_s12   ;;  %p430_p0 = scmp.ge.s32.totalorder %s515_s12, 1  ;;  %s515_s12 = sphi %s546_s12, %s13_s12  }
   0x2   : > { %p137_p1 = scmp.lt.s32.totalorder %s515_s12, 3 }
   0x4   : > { %p138_p2 = pnand %p430_p0, %p137_p1 }
   0x5   : > { %p161_p3 = scmp.lt.s32.totalorder (!%p138_p2), %s426_s13, 1  ;;  %s517_s18 = smov (!%p138_p2), 122  }
   0x6   : > { %141 = sbr.rel (%p138_p2) target bundleno = 330 (0x14a), region = 32  ;;  %s518_s19 = smov (!%p138_p2), 115  }
   0x7   : > { %s519_s20 = smov (!%p138_p2), 116   ;;  %s520_s21 = smov (!%p138_p2), 120  }
   0x8   : > { %s521_s22 = smov (!%p138_p2), 126   ;;  %s522_s23 = smov (!%p138_p2), 114  }
   0x9   : > { %s523_s24 = smov (!%p138_p2), 127   ;;  %s524_s25 = smov (!%p138_p2), 121  }
   0xb   : > { %s650_s13 = smov (!%p161_p3, %s426_s13), 1  ;;  %v525_v9 = vmov 0   ;;  %v184_v13 = vld [vmem:[%s647_s2] sm:$0xff]  ;;  %v187_v17 = vld [vmem:[%s647_s2 + $0x18] sm:$0xff]  ;;  %v186_v18 = vld [vmem:[%s647_s2 + $0x10] sm:$0xff]  ;;  %vm298_vm0 = vcmask 261120  }
   0xc   : > { %s471_s14 = sshll.u32 %s650_s13, 4  ;;  %506 = vset.pattern.permute.xlu1 %v525_v9  ;;  %508 = vset.pattern.permute.xlu0 %v525_v9  ;;  %v185_v19 = vld [vmem:[%s647_s2 + $0x8] sm:$0xff]  ;;  %v477_v21 = vld [vmem:[%s646_s1 + $0x10] sm:$0xf0]  ;;  %v445_v25 = vld [vmem:[%s646_s1] sm:$0xf] }
   0xd   : > { %s165_s17 = scalar_lea.vmem %s645_s0, %s471_s14  ;;  %507 = vset.pattern.permute.xlu2 %v525_v9  ;;  %v453_v20 = vld [vmem:[%s646_s1 + $0x8] sm:$0xf]  ;;  %v476_v26 = vld [vmem:[%s646_s1 + $0x8] sm:$0xf0]  ;;  %v457_v27 = vld [vmem:[%s646_s1 + $0x18] sm:$0xf] }
   0xe   : > { %v560_v0 = vld [vmem:[%s165_s17 + $0x8] sm:$0xff]  ;;  %v562_v1 = vld [vmem:[%s165_s17] sm:$0xff]  ;;  %v454_v24 = vor.u32 %v477_v21, %v453_v20  ;;  %v446_v29 = vor.u32 %v476_v26, %v445_v25  ;;  %v447_v31 = vld [vmem:[%s646_s1 + $0xc] sm:$0xf0]  ;;  %s472_s6 = sshll.u32 %s650_s13, 5  ;;  %vm366_vm1 = vcmask 195584  }
   0xf   : > { %214 = vrot.lane.b32.xlu1 %v560_v0, %s517_s18  ;;  %238 = vrot.lane.b32.xlu0 %v560_v0, %s518_s19  ;;  %v479_v28 = vld [vmem:[%s646_s1 + $0x20] sm:$0xf0]  ;;  %v465_v35 = vld [vmem:[%s646_s1 + $0x20] sm:$0xf]  ;;  %s170_s9 = scalar_lea.vmem %s648_s3, %s472_s6 }
  0x10   : > { %212 = vrot.lane.b32.xlu2 %v562_v1, %s517_s18  ;;  %v475_v30 = vld [vmem:[%s646_s1 + $0x4] sm:$0xf]  ;;  %v458_v32 = vor.u32 %v479_v28, %v457_v27  ;;  %v480_v36 = vld [vmem:[%s646_s1 + $0x28] sm:$0xf0]  ;;  %v478_v38 = vld [vmem:[%s646_s1 + $0x1c] sm:$0xf] }
  0x11   : > { %v450_v34 = vor.u32 %v475_v30, %v447_v31  ;;  %v466_v37 = vor.u32 %v480_v36, %v465_v35  ;;  %v459_v39 = vld [vmem:[%s646_s1 + $0x24] sm:$0xf0] }
  0x12   : > { %v462_v40 = vor.u32 %v478_v38, %v459_v39 }
  0x17   : > { %232 = vrot.lane.b32.xlu1 %v560_v0, %s519_s20  ;;  %236 = vrot.lane.b32.xlu0 %v562_v1, %s518_s19 }
  0x18   : > { %230 = vrot.lane.b32.xlu2 %v562_v1, %s519_s20 }
  0x1f   : > { %226 = vrot.lane.b32.xlu1 %v560_v0, %s520_s21  ;;  %208 = vrot.lane.b32.xlu0 %v560_v0, %s521_s22 }
  0x20   : > { %206 = vrot.lane.b32.xlu2 %v562_v1, %s521_s22 }
  0x27   : > { %244 = vrot.lane.b32.xlu1 %v560_v0, %s522_s23  ;;  %224 = vrot.lane.b32.xlu0 %v562_v1, %s520_s21 }
  0x28   : > { %202 = vrot.lane.b32.xlu2 %v560_v0, %s523_s24 }
  0x2f   : > { %242 = vrot.lane.b32.xlu1 %v562_v1, %s522_s23  ;;  %220 = vrot.lane.b32.xlu0 %v560_v0, %s524_s25 }
  0x30   : > { %200 = vrot.lane.b32.xlu2 %v562_v1, %s523_s24 }
  0x37   : > { %218 = vrot.lane.b32.xlu0 %v562_v1, %s524_s25  ;;  %250 = vperm.xlu1 %506, %v184_v13  }
  0x38   : > { %255 = vperm.xlu2 %507, %v185_v19  }
  0x3f   : > { %265 = vperm.xlu1 %506, %v187_v17   ;;  %260 = vperm.xlu0 %508, %v186_v18  }
  0x6a   : > { %v213_v2 = vpop.permute.xlu2 %212 }
  0x72   : > { %v231_v3 = vpop.permute.xlu2 %230 }
  0x7a   : > { %v207_v6 = vpop.permute.xlu2 %206 }
  0x81   : > { %v215_v4 = vpop.permute.xlu1 %214  ;;  %v239_v5 = vpop.permute.xlu0 %238 }
  0x82   : > { %324 = vmatpush.bf16.msra.mxu1 %v239_v5  ;;  %305 = vmatpush.bf16.msra.mxu0 %v215_v4  ;;  %v203_v10 = vpop.permute.xlu2 %202 }
  0x83   : > { %481 = vmatpush.bf16.msra.mxu3 %v215_v4 }
  0x86   : > { %306 = vmatpush.bf16.msra.mxu0 %v213_v2 }
  0x87   : > { %482 = vmatpush.bf16.msra.mxu3 %v213_v2 }
  0x89   : > { %v233_v7 = vpop.permute.xlu1 %232  ;;  %v237_v8 = vpop.permute.xlu0 %236 }
  0x8a   : > { %325 = vmatpush.bf16.msra.mxu1 %v237_v8  ;;  %v201_v16 = vpop.permute.xlu2 %200 }
  0x8e   : > { %326 = vmatpush.bf16.msra.mxu1 %v233_v7 }
  0x91   : > { %v227_v11 = vpop.permute.xlu1 %226  ;;  %v209_v12 = vpop.permute.xlu0 %208 }
  0x92   : > { %307 = vmatpush.bf16.msra.mxu0 %v209_v12  ;;  %483 = vmatpush.bf16.msra.mxu3 %v209_v12  ;;  %v256_v48 = vpop.permute.xlu2 %255 }
  0x93   : > { %327 = vmatpush.bf16.msra.mxu1 %v231_v3 }
  0x96   : > { %308 = vmatpush.bf16.msra.mxu0 %v207_v6  ;;  %484 = vmatpush.bf16.msra.mxu3 %v207_v6 }
  0x97   : > { %328 = vmatpush.bf16.msra.mxu1 %v227_v11 }
  0x99   : > { %v245_v14 = vpop.permute.xlu1 %244  ;;  %v225_v15 = vpop.permute.xlu0 %224 }
  0x9a   : > { %309 = vmatpush.bf16.msra.mxu0 %v203_v10  ;;  %485 = vmatpush.bf16.msra.mxu3 %v203_v10 }
  0x9b   : > { %329 = vmatpush.bf16.msra.mxu1 %v225_v15  ;;  %349 = vmatpush.bf16.msra.mxu2 %v245_v14 }
  0x9e   : > { %310 = vmatpush.bf16.msra.mxu0 %v201_v16  ;;  %486 = vmatpush.bf16.msra.mxu3 %v201_v16 }
  0xa1   : > { %v243_v22 = vpop.permute.xlu1 %242  ;;  %v221_v23 = vpop.permute.xlu0 %220 }
  0xa2   : > { %330 = vmatpush.bf16.msra.mxu1 %v221_v23  ;;  %350 = vmatpush.bf16.msra.mxu2 %v243_v22 }
  0xa3   : > { %311 = vmatpush.bf16.msra.mxu0 %v560_v0  ;;  %487 = vmatpush.bf16.msra.mxu3 %v560_v0 }
  0xa5   : > { %467 = vmatmul.msk.bf16.vlgmr.msra.gmra.mxu2 %vm298_vm0, %v454_v24 }
  0xa7   : > { %312 = vmatpush.bf16.msra.mxu0 %v562_v1  ;;  %488 = vmatpush.bf16.msra.mxu3 %v562_v1 }
  0xa9   : > { %v219_v33 = vpop.permute.xlu0 %218  ;;  %v251_v41 = vpop.permute.xlu1 %250 }
  0xaa   : > { %331 = vmatpush.bf16.msra.mxu1 %v219_v33  ;;  %313 = vmatmul.bf16.vlgmr.msra.gmra.mxu0 %v446_v29 }
  0xab   : > { %318 = vmatmul.bf16.vlgmr.msra.gmra.mxu3 %v458_v32 }
  0xad   : > { %332 = vmatmul.bf16.vlgmr.msra.gmra.mxu1 %v450_v34 }
  0xb1   : > { %v261_v56 = vpop.permute.xlu0 %260  ;;  %v266_v0 = vpop.permute.xlu1 %265 }
  0xb5   : > { %468 = vmatmul.msk.bf16.gmra.mxu2 %vm298_vm0, %v466_v37 }
  0xbd   : > { %337 = vmatmul.bf16.gmra.mxu1 %v462_v40 }
 0x127   : > { %v314_v42 = vpop.f32.mrf.mxu0 }
 0x128   : > { %v352_v43 = vpop.f32.mrf.mxu2  ;;  %v315_v44 = vadd.f32 %v314_v42, %v251_v41 }
 0x12a   : > { %v333_v45 = vpop.f32.mrf.mxu1 }
 0x12b   : > { %v334_v46 = vadd.f32 %v333_v45, %v315_v44 }
 0x12d   : > { %v353_v47 = vadd.f32 %v352_v43, %v334_v46 }
 0x12e   : > { %v319_v55 = vpop.f32.mrf.mxu3 }
 0x12f   : > { %v362_v49 = vmax.f32 %v353_v47, 0.0  ;;  %v316_v50 = vpop.f32.mrf.mxu0  ;;  %v320_v59 = vadd.f32 %v319_v55, %v261_v56 }
 0x130   : > { %v354_v51 = vpop.f32.mrf.mxu2  ;;  %v317_v52 = vadd.f32 %v316_v50, %v256_v48 }
 0x131   : > { %367 = vst.msk [vmem:[%s170_s9] sm:$0xff] %vm366_vm1, %v362_v49 }
 0x132   : > { %v335_v53 = vpop.f32.mrf.mxu1 }
 0x133   : > { %v336_v54 = vadd.f32 %v335_v53, %v317_v52 }
 0x135   : > { %v355_v57 = vadd.f32 %v354_v51, %v336_v54 }
 0x136   : > { %v321_v1 = vpop.f32.mrf.mxu3 }
 0x137   : > { %v363_v58 = vmax.f32 %v355_v57, 0.0  ;;  %v322_v3 = vadd.f32 %v321_v1, %v266_v0 }
 0x138   : > { %v357_v60 = vpop.f32.mrf.mxu2 }
 0x139   : > { %368 = vst.msk [vmem:[%s170_s9 + $0x8] sm:$0xff] %vm366_vm1, %v363_v58 }
 0x13a   : > { %v338_v61 = vpop.f32.mrf.mxu1 }
 0x13b   : > { %v339_v62 = vadd.f32 %v338_v61, %v320_v59 }
 0x13d   : > { %v358_v63 = vadd.f32 %v357_v60, %v339_v62 }
 0x13f   : > { %v364_v2 = vmax.f32 %v358_v63, 0.0 }
 0x140   : > { %v359_v6 = vpop.f32.mrf.mxu2 }
 0x141   : > { %369 = vst.msk [vmem:[%s170_s9 + $0x10] sm:$0xff] %vm366_vm1, %v364_v2 }
 0x142   : > { %v340_v4 = vpop.f32.mrf.mxu1 }
 0x143   : > { %v341_v5 = vadd.f32 %v340_v4, %v322_v3 }
 0x145   : > { %v360_v7 = vadd.f32 %v359_v6, %v341_v5 }
 0x147   : > { %v365_v8 = vmax.f32 %v360_v7, 0.0 }
 0x149   : > { %370 = vst.msk [vmem:[%s170_s9 + $0x18] sm:$0xff] %vm366_vm1, %v365_v8 }
 0x14a PF: > { %s13_s12 = sadd.s32 1, %s515_s12  }
 0x14b   : > { %p10_p4 = scmp.ge.s32.totalorder %s13_s12, 4  }
 0x14d   :  { %12 = sbr.rel (!%p10_p4) target bundleno = 1 (0x1), region = 62 }

// kernel: addition_generator_forward.12
= control target key start
LH: loop header
LB: loop body
LE: loop exit
PB: predicated region body
PF: predicated region fallthrough
CT: control target
= control target key end

     0   :  { %s849_s12 = smov 0   ;;  %s1111_s0 = inlined_call_operand.vmem [shape: bf16[2,32,342], index: 0, kind: input, shape index: {}]   ;;  %s1112_s1 = inlined_call_operand.vmem [shape: bf16[32,288], index: 1, kind: input, shape index: {}]   ;;  %s1113_s2 = inlined_call_operand.vmem [shape: f32[32,1], index: 2, kind: input, shape index: {}]   ;;  %s1114_s3 = inlined_call_operand.vmem [shape: f32[2,32,288], index: 3, kind: output, shape index: {}]  }
   0x1 LB: > { %s715_s13 = sadd.s32 4294967295, %s818_s12   ;;  %p719_p0 = scmp.ge.s32.totalorder %s818_s12, 1  ;;  %s818_s12 = sphi %s849_s12, %s13_s12  }
   0x2   : > { %p137_p1 = scmp.lt.s32.totalorder %s818_s12, 3 }
   0x4   : > { %p138_p2 = pnand %p719_p0, %p137_p1 }
   0x5   : > { %p161_p3 = scmp.lt.s32.totalorder (!%p138_p2), %s715_s13, 1  ;;  %s820_s18 = smov (!%p138_p2), 90  }
   0x6   : > { %141 = sbr.rel (%p138_p2) target bundleno = 448 (0x1c0), region = 32  ;;  %s821_s19 = smov (!%p138_p2), 110  }
   0x7   : > { %s822_s20 = smov (!%p138_p2), 91   ;;  %s823_s21 = smov (!%p138_p2), 126  }
   0x8   : > { %s824_s22 = smov (!%p138_p2), 92   ;;  %s825_s23 = smov (!%p138_p2), 127  }
   0x9   : > { %s826_s24 = smov (!%p138_p2), 108   ;;  %s827_s25 = smov (!%p138_p2), 109  }
   0xb   : > { %s1116_s13 = smov (!%p161_p3, %s715_s13), 1  ;;  %vm282_vm0 = vcmask 900096   ;;  %vm397_vm1 = vcmask 736256   ;;  %vm374_vm2 = vcmask 744448   ;;  %vm259_vm3 = vcmask 1031168  }
   0xc   : > { %s790_s14 = smul.u32 48, %s1116_s13  ;;  %vm351_vm4 = vcmask 752640   ;;  %v756_v51 = vld [vmem:[%s1112_s1 + $0x8] sm:$0xf]  ;;  %v786_v52 = vld [vmem:[%s1112_s1 + $0x10] sm:$0xf0] }
   0xd   : > { %v980_v54 = vor.u32 %v786_v52, %v756_v51  ;;  %vm458_vm5 = vcmask 261120   ;;  %vm236_vm6 = vcmask 1039360   ;;  %vm328_vm7 = vcmask 883712   ;;  %s791_s6 = smul.u32 96, %s1116_s13 }
   0xe   : > { %s165_s17 = scalar_lea.vmem %s1111_s0, %s790_s14  ;;  %vm305_vm8 = vcmask 891904  }
   0xf   : > { %v736_v0 = vld [vmem:[%s165_s17 + $0x18] sm:$0xf]  ;;  %v782_v1 = vld [vmem:[%s165_s17 + $0x20] sm:$0xf0]  ;;  %v781_v2 = vld [vmem:[%s165_s17 + $0x1c] sm:$0xf]  ;;  %s1090_s9 = scalar_lea.vmem %s1114_s3, %s791_s6 }
  0x10   : > { %v863_v3 = vor.u32 %v782_v1, %v736_v0  ;;  %v738_v4 = vld [vmem:[%s165_s17 + $0x24] sm:$0xf0]  ;;  %v724_v5 = vld [vmem:[%s165_s17] sm:$0xf]  ;;  %v779_v6 = vld [vmem:[%s165_s17 + $0x8] sm:$0xf0] }
  0x11   : > { %v865_v7 = vor.u32 %v781_v2, %v738_v4  ;;  %v867_v8 = vor.u32 %v779_v6, %v724_v5  ;;  %v744_v9 = vld [vmem:[%s165_s17 + $0x20] sm:$0xf]  ;;  %v783_v10 = vld [vmem:[%s165_s17 + $0x28] sm:$0xf0]  ;;  %v778_v11 = vld [vmem:[%s165_s17 + $0x4] sm:$0xf] }
  0x12   : > { %391 = vrot.lane.b32.xlu0 %v863_v3, %s820_s18  ;;  %v726_v12 = vld [vmem:[%s165_s17 + $0xc] sm:$0xf0]  ;;  %v875_v13 = vor.u32 %v783_v10, %v744_v9  ;;  %v732_v15 = vld [vmem:[%s165_s17 + $0x8] sm:$0xf]  ;;  %v780_v16 = vld [vmem:[%s165_s17 + $0x10] sm:$0xf0] }
  0x13   : > { %278 = vrot.lane.b32.xlu2 %v865_v7, %s821_s19  ;;  %385 = vrot.lane.b32.xlu1 %v867_v8, %s820_s18  ;;  %v877_v14 = vor.u32 %v778_v11, %v726_v12  ;;  %v889_v17 = vor.u32 %v780_v16, %v732_v15  ;;  %v768_v0 = vld [vmem:[%s1112_s1 + $0x20] sm:$0xf]  ;;  %v789_v1 = vld [vmem:[%s1112_s1 + $0x28] sm:$0xf0] }
  0x14   : > { %v997_v4 = vor.u32 %v789_v1, %v768_v0 }
  0x1a   : > { %393 = vrot.lane.b32.xlu0 %v865_v7, %s820_s18 }
  0x1b   : > { %280 = vrot.lane.b32.xlu2 %v875_v13, %s821_s19  ;;  %387 = vrot.lane.b32.xlu1 %v877_v14, %s820_s18 }
  0x22   : > { %370 = vrot.lane.b32.xlu0 %v865_v7, %s822_s20 }
  0x23   : > { %272 = vrot.lane.b32.xlu2 %v877_v14, %s821_s19  ;;  %372 = vrot.lane.b32.xlu1 %v875_v13, %s822_s20 }
  0x2a   : > { %274 = vrot.lane.b32.xlu0 %v889_v17, %s821_s19 }
  0x2b   : > { %364 = vrot.lane.b32.xlu2 %v877_v14, %s822_s20  ;;  %368 = vrot.lane.b32.xlu1 %v863_v3, %s822_s20 }
  0x32   : > { %366 = vrot.lane.b32.xlu0 %v889_v17, %s822_s20 }
  0x33   : > { %257 = vrot.lane.b32.xlu2 %v875_v13, %s823_s21  ;;  %255 = vrot.lane.b32.xlu1 %v865_v7, %s823_s21 }
  0x3a   : > { %276 = vrot.lane.b32.xlu0 %v863_v3, %s821_s19 }
  0x3b   : > { %347 = vrot.lane.b32.xlu2 %v865_v7, %s824_s22  ;;  %362 = vrot.lane.b32.xlu1 %v867_v8, %s822_s20 }
  0x42   : > { %349 = vrot.lane.b32.xlu0 %v875_v13, %s824_s22 }
  0x43   : > { %251 = vrot.lane.b32.xlu2 %v889_v17, %s823_s21  ;;  %249 = vrot.lane.b32.xlu1 %v877_v14, %s823_s21 }
  0x4a   : > { %270 = vrot.lane.b32.xlu0 %v867_v8, %s821_s19 }
  0x4b   : > { %341 = vrot.lane.b32.xlu2 %v877_v14, %s824_s22  ;;  %345 = vrot.lane.b32.xlu1 %v863_v3, %s824_s22 }
  0x52   : > { %343 = vrot.lane.b32.xlu0 %v889_v17, %s824_s22 }
  0x53   : > { %234 = vrot.lane.b32.xlu2 %v875_v13, %s825_s23  ;;  %232 = vrot.lane.b32.xlu1 %v865_v7, %s825_s23 }
  0x5a   : > { %253 = vrot.lane.b32.xlu0 %v863_v3, %s823_s21 }
  0x5b   : > { %324 = vrot.lane.b32.xlu2 %v865_v7, %s826_s24  ;;  %339 = vrot.lane.b32.xlu1 %v867_v8, %s824_s22 }
  0x62   : > { %326 = vrot.lane.b32.xlu0 %v875_v13, %s826_s24 }
  0x63   : > { %228 = vrot.lane.b32.xlu2 %v889_v17, %s825_s23  ;;  %226 = vrot.lane.b32.xlu1 %v877_v14, %s825_s23 }
  0x6a   : > { %247 = vrot.lane.b32.xlu0 %v867_v8, %s823_s21 }
  0x6b   : > { %318 = vrot.lane.b32.xlu2 %v877_v14, %s826_s24  ;;  %322 = vrot.lane.b32.xlu1 %v863_v3, %s826_s24 }
  0x6d   : > { %v279_v18 = vpop.permute.xlu2 %278 }
  0x72   : > { %320 = vrot.lane.b32.xlu0 %v889_v17, %s826_s24 }
  0x73   : > { %316 = vrot.lane.b32.xlu2 %v867_v8, %s826_s24  ;;  %230 = vrot.lane.b32.xlu1 %v863_v3, %s825_s23 }
  0x75   : > { %v924_v19 = vpop.permute.xlu2 %280 }
  0x76   : > { %v286_v20 = vsel %vm282_vm0, %v279_v18, %v924_v19 }
  0x77   : > { %522 = vmatpush.bf16.msra.mxu3 %v286_v20 }
  0x7a   : > { %301 = vrot.lane.b32.xlu0 %v865_v7, %s827_s25 }
  0x7b   : > { %224 = vrot.lane.b32.xlu2 %v867_v8, %s825_s23  ;;  %303 = vrot.lane.b32.xlu1 %v875_v13, %s827_s25 }
  0x7d   : > { %v273_v21 = vpop.permute.xlu2 %272 }
  0x82   : > { %299 = vrot.lane.b32.xlu0 %v863_v3, %s827_s25 }
  0x83   : > { %297 = vrot.lane.b32.xlu2 %v889_v17, %s827_s25  ;;  %295 = vrot.lane.b32.xlu1 %v877_v14, %s827_s25 }
  0x84   : > { %v392_v22 = vpop.permute.xlu0 %391 }
  0x85   : > { %v386_v23 = vpop.permute.xlu1 %385  ;;  %v365_v24 = vpop.permute.xlu2 %364 }
  0x8a   : > { %293 = vrot.lane.b32.xlu0 %v867_v8, %s827_s25 }
  0x8b   : > { %389 = vrot.lane.b32.xlu2 %v889_v17, %s820_s18  ;;  %395 = vrot.lane.b32.xlu1 %v875_v13, %s820_s18 }
  0x8c   : > { %v939_v25 = vpop.permute.xlu0 %393 }
  0x8d   : > { %v941_v26 = vpop.permute.xlu1 %387  ;;  %v400_v27 = vsel %vm397_vm1, %v392_v22, %v939_v25  ;;  %v945_v28 = vpop.permute.xlu2 %257  ;;  %v785_v22 = vld [vmem:[%s1112_s1 + $0x8] sm:$0xf0] }
  0x8e   : > { %509 = vmatpush.bf16.msra.mxu2 %v400_v27  ;;  %v398_v29 = vsel %vm397_vm1, %v386_v23, %v941_v26 }
  0x92   : > { %510 = vmatpush.bf16.msra.mxu2 %v398_v29 }
  0x94   : > { %v371_v30 = vpop.permute.xlu0 %370 }
  0x95   : > { %v949_v31 = vpop.permute.xlu1 %372  ;;  %v348_v33 = vpop.permute.xlu2 %347  ;;  %770 = vmatmul.msk.bf16.vlgmr.msra.gmra.mxu2 %vm458_vm5, %v980_v54 }
  0x96   : > { %v378_v32 = vsel %vm374_vm2, %v371_v30, %v949_v31 }
  0x97   : > { %541 = vmatpush.bf16.msrb.mxu2 %v378_v32 }
  0x9c   : > { %v953_v34 = vpop.permute.xlu0 %274 }
  0x9d   : > { %v369_v35 = vpop.permute.xlu1 %368  ;;  %v284_v36 = vsel %vm282_vm0, %v273_v21, %v953_v34  ;;  %v958_v38 = vpop.permute.xlu2 %251 }
  0x9e   : > { %v377_v37 = vsel %vm374_vm2, %v369_v35, %v371_v30  ;;  %523 = vmatpush.bf16.msra.mxu3 %v284_v36 }
  0x9f   : > { %484 = vmatpush.bf16.msra.mxu1 %v377_v37 }
  0xa4   : > { %v960_v39 = vpop.permute.xlu0 %366 }
  0xa5   : > { %v256_v40 = vpop.permute.xlu1 %255  ;;  %v376_v41 = vsel %vm374_vm2, %v365_v24, %v960_v39  ;;  %v342_v44 = vpop.permute.xlu2 %341  ;;  %771 = vmatmul.msk.bf16.gmra.mxu2 %vm458_vm5, %v997_v4 }
  0xa6   : > { %542 = vmatpush.bf16.msrb.mxu2 %v376_v41  ;;  %v263_v42 = vsel %vm259_vm3, %v256_v40, %v945_v28  ;;  %v760_v41 = vld [vmem:[%s1112_s1 + $0x18] sm:$0xf] }
  0xa7   : > { %524 = vmatpush.bf16.msra.mxu3 %v263_v42  ;;  %v788_v42 = vld [vmem:[%s1112_s1 + $0x20] sm:$0xf0] }
  0xac   : > { %v277_v43 = vpop.permute.xlu0 %276 }
  0xad   : > { %v363_v45 = vpop.permute.xlu1 %362  ;;  %v285_v46 = vsel %vm282_vm0, %v277_v43, %v279_v18  ;;  %v982_v55 = vpop.permute.xlu2 %234  ;;  %v189_v43 = vld [vmem:[%s1113_s2 + $0x8] sm:$0xff] }
  0xae   : > { %465 = vmatpush.bf16.msra.mxu0 %v285_v46  ;;  %v375_v47 = vsel %vm374_vm2, %v363_v45, %v365_v24 }
  0xaf   : > { %485 = vmatpush.bf16.msra.mxu1 %v375_v47  ;;  %v761_v47 = vor.u32 %v788_v42, %v760_v41 }
  0xb4   : > { %v968_v48 = vpop.permute.xlu0 %349 }
  0xb5   : > { %v250_v49 = vpop.permute.xlu1 %249  ;;  %v355_v50 = vsel %vm351_vm4, %v348_v33, %v968_v48  ;;  %v325_v60 = vpop.permute.xlu2 %324 }
  0xb6   : > { %543 = vmatpush.bf16.msrb.mxu2 %v355_v50  ;;  %v261_v53 = vsel %vm259_vm3, %v250_v49, %v958_v38 }
  0xb7   : > { %525 = vmatpush.bf16.msra.mxu3 %v261_v53 }
  0xbc   : > { %v271_v56 = vpop.permute.xlu0 %270 }
  0xbd   : > { %v346_v57 = vpop.permute.xlu1 %345  ;;  %v283_v58 = vsel %vm282_vm0, %v271_v56, %v273_v21  ;;  %v1001_v5 = vpop.permute.xlu2 %228  ;;  %v748_v21 = vld [vmem:[%s1112_s1] sm:$0xf]  ;;  %v191_v56 = vld [vmem:[%s1113_s2 + $0x18] sm:$0xff] }
  0xbe   : > { %466 = vmatpush.bf16.msra.mxu0 %v283_v58  ;;  %v354_v59 = vsel %vm351_vm4, %v346_v57, %v348_v33  ;;  %v1017_v30 = vor.u32 %v785_v22, %v748_v21 }
  0xbf   : > { %486 = vmatpush.bf16.msra.mxu1 %v354_v59 }
  0xc4   : > { %v344_v61 = vpop.permute.xlu0 %343 }
  0xc5   : > { %v233_v62 = vpop.permute.xlu1 %232  ;;  %v353_v63 = vsel %vm351_vm4, %v342_v44, %v344_v61  ;;  %v319_v15 = vpop.permute.xlu2 %318 }
  0xc6   : > { %544 = vmatpush.bf16.msrb.mxu2 %v353_v63  ;;  %v240_v2 = vsel %vm236_vm6, %v233_v62, %v982_v55  ;;  %v787_v63 = vld [vmem:[%s1112_s1 + $0x1c] sm:$0xf] }
  0xc7   : > { %526 = vmatpush.bf16.msra.mxu3 %v240_v2 }
  0xcc   : > { %v254_v6 = vpop.permute.xlu0 %253 }
  0xcd   : > { %v340_v9 = vpop.permute.xlu1 %339  ;;  %v262_v10 = vsel %vm259_vm3, %v254_v6, %v256_v40  ;;  %v317_v32 = vpop.permute.xlu2 %316 }
  0xce   : > { %467 = vmatpush.bf16.msra.mxu0 %v262_v10  ;;  %v352_v11 = vsel %vm351_vm4, %v340_v9, %v342_v44 }
  0xcf   : > { %487 = vmatpush.bf16.msra.mxu1 %v352_v11 }
  0xd4   : > { %v327_v12 = vpop.permute.xlu0 %326 }
  0xd5   : > { %v227_v16 = vpop.permute.xlu1 %226  ;;  %v332_v18 = vsel %vm328_vm7, %v325_v60, %v327_v12 }
  0xd6   : > { %v238_v20 = vsel %vm236_vm6, %v227_v16, %v1001_v5  ;;  %545 = vmatpush.bf16.msrb.mxu2 %v332_v18 }
  0xd7   : > { %527 = vmatpush.bf16.msra.mxu3 %v238_v20 }
  0xdb   : > { %528 = vmatpush.bf16.msra.mxu3 %v865_v7  ;;  %v329_v7 = vsel %vm328_vm7, %v317_v32, %v319_v15 }
  0xdc   : > { %v248_v23 = vpop.permute.xlu0 %247 }
  0xdd   : > { %v323_v24 = vpop.permute.xlu1 %322  ;;  %v260_v27 = vsel %vm259_vm3, %v248_v23, %v250_v49  ;;  %v750_v49 = vld [vmem:[%s1112_s1 + $0xc] sm:$0xf0] }
  0xde   : > { %468 = vmatpush.bf16.msra.mxu0 %v260_v27  ;;  %v331_v29 = vsel %vm328_vm7, %v323_v24, %v325_v60 }
  0xdf   : > { %488 = vmatpush.bf16.msra.mxu1 %v331_v29  ;;  %529 = vmatpush.bf16.msra.mxu3 %v877_v14  ;;  %v828_v14 = vmov 0  }
  0xe0   : > { %809 = vset.pattern.permute.xlu0 %v828_v14  ;;  %810 = vset.pattern.permute.xlu1 %v828_v14 }
  0xe1   : > { %811 = vset.pattern.permute.xlu2 %v828_v14  ;;  %415 = vperm.xlu1 %810, %v189_v43  }
  0xe2   : > { %530 = vmatmul.bf16.vlgmr.msra.gmra.mxu3 %v1017_v30 }
  0xe3   : > { %598 = vmatpush.bf16.msrb.mxu3 %v949_v31  ;;  %489 = vmatpush.bf16.msra.mxu1 %v329_v7  ;;  %v225_v31 = vpop.permute.xlu2 %224 }
  0xe4   : > { %v321_v33 = vpop.permute.xlu0 %320  ;;  %v237_v40 = vsel %vm236_vm6, %v225_v31, %v227_v16 }
  0xe5   : > { %v231_v35 = vpop.permute.xlu1 %230  ;;  %v330_v36 = vsel %vm328_vm7, %v319_v15, %v321_v33 }
  0xe6   : > { %v239_v37 = vsel %vm236_vm6, %v231_v35, %v233_v62  ;;  %546 = vmatpush.bf16.msrb.mxu2 %v330_v36 }
  0xe7   : > { %599 = vmatpush.bf16.msrb.mxu3 %v960_v39  ;;  %469 = vmatpush.bf16.msra.mxu0 %v239_v37  ;;  %v188_v39 = vld [vmem:[%s1113_s2] sm:$0xff] }
  0xe8   : > { %410 = vperm.xlu0 %809, %v188_v39  }
  0xe9   : > { %425 = vperm.xlu1 %810, %v191_v56  }
  0xeb   : > { %600 = vmatpush.bf16.msrb.mxu3 %v968_v48  ;;  %470 = vmatpush.bf16.msra.mxu0 %v237_v40  ;;  %v784_v48 = vld [vmem:[%s1112_s1 + $0x4] sm:$0xf]  ;;  %v298_v51 = vpop.permute.xlu2 %297 }
  0xec   : > { %v302_v44 = vpop.permute.xlu0 %301 }
  0xed   : > { %v304_v45 = vpop.permute.xlu1 %303 }
  0xee   : > { %v309_v46 = vsel %vm305_vm8, %v302_v44, %v304_v45 }
  0xef   : > { %601 = vmatpush.bf16.msrb.mxu3 %v344_v61  ;;  %471 = vmatpush.bf16.msra.mxu0 %v863_v3 }
  0xf0   : > { %547 = vmatpush.bf16.msrb.mxu2 %v309_v46 }
  0xf2   : > { %535 = vmatmul.bf16.gmra.mxu3 %v761_v47 }
  0xf3   : > { %602 = vmatpush.bf16.msrb.mxu3 %v327_v12  ;;  %472 = vmatpush.bf16.msra.mxu0 %v867_v8  ;;  %v753_v8 = vor.u32 %v784_v48, %v750_v49  ;;  %v390_v61 = vpop.permute.xlu2 %389 }
  0xf4   : > { %v300_v50 = vpop.permute.xlu0 %299  ;;  %v399_v62 = vsel %vm397_vm1, %v941_v26, %v390_v61 }
  0xf5   : > { %v296_v52 = vpop.permute.xlu1 %295  ;;  %v308_v53 = vsel %vm305_vm8, %v300_v50, %v302_v44 }
  0xf6   : > { %473 = vmatmul.bf16.vlgmr.msra.gmra.mxu0 %v1017_v30  ;;  %490 = vmatpush.bf16.msra.mxu1 %v308_v53  ;;  %v307_v3 = vsel %vm305_vm8, %v296_v52, %v298_v51 }
  0xf7   : > { %603 = vmatpush.bf16.msrb.mxu3 %v321_v33  ;;  %548 = vmatpush.bf16.msrb.mxu2 %v307_v3 }
  0xfa   : > { %549 = vmatmul.bf16.vlgmr.msrb.gmra.mxu2 %v753_v8 }
  0xfb   : > { %604 = vmatpush.bf16.msrb.mxu3 %v304_v45 }
  0xfc   : > { %v294_v57 = vpop.permute.xlu0 %293 }
  0xfd   : > { %v396_v58 = vpop.permute.xlu1 %395  ;;  %v306_v59 = vsel %vm305_vm8, %v294_v57, %v296_v52 }
  0xfe   : > { %491 = vmatpush.bf16.msra.mxu1 %v306_v59  ;;  %v401_v60 = vsel %vm397_vm1, %v939_v25, %v396_v58  ;;  %623 = vmatpush.bf16.msra.mxu2 %v396_v58  ;;  %v762_v25 = vld [vmem:[%s1112_s1 + $0x24] sm:$0xf0] }
  0xff   : > { %605 = vmatpush.bf16.msrb.mxu3 %v298_v51  ;;  %566 = vmatpush.bf16.msrb.mxu0 %v401_v60  ;;  %v765_v0 = vor.u32 %v787_v63, %v762_v25 }
 0x101   : > { %492 = vmatmul.bf16.vlgmr.msra.gmra.mxu1 %v753_v8 }
 0x102   : > { %579 = vmatpush.bf16.msrb.mxu1 %v924_v19  ;;  %624 = vmatpush.bf16.msra.mxu2 %v390_v61  ;;  %v190_v19 = vld [vmem:[%s1113_s2 + $0x10] sm:$0xff] }
 0x103   : > { %606 = vmatmul.bf16.vlgmr.msrb.gmra.mxu3 %v753_v8  ;;  %567 = vmatpush.bf16.msrb.mxu0 %v399_v62 }
 0x104   : > { %420 = vperm.xlu2 %811, %v190_v19  }
 0x106   : > { %580 = vmatpush.bf16.msrb.mxu1 %v953_v34  ;;  %478 = vmatmul.bf16.gmra.mxu0 %v761_v47 }
 0x10a   : > { %581 = vmatpush.bf16.msrb.mxu1 %v945_v28  ;;  %554 = vmatmul.bf16.gmra.mxu2 %v765_v0 }
 0x10e   : > { %582 = vmatpush.bf16.msrb.mxu1 %v958_v38 }
 0x111   : > { %497 = vmatmul.bf16.gmra.mxu1 %v765_v0 }
 0x112   : > { %583 = vmatpush.bf16.msrb.mxu1 %v982_v55 }
 0x113   : > { %611 = vmatmul.bf16.gmra.mxu3 %v765_v0 }
 0x116   : > { %584 = vmatpush.bf16.msrb.mxu1 %v1001_v5  ;;  %772 = vmatmul.msk.bf16.vlgmr.msrb.gmra.mxu0 %vm458_vm5, %v980_v54 }
 0x118   : > { %v512_v26 = vpop.f32.mrf.mxu2 }
 0x11a   : > { %585 = vmatpush.bf16.msrb.mxu1 %v875_v13  ;;  %774 = vmatmul.msk.bf16.vlgmr.msra.gmra.mxu2 %vm458_vm5, %v980_v54 }
 0x11e   : > { %586 = vmatpush.bf16.msrb.mxu1 %v889_v17 }
 0x120   : > { %v514_v28 = vpop.f32.mrf.mxu2 }
 0x121   : > { %587 = vmatmul.bf16.vlgmr.msrb.gmra.mxu1 %v1017_v30 }
 0x126   : > { %773 = vmatmul.msk.bf16.gmra.mxu0 %vm458_vm5, %v997_v4 }
 0x128   : > { %v517_v34 = vpop.f32.mrf.mxu2 }
 0x12a   : > { %775 = vmatmul.msk.bf16.gmra.mxu2 %vm458_vm5, %v997_v4 }
 0x130   : > { %v519_v55 = vpop.f32.mrf.mxu2 }
 0x131   : > { %592 = vmatmul.bf16.gmra.mxu1 %v761_v47 }
 0x153   : > { %v416_v12 = vpop.permute.xlu1 %415 }
 0x15a   : > { %v411_v1 = vpop.permute.xlu0 %410 }
 0x15b   : > { %v426_v40 = vpop.permute.xlu1 %425 }
 0x15e   : > { %v421_v22 = vpop.permute.xlu2 %420 }
 0x165   : > { %v531_v38 = vpop.f32.mrf.mxu3 }
 0x166   : > { %v532_v32 = vadd.f32 %v531_v38, %v411_v1 }
 0x16d   : > { %v533_v17 = vpop.f32.mrf.mxu3 }
 0x16e   : > { %v534_v46 = vadd.f32 %v533_v17, %v416_v12 }
 0x173   : > { %v474_v13 = vpop.f32.mrf.mxu0 }
 0x174   : > { %v475_v2 = vadd.f32 %v474_v13, %v411_v1 }
 0x175   : > { %v536_v20 = vpop.f32.mrf.mxu3 }
 0x176   : > { %v537_v3 = vadd.f32 %v536_v20, %v421_v22 }
 0x17b   : > { %v476_v54 = vpop.f32.mrf.mxu0 }
 0x17c   : > { %v477_v16 = vadd.f32 %v476_v54, %v416_v12 }
 0x17d   : > { %v550_v5 = vpop.f32.mrf.mxu2  ;;  %v538_v35 = vpop.f32.mrf.mxu3 }
 0x17e   : > { %v493_v6 = vpop.f32.mrf.mxu1  ;;  %v551_v37 = vadd.f32 %v550_v5, %v532_v32 }
 0x17f   : > { %v494_v9 = vadd.f32 %v493_v6, %v475_v2 }
 0x181   : > { %v513_v10 = vadd.f32 %v512_v26, %v494_v9 }
 0x183   : > { %v636_v4 = vmax.f32 %v513_v10, 0.0  ;;  %v479_v11 = vpop.f32.mrf.mxu0 }
 0x184   : > { %v480_v29 = vadd.f32 %v479_v11, %v421_v22 }
 0x185   : > { %648 = vst [vmem:[%s1090_s9] sm:$0xff] %v636_v4  ;;  %v552_v15 = vpop.f32.mrf.mxu2 }
 0x186   : > { %v495_v18 = vpop.f32.mrf.mxu1  ;;  %v553_v48 = vadd.f32 %v552_v15, %v534_v46  ;;  %v607_v49 = vpop.f32.mrf.mxu3 }
 0x187   : > { %v496_v21 = vadd.f32 %v495_v18, %v477_v16 }
 0x189   : > { %v515_v23 = vadd.f32 %v514_v28, %v496_v21 }
 0x18b   : > { %v639_v24 = vmax.f32 %v515_v23, 0.0  ;;  %v481_v27 = vpop.f32.mrf.mxu0 }
 0x18c   : > { %v482_v41 = vadd.f32 %v481_v27, %v426_v40 }
 0x18d   : > { %651 = vst [vmem:[%s1090_s9 + $0x18] sm:$0xff] %v639_v24  ;;  %v555_v30 = vpop.f32.mrf.mxu2 }
 0x18e   : > { %v498_v7 = vpop.f32.mrf.mxu1  ;;  %v556_v59 = vadd.f32 %v555_v30, %v537_v3  ;;  %v609_v62 = vpop.f32.mrf.mxu3 }
 0x18f   : > { %v499_v33 = vadd.f32 %v498_v7, %v480_v29 }
 0x191   : > { %v518_v36 = vadd.f32 %v517_v34, %v499_v33  ;;  %v539_v34 = vadd.f32 %v538_v35, %v426_v40 }
 0x193   : > { %v642_v14 = vmax.f32 %v518_v36, 0.0  ;;  %v569_v31 = vpop.f32.mrf.mxu0 }
 0x194   : > { %v570_v39 = vadd.f32 %v569_v31, %v551_v37 }
 0x195   : > { %654 = vst [vmem:[%s1090_s9 + $0x30] sm:$0xff] %v642_v14  ;;  %v557_v42 = vpop.f32.mrf.mxu2 }
 0x196   : > { %v637_v43 = vmax.f32 %v570_v39, 0.0  ;;  %v500_v44 = vpop.f32.mrf.mxu1  ;;  %v558_v13 = vadd.f32 %v557_v42, %v539_v34  ;;  %v612_v17 = vpop.f32.mrf.mxu3 }
 0x197   : > { %v501_v45 = vadd.f32 %v500_v44, %v482_v41 }
 0x198   : > { %649 = vst [vmem:[%s1090_s9 + $0x8] sm:$0xff] %v637_v43 }
 0x199   : > { %v520_v47 = vadd.f32 %v519_v55, %v501_v45 }
 0x19b   : > { %v645_v50 = vmax.f32 %v520_v47, 0.0  ;;  %v571_v51 = vpop.f32.mrf.mxu0 }
 0x19c   : > { %v572_v52 = vadd.f32 %v571_v51, %v553_v48 }
 0x19d   : > { %657 = vst [vmem:[%s1090_s9 + $0x48] sm:$0xff] %v645_v50  ;;  %v626_v53 = vpop.f32.mrf.mxu2 }
 0x19e   : > { %v640_v8 = vmax.f32 %v572_v52, 0.0  ;;  %v588_v56 = vpop.f32.mrf.mxu1  ;;  %v614_v18 = vpop.f32.mrf.mxu3 }
 0x19f   : > { %v589_v57 = vadd.f32 %v588_v56, %v411_v1 }
 0x1a0   : > { %652 = vst [vmem:[%s1090_s9 + $0x20] sm:$0xff] %v640_v8 }
 0x1a1   : > { %v608_v58 = vadd.f32 %v607_v49, %v589_v57 }
 0x1a3   : > { %v627_v60 = vadd.f32 %v626_v53, %v608_v58  ;;  %v574_v61 = vpop.f32.mrf.mxu0 }
 0x1a4   : > { %v575_v63 = vadd.f32 %v574_v61, %v556_v59 }
 0x1a5   : > { %v638_v25 = vmax.f32 %v627_v60, 0.0  ;;  %v628_v19 = vpop.f32.mrf.mxu2 }
 0x1a6   : > { %v643_v0 = vmax.f32 %v575_v63, 0.0  ;;  %v590_v26 = vpop.f32.mrf.mxu1 }
 0x1a7   : > { %650 = vst.msk [vmem:[%s1090_s9 + $0x10] sm:$0xff] %vm458_vm5, %v638_v25  ;;  %v591_v28 = vadd.f32 %v590_v26, %v416_v12 }
 0x1a8   : > { %655 = vst [vmem:[%s1090_s9 + $0x38] sm:$0xff] %v643_v0 }
 0x1a9   : > { %v610_v38 = vadd.f32 %v609_v62, %v591_v28 }
 0x1ab   : > { %v629_v55 = vadd.f32 %v628_v19, %v610_v38  ;;  %v576_v1 = vpop.f32.mrf.mxu0 }
 0x1ac   : > { %v577_v54 = vadd.f32 %v576_v1, %v558_v13 }
 0x1ad   : > { %v641_v2 = vmax.f32 %v629_v55, 0.0  ;;  %v631_v10 = vpop.f32.mrf.mxu2 }
 0x1ae   : > { %v646_v5 = vmax.f32 %v577_v54, 0.0  ;;  %v593_v6 = vpop.f32.mrf.mxu1 }
 0x1af   : > { %653 = vst.msk [vmem:[%s1090_s9 + $0x28] sm:$0xff] %vm458_vm5, %v641_v2  ;;  %v594_v9 = vadd.f32 %v593_v6, %v421_v22 }
 0x1b0   : > { %658 = vst [vmem:[%s1090_s9 + $0x50] sm:$0xff] %v646_v5 }
 0x1b1   : > { %v613_v4 = vadd.f32 %v612_v17, %v594_v9 }
 0x1b3   : > { %v632_v11 = vadd.f32 %v631_v10, %v613_v4 }
 0x1b5   : > { %v644_v12 = vmax.f32 %v632_v11, 0.0  ;;  %v633_v21 = vpop.f32.mrf.mxu2 }
 0x1b6   : > { %v595_v15 = vpop.f32.mrf.mxu1 }
 0x1b7   : > { %656 = vst.msk [vmem:[%s1090_s9 + $0x40] sm:$0xff] %vm458_vm5, %v644_v12  ;;  %v596_v16 = vadd.f32 %v595_v15, %v426_v40 }
 0x1b9   : > { %v615_v20 = vadd.f32 %v614_v18, %v596_v16 }
 0x1bb   : > { %v634_v23 = vadd.f32 %v633_v21, %v615_v20 }
 0x1bd   : > { %v647_v24 = vmax.f32 %v634_v23, 0.0 }
 0x1bf   : > { %659 = vst.msk [vmem:[%s1090_s9 + $0x58] sm:$0xff] %vm458_vm5, %v647_v24 }
 0x1c0 PF: > { %s13_s12 = sadd.s32 1, %s818_s12  }
 0x1c1   : > { %p10_p4 = scmp.ge.s32.totalorder %s13_s12, 4  }
 0x1c3   :  { %12 = sbr.rel (!%p10_p4) target bundleno = 1 (0x1), region = 62 }

// kernel: mul.13
= control target key start
LH: loop header
LB: loop body
LE: loop exit
PB: predicated region body
PF: predicated region fallthrough
CT: control target
= control target key end

     0   :  { %vm11_vm0 = vcmask 130048   ;;  %s77_s10 = smov 80   ;;  %s78_s13 = smov 48   ;;  %s135_s0 = inlined_call_operand.vmem [shape: f32[2,256], index: 0, kind: input, shape index: {}]   ;;  %s136_s1 = inlined_call_operand.vmem [shape: f32[2,16,16], index: 1, kind: output, shape index: {}]  }
   0x1   :  { %v60_v0 = vld [vmem:[%s135_s0 + $0x2] sm:$0x3]  ;;  %v8_v1 = vld [vmem:[%s135_s0] sm:$0x3]  ;;  %s76_s0 = smov 112   ;;  %s79_s14 = smov 96  }
   0x2   :  { %7 = vst [vmem:[#allocation0 + $0x8] sm:$0x3] %v60_v0  ;;  %s80_s15 = smov 64   ;;  %s81_s16 = smov 32  }
   0x3   :  { %9 = vst [vmem:[#allocation0] sm:$0x3] %v8_v1  ;;  %s82_s17 = smov 16  }
   0x9   :  { %v14_v4 = vld [vmem:[#allocation0 + $0x8] sm:$0x3]  }
   0xa   :  { %v18_v2 = vld.sshfl [vmem:[#allocation0] sm:$0xff pattern:$0x99999180]   ;;  %61 = vst.msk [vmem:[%s136_s1 + $0x8] ss:$16 sm:$0x3] %vm11_vm0, %v14_v4  }
   0xb   :  { %v10_v3 = vld [vmem:[#allocation0] sm:$0x3]   ;;  %19 = vrot.lane.b32.xlu0 %v18_v2, %s76_s0  ;;  %31 = vrot.lane.b32.xlu1 %v18_v2, %s77_s10 }
   0xc   :  { %12 = vst.msk [vmem:[%s136_s1] ss:$16 sm:$0x3] %vm11_vm0, %v10_v3   ;;  %43 = vrot.lane.b32.xlu2 %v18_v2, %s78_s13 }
  0x13   :  { %25 = vrot.lane.b32.xlu0 %v18_v2, %s79_s14  ;;  %37 = vrot.lane.b32.xlu1 %v18_v2, %s80_s15 }
  0x14   :  { %49 = vrot.lane.b32.xlu2 %v18_v2, %s81_s16 }
  0x1b   :  { %55 = vrot.lane.b32.xlu0 %v18_v2, %s82_s17 }
  0x66   :  { %v44_v5 = vpop.permute.xlu2 %43  }
  0x67   :  { %66 = vst.msk [vmem:[%s136_s1 + $0x5] ss:$8 sm:$0xf] %vm11_vm0, %v44_v5  }
  0x6e   :  { %v50_v6 = vpop.permute.xlu2 %49  }
  0x6f   :  { %67 = vst.msk [vmem:[%s136_s1 + $0x6] ss:$8 sm:$0xf] %vm11_vm0, %v50_v6  }
  0x7d   :  { %v20_v7 = vpop.permute.xlu0 %19   ;;  %v32_v8 = vpop.permute.xlu1 %31  }
  0x7e   :  { %62 = vst.msk [vmem:[%s136_s1 + $0x1] ss:$8 sm:$0xf] %vm11_vm0, %v20_v7  }
  0x7f   :  { %64 = vst.msk [vmem:[%s136_s1 + $0x3] ss:$8 sm:$0xf] %vm11_vm0, %v32_v8  }
  0x85   :  { %v26_v9 = vpop.permute.xlu0 %25   ;;  %v38_v10 = vpop.permute.xlu1 %37  }
  0x86   :  { %63 = vst.msk [vmem:[%s136_s1 + $0x2] ss:$8 sm:$0xf] %vm11_vm0, %v26_v9  }
  0x87   :  { %65 = vst.msk [vmem:[%s136_s1 + $0x4] ss:$8 sm:$0xf] %vm11_vm0, %v38_v10  }
  0x8d   :  { %v56_v11 = vpop.permute.xlu0 %55  }
  0x8e   :  { %68 = vst.msk [vmem:[%s136_s1 + $0x7] ss:$8 sm:$0xf] %vm11_vm0, %v56_v11  }

// kernel: addition_generator_forward.13
= control target key start
LH: loop header
LB: loop body
LE: loop exit
PB: predicated region body
PF: predicated region fallthrough
CT: control target
= control target key end

     0   :  { %s993_s21 = smov 0   ;;  %s1234_s0 = inlined_call_operand.vmem [shape: bf16[2,32,342], index: 0, kind: input, shape index: {}]   ;;  %s1235_s1 = inlined_call_operand.vmem [shape: bf16[3,288], index: 1, kind: input, shape index: {}]   ;;  %s1236_s2 = inlined_call_operand.vmem [shape: f32[3,1], index: 2, kind: input, shape index: {}]   ;;  %s1237_s3 = inlined_call_operand.vmem [shape: f32[2,3,288], index: 3, kind: input, shape index: {}]   ;;  %s1238_s4 = inlined_call_operand.vmem [shape: f32[2,1,288], index: 4, kind: input, shape index: {}]   ;;  %s1239_s5 = inlined_call_operand.vmem [shape: f32[2,3,288], index: 5, kind: output, shape index: {0}]   ;;  %s1240_s6 = inlined_call_operand.vmem [shape: f32[2,3,288], index: 6, kind: output, shape index: {1}]  }
   0x1 LB: > { %s861_s22 = sadd.s32 4294967295, %s947_s21   ;;  %p865_p0 = scmp.ge.s32.totalorder %s947_s21, 1  ;;  %s947_s21 = sphi %s993_s21, %s17_s21  }
   0x2   : > { %p234_p1 = scmp.lt.s32.totalorder %s947_s21, 3 }
   0x4   : > { %p235_p2 = pnand %p865_p0, %p234_p1 }
   0x5   : > { %p278_p3 = scmp.lt.s32.totalorder (!%p235_p2), %s861_s22, 1  ;;  %s949_s27 = smov (!%p235_p2), 91  }
   0x6   : > { %238 = sbr.rel (%p235_p2) target bundleno = 454 (0x1c6), region = 40  ;;  %s950_s28 = smov (!%p235_p2), 110  }
   0x7   : > { %s951_s29 = smov (!%p235_p2), 126   ;;  %s952_s30 = smov (!%p235_p2), 92  }
   0x8   : > { %s953_s7 = smov (!%p235_p2), 90   ;;  %s954_s8 = smov (!%p235_p2), 127  }
   0x9   : > { %s955_s9 = smov (!%p235_p2), 108   ;;  %s956_s10 = smov (!%p235_p2), 109  }
   0xb   : > { %s1244_s22 = smov (!%p278_p3, %s861_s22), 1  ;;  %vm403_vm0 = vcmask 900096   ;;  %vm495_vm1 = vcmask 744448   ;;  %vm380_vm2 = vcmask 1031168   ;;  %vm472_vm3 = vcmask 752640  }
   0xc   : > { %s908_s23 = smul.u32 48, %s1244_s22  ;;  %vm518_vm4 = vcmask 736256   ;;  %vm357_vm5 = vcmask 1039360   ;;  %v311_v63 = vld [vmem:[%s1235_s1] sm:$0x3f]  ;;  %vm541_vm6 = vcmask 261120  }
   0xd   : > { %535 = vst [vmem:[#allocation1] ss:$4 sm:$0xff] %v311_v63  ;;  %vm449_vm7 = vcmask 883712   ;;  %vm426_vm8 = vcmask 891904   ;;  %s910_s15 = smul.u32 3, %s1244_s22 }
   0xe   : > { %s1007_s26 = scalar_lea.vmem %s1234_s0, %s908_s23  ;;  %s909_s19 = smul.u32 12, %s1244_s22 }
   0xf   : > { %v905_v0 = vld [vmem:[%s1007_s26 + $0x1c] sm:$0xf]  ;;  %v886_v1 = vld [vmem:[%s1007_s26 + $0x24] sm:$0xf0]  ;;  %v902_v2 = vld [vmem:[%s1007_s26 + $0x4] sm:$0xf]  ;;  %s291_s18 = scalar_lea.vmem %s1238_s4, %s910_s15 }
  0x10   : > { %v1012_v3 = vor.u32 %v905_v0, %v886_v1  ;;  %v874_v4 = vld [vmem:[%s1007_s26 + $0xc] sm:$0xf0]  ;;  %v892_v6 = vld [vmem:[%s1007_s26 + $0x20] sm:$0xf]  ;;  %v907_v7 = vld [vmem:[%s1007_s26 + $0x28] sm:$0xf0]  ;;  %s1217_s22 = scalar_lea.vmem %s1237_s3, %s909_s19 }
  0x11   : > { %v1015_v5 = vor.u32 %v902_v2, %v874_v4  ;;  %v880_v8 = vld [vmem:[%s1007_s26 + $0x8] sm:$0xf]  ;;  %v904_v9 = vld [vmem:[%s1007_s26 + $0x10] sm:$0xf0]  ;;  %v1024_v10 = vor.u32 %v907_v7, %v892_v6  ;;  %v884_v12 = vld [vmem:[%s1007_s26 + $0x18] sm:$0xf] }
  0x12   : > { %491 = vrot.lane.b32.xlu1 %v1012_v3, %s949_s27  ;;  %399 = vrot.lane.b32.xlu0 %v1012_v3, %s950_s28  ;;  %v1026_v11 = vor.u32 %v904_v9, %v880_v8  ;;  %v906_v13 = vld [vmem:[%s1007_s26 + $0x20] sm:$0xf0]  ;;  %v872_v15 = vld [vmem:[%s1007_s26] sm:$0xf] }
  0x13   : > { %393 = vrot.lane.b32.xlu2 %v1015_v5, %s950_s28  ;;  %v1033_v14 = vor.u32 %v906_v13, %v884_v12  ;;  %v903_v16 = vld [vmem:[%s1007_s26 + $0x8] sm:$0xf0]  ;;  %s1222_s26 = scalar_lea.vmem %s1240_s6, %s909_s19 }
  0x14   : > { %v1043_v17 = vor.u32 %v903_v16, %v872_v15  ;;  %v1155_v8 = vld.sshfl [vmem:[#allocation1 + $0x10] sm:$0xff pattern:$0x73625140] }
  0x1a   : > { %493 = vrot.lane.b32.xlu1 %v1024_v10, %s949_s27  ;;  %401 = vrot.lane.b32.xlu0 %v1024_v10, %s950_s28 }
  0x1b   : > { %395 = vrot.lane.b32.xlu2 %v1026_v11, %s950_s28 }
  0x22   : > { %397 = vrot.lane.b32.xlu1 %v1033_v14, %s950_s28  ;;  %489 = vrot.lane.b32.xlu0 %v1033_v14, %s949_s27 }
  0x23   : > { %485 = vrot.lane.b32.xlu2 %v1015_v5, %s949_s27 }
  0x2a   : > { %376 = vrot.lane.b32.xlu1 %v1012_v3, %s951_s29  ;;  %487 = vrot.lane.b32.xlu0 %v1026_v11, %s949_s27 }
  0x2b   : > { %378 = vrot.lane.b32.xlu2 %v1024_v10, %s951_s29 }
  0x32   : > { %391 = vrot.lane.b32.xlu1 %v1043_v17, %s950_s28  ;;  %483 = vrot.lane.b32.xlu0 %v1043_v17, %s949_s27 }
  0x33   : > { %468 = vrot.lane.b32.xlu2 %v1012_v3, %s952_s30 }
  0x3a   : > { %512 = vrot.lane.b32.xlu1 %v1033_v14, %s953_s7  ;;  %470 = vrot.lane.b32.xlu0 %v1024_v10, %s952_s30 }
  0x3b   : > { %514 = vrot.lane.b32.xlu2 %v1012_v3, %s953_s7 }
  0x42   : > { %372 = vrot.lane.b32.xlu1 %v1026_v11, %s951_s29  ;;  %370 = vrot.lane.b32.xlu0 %v1015_v5, %s951_s29 }
  0x43   : > { %466 = vrot.lane.b32.xlu2 %v1033_v14, %s952_s30 }
  0x4a   : > { %462 = vrot.lane.b32.xlu1 %v1015_v5, %s952_s30  ;;  %374 = vrot.lane.b32.xlu0 %v1033_v14, %s951_s29 }
  0x4b   : > { %464 = vrot.lane.b32.xlu2 %v1026_v11, %s952_s30 }
  0x52   : > { %508 = vrot.lane.b32.xlu1 %v1015_v5, %s953_s7  ;;  %506 = vrot.lane.b32.xlu0 %v1043_v17, %s953_s7 }
  0x53   : > { %353 = vrot.lane.b32.xlu2 %v1012_v3, %s954_s8 }
  0x5a   : > { %460 = vrot.lane.b32.xlu1 %v1043_v17, %s952_s30  ;;  %355 = vrot.lane.b32.xlu0 %v1024_v10, %s954_s8 }
  0x5b   : > { %368 = vrot.lane.b32.xlu2 %v1043_v17, %s951_s29  ;;  %s296_s29 = scalar_lea.vmem %s1239_s5, %s909_s19 }
  0x62   : > { %447 = vrot.lane.b32.xlu1 %v1024_v10, %s955_s9  ;;  %445 = vrot.lane.b32.xlu0 %v1012_v3, %s955_s9 }
  0x63   : > { %347 = vrot.lane.b32.xlu2 %v1015_v5, %s954_s8 }
  0x6a   : > { %443 = vrot.lane.b32.xlu1 %v1033_v14, %s955_s9  ;;  %349 = vrot.lane.b32.xlu0 %v1026_v11, %s954_s8 }
  0x6b   : > { %351 = vrot.lane.b32.xlu2 %v1033_v14, %s954_s8 }
  0x6d   : > { %v394_v18 = vpop.permute.xlu2 %393 }
  0x72   : > { %441 = vrot.lane.b32.xlu1 %v1026_v11, %s955_s9  ;;  %439 = vrot.lane.b32.xlu0 %v1015_v5, %s955_s9 }
  0x73   : > { %437 = vrot.lane.b32.xlu2 %v1043_v17, %s955_s9 }
  0x75   : > { %v1076_v19 = vpop.permute.xlu2 %395 }
  0x76   : > { %v405_v28 = vsel %vm403_vm0, %v394_v18, %v1076_v19 }
  0x7a   : > { %422 = vrot.lane.b32.xlu1 %v1012_v3, %s956_s10  ;;  %345 = vrot.lane.b32.xlu0 %v1043_v17, %s954_s8 }
  0x7b   : > { %424 = vrot.lane.b32.xlu2 %v1024_v10, %s956_s10 }
  0x7d   : > { %v1081_v20 = vpop.permute.xlu2 %485 }
  0x82   : > { %416 = vrot.lane.b32.xlu1 %v1015_v5, %s956_s10  ;;  %420 = vrot.lane.b32.xlu0 %v1033_v14, %s956_s10 }
  0x83   : > { %418 = vrot.lane.b32.xlu2 %v1026_v11, %s956_s10 }
  0x84   : > { %v1086_v21 = vpop.permute.xlu1 %491  ;;  %v400_v22 = vpop.permute.xlu0 %399 }
  0x85   : > { %v1088_v23 = vpop.permute.xlu2 %378 }
  0x8a   : > { %516 = vrot.lane.b32.xlu1 %v1024_v10, %s953_s7  ;;  %414 = vrot.lane.b32.xlu0 %v1043_v17, %s956_s10 }
  0x8b   : > { %510 = vrot.lane.b32.xlu2 %v1026_v11, %s953_s7 }
  0x8c   : > { %v1095_v24 = vpop.permute.xlu1 %493  ;;  %v1097_v25 = vpop.permute.xlu0 %401 }
  0x8d   : > { %v1099_v26 = vpop.permute.xlu2 %468  ;;  %v407_v27 = vsel %vm403_vm0, %v400_v22, %v1097_v25  ;;  %v499_v61 = vsel %vm495_vm1, %v1086_v21, %v1095_v24 }
  0x8e   : > { %583 = vmatpush.bf16.msra.mxu3 %v407_v27 }
  0x92   : > { %584 = vmatpush.bf16.msra.mxu3 %v405_v28 }
  0x94   : > { %v398_v29 = vpop.permute.xlu1 %397  ;;  %v490_v30 = vpop.permute.xlu0 %489 }
  0x95   : > { %v1105_v31 = vpop.permute.xlu2 %514  ;;  %v406_v32 = vsel %vm403_vm0, %v398_v29, %v400_v22  ;;  %v498_v33 = vsel %vm495_vm1, %v490_v30, %v1086_v21  ;;  %v536_v30 = vld.sshfl [vmem:[#allocation1] sm:$0xff pattern:$0x73625140] }
  0x96   : > { %544 = vmatpush.bf16.msra.mxu0 %v406_v32  ;;  %557 = vmatpush.bf16.msra.mxu1 %v498_v33  ;;  %v957_v32 = vmov 0  }
  0x97   : > { %928 = vset.pattern.permute.xlu0 %v957_v32 }
  0x9c   : > { %v377_v34 = vpop.permute.xlu1 %376  ;;  %v1110_v35 = vpop.permute.xlu0 %487 }
  0x9d   : > { %v467_v36 = vpop.permute.xlu2 %466  ;;  %v384_v37 = vsel %vm380_vm2, %v377_v34, %v1088_v23  ;;  %v497_v0 = vsel %vm495_vm1, %v1081_v20, %v1110_v35 }
  0x9e   : > { %585 = vmatpush.bf16.msra.mxu3 %v384_v37  ;;  %v475_v43 = vsel %vm472_vm3, %v467_v36, %v1099_v26 }
  0xa4   : > { %v392_v38 = vpop.permute.xlu1 %391  ;;  %v484_v39 = vpop.permute.xlu0 %483 }
  0xa5   : > { %v1114_v40 = vpop.permute.xlu2 %464  ;;  %v404_v41 = vsel %vm403_vm0, %v392_v38, %v394_v18  ;;  %v496_v42 = vsel %vm495_vm1, %v484_v39, %v1081_v20  ;;  %vm721_vm1 = vcmask 1043456  }
  0xa6   : > { %545 = vmatpush.bf16.msra.mxu0 %v404_v41  ;;  %558 = vmatpush.bf16.msra.mxu1 %v496_v42  ;;  %v537_v42 = vld.sshfl [vmem:[#allocation1 + $0x8] sm:$0xff pattern:$0x73625140] }
  0xaa   : > { %559 = vmatpush.bf16.msra.mxu1 %v475_v43 }
  0xac   : > { %v513_v44 = vpop.permute.xlu1 %512  ;;  %v1121_v45 = vpop.permute.xlu0 %470 }
  0xad   : > { %v354_v46 = vpop.permute.xlu2 %353  ;;  %v521_v47 = vsel %vm518_vm4, %v513_v44, %v1105_v31  ;;  %v476_v7 = vsel %vm472_vm3, %v1099_v26, %v1121_v45 }
  0xae   : > { %576 = vmatpush.bf16.msra.mxu2 %v521_v47 }
  0xb4   : > { %v1125_v48 = vpop.permute.xlu1 %372  ;;  %v371_v49 = vpop.permute.xlu0 %370 }
  0xb5   : > { %v369_v50 = vpop.permute.xlu2 %368  ;;  %v382_v51 = vsel %vm380_vm2, %v371_v49, %v1125_v48 }
  0xb6   : > { %586 = vmatpush.bf16.msra.mxu3 %v382_v51  ;;  %v381_v56 = vsel %vm380_vm2, %v369_v50, %v371_v49 }
  0xbc   : > { %v463_v52 = vpop.permute.xlu1 %462  ;;  %v375_v53 = vpop.permute.xlu0 %374 }
  0xbd   : > { %v1129_v54 = vpop.permute.xlu2 %347  ;;  %v383_v55 = vsel %vm380_vm2, %v375_v53, %v377_v34  ;;  %v474_v9 = vsel %vm472_vm3, %v463_v52, %v1114_v40 }
  0xbe   : > { %546 = vmatpush.bf16.msra.mxu0 %v383_v55 }
  0xc2   : > { %547 = vmatpush.bf16.msra.mxu0 %v381_v56 }
  0xc4   : > { %v1133_v57 = vpop.permute.xlu1 %508  ;;  %v507_v58 = vpop.permute.xlu0 %506 }
  0xc5   : > { %v352_v59 = vpop.permute.xlu2 %351  ;;  %v519_v60 = vsel %vm518_vm4, %v507_v58, %v1133_v57 }
  0xc6   : > { %577 = vmatpush.bf16.msra.mxu2 %v519_v60  ;;  %v360_v62 = vsel %vm357_vm5, %v352_v59, %v354_v46 }
  0xc7   : > { %548 = vmatpush.bf16.msra.mxu0 %v360_v62 }
  0xc9   : > { %894 = vmatmul.msk.bf16.vlgmr.msra.gmra.mxu2 %vm541_vm6, %v1155_v8 }
  0xca   : > { %596 = vmatpush.bf16.msrb.mxu2 %v499_v61 }
  0xcc   : > { %v461_v1 = vpop.permute.xlu1 %460  ;;  %v1147_v2 = vpop.permute.xlu0 %355 }
  0xcd   : > { %v473_v4 = vsel %vm472_vm3, %v461_v1, %v463_v52  ;;  %v361_v6 = vsel %vm357_vm5, %v354_v46, %v1147_v2  ;;  %v438_v22 = vpop.permute.xlu2 %437 }
  0xce   : > { %597 = vmatpush.bf16.msrb.mxu2 %v497_v0  ;;  %560 = vmatpush.bf16.msra.mxu1 %v473_v4 }
  0xcf   : > { %587 = vmatpush.bf16.msra.mxu3 %v361_v6 }
  0xd2   : > { %598 = vmatpush.bf16.msrb.mxu2 %v476_v7 }
  0xd4   : > { %v448_v12 = vpop.permute.xlu1 %447  ;;  %v446_v13 = vpop.permute.xlu0 %445 }
  0xd5   : > { %v453_v15 = vsel %vm449_vm7, %v446_v13, %v448_v12  ;;  %v425_v33 = vpop.permute.xlu2 %424 }
  0xd6   : > { %599 = vmatpush.bf16.msrb.mxu2 %v474_v9 }
  0xda   : > { %600 = vmatpush.bf16.msrb.mxu2 %v453_v15 }
  0xdc   : > { %v444_v16 = vpop.permute.xlu1 %443  ;;  %v1162_v18 = vpop.permute.xlu0 %349 }
  0xdd   : > { %v452_v20 = vsel %vm449_vm7, %v444_v16, %v446_v13  ;;  %v359_v21 = vsel %vm357_vm5, %v1129_v54, %v1162_v18  ;;  %v419_v37 = vpop.permute.xlu2 %418 }
  0xde   : > { %561 = vmatpush.bf16.msra.mxu1 %v452_v20  ;;  %588 = vmatpush.bf16.msra.mxu3 %v359_v21 }
  0xe2   : > { %589 = vmatpush.bf16.msra.mxu3 %v1012_v3  ;;  %v312_v3 = vld [vmem:[%s1236_s2] sm:$0x7] }
  0xe3   : > { %531 = vperm.xlu0 %928, %v312_v3  }
  0xe4   : > { %v442_v26 = vpop.permute.xlu1 %441  ;;  %v440_v27 = vpop.permute.xlu0 %439 }
  0xe5   : > { %v450_v28 = vsel %vm449_vm7, %v438_v22, %v440_v27  ;;  %v451_v29 = vsel %vm449_vm7, %v440_v27, %v442_v26 }
  0xe6   : > { %562 = vmatpush.bf16.msra.mxu1 %v450_v28  ;;  %590 = vmatpush.bf16.msra.mxu3 %v1015_v5 }
  0xe7   : > { %601 = vmatpush.bf16.msrb.mxu2 %v451_v29 }
  0xe9   : > { %591 = vmatmul.bf16.vlgmr.msra.gmra.mxu3 %v536_v30 }
  0xea   : > { %635 = vmatpush.bf16.msrb.mxu3 %v1095_v24 }
  0xec   : > { %v423_v34 = vpop.permute.xlu1 %422  ;;  %v346_v36 = vpop.permute.xlu0 %345 }
  0xed   : > { %v358_v5 = vsel %vm357_vm5, %v346_v36, %v1129_v54  ;;  %v430_v24 = vsel %vm426_vm8, %v423_v34, %v425_v33  ;;  %vm725_vm5 = vcmask 256000  }
  0xee   : > { %636 = vmatpush.bf16.msrb.mxu3 %v1110_v35  ;;  %549 = vmatpush.bf16.msra.mxu0 %v358_v5 }
  0xef   : > { %602 = vmatpush.bf16.msrb.mxu2 %v430_v24 }
  0xf2   : > { %637 = vmatpush.bf16.msrb.mxu3 %v1121_v45  ;;  %550 = vmatpush.bf16.msra.mxu0 %v1033_v14  ;;  %v511_v45 = vpop.permute.xlu2 %510 }
  0xf4   : > { %v417_v38 = vpop.permute.xlu1 %416  ;;  %v421_v39 = vpop.permute.xlu0 %420 }
  0xf5   : > { %v429_v35 = vsel %vm426_vm8, %v421_v39, %v423_v34  ;;  %v428_v41 = vsel %vm426_vm8, %v417_v38, %v419_v37 }
  0xf6   : > { %638 = vmatpush.bf16.msrb.mxu3 %v1114_v40  ;;  %551 = vmatpush.bf16.msra.mxu0 %v1043_v17  ;;  %v520_v17 = vsel %vm518_vm4, %v1133_v57, %v511_v45 }
  0xf7   : > { %563 = vmatpush.bf16.msra.mxu1 %v429_v35  ;;  %603 = vmatpush.bf16.msrb.mxu2 %v428_v41 }
  0xf9   : > { %552 = vmatmul.bf16.vlgmr.msra.gmra.mxu0 %v536_v30 }
  0xfa   : > { %639 = vmatpush.bf16.msrb.mxu3 %v448_v12  ;;  %604 = vmatmul.bf16.vlgmr.msrb.gmra.mxu2 %v537_v42 }
  0xfc   : > { %v517_v43 = vpop.permute.xlu1 %516  ;;  %v415_v14 = vpop.permute.xlu0 %414 }
  0xfd   : > { %v427_v44 = vsel %vm426_vm8, %v415_v14, %v417_v38  ;;  %v522_v40 = vsel %vm518_vm4, %v1105_v31, %v517_v43  ;;  %654 = vmatpush.bf16.msra.mxu2 %v517_v43 }
  0xfe   : > { %640 = vmatpush.bf16.msrb.mxu3 %v442_v26  ;;  %564 = vmatpush.bf16.msra.mxu1 %v427_v44 }
  0xff   : > { %615 = vmatpush.bf16.msrb.mxu0 %v522_v40 }
 0x101   : > { %565 = vmatmul.bf16.vlgmr.msra.gmra.mxu1 %v537_v42  ;;  %655 = vmatpush.bf16.msra.mxu2 %v511_v45 }
 0x102   : > { %622 = vmatpush.bf16.msrb.mxu1 %v1097_v25  ;;  %641 = vmatpush.bf16.msrb.mxu3 %v425_v33  ;;  %v729_v33 = vld [vmem:[%s291_s18] sm:$0x7] }
 0x103   : > { %616 = vmatpush.bf16.msrb.mxu0 %v520_v17  ;;  %v732_v24 = vperm.slane %v729_v33, 1  ;;  %v731_v39 = vperm.slane %v729_v33, 0  ;;  %v727_v17 = vld [vmem:[%s1217_s22] sm:$0x77] }
 0x106   : > { %623 = vmatpush.bf16.msrb.mxu1 %v1076_v19  ;;  %642 = vmatpush.bf16.msrb.mxu3 %v419_v37 }
 0x109   : > { %643 = vmatmul.bf16.vlgmr.msrb.gmra.mxu3 %v537_v42  ;;  %895 = vmatmul.msk.bf16.vlgmr.msrb.gmra.mxu0 %vm541_vm6, %v1155_v8 }
 0x10a   : > { %624 = vmatpush.bf16.msrb.mxu1 %v1088_v23  ;;  %896 = vmatmul.msk.bf16.vlgmr.msra.gmra.mxu2 %vm541_vm6, %v1155_v8 }
 0x10e   : > { %625 = vmatpush.bf16.msrb.mxu1 %v1125_v48 }
 0x112   : > { %626 = vmatpush.bf16.msrb.mxu1 %v1147_v2 }
 0x116   : > { %627 = vmatpush.bf16.msrb.mxu1 %v1162_v18 }
 0x11a   : > { %628 = vmatpush.bf16.msrb.mxu1 %v1024_v10 }
 0x11e   : > { %629 = vmatpush.bf16.msrb.mxu1 %v1026_v11 }
 0x121   : > { %630 = vmatmul.bf16.vlgmr.msrb.gmra.mxu1 %v536_v30 }
 0x14c   : > { %v579_v19 = vpop.f32.mrf.mxu2 }
 0x154   : > { %v581_v25 = vpop.f32.mrf.mxu2 }
 0x155   : > { %v532_v47 = vpop.permute.xlu0 %531 }
 0x16c   : > { %v592_v23 = vpop.f32.mrf.mxu3 }
 0x16d   : > { %v593_v53 = vadd.f32 %v592_v23, %v532_v47 }
 0x174   : > { %v594_v31 = vpop.f32.mrf.mxu3 }
 0x176   : > { %v553_v46 = vpop.f32.mrf.mxu0 }
 0x177   : > { %v554_v49 = vadd.f32 %v553_v46, %v532_v47 }
 0x17d   : > { %v605_v50 = vpop.f32.mrf.mxu2 }
 0x17e   : > { %v555_v51 = vpop.f32.mrf.mxu0  ;;  %v566_v52 = vpop.f32.mrf.mxu1  ;;  %v606_v56 = vadd.f32 %v605_v50, %v593_v53 }
 0x17f   : > { %v567_v48 = vadd.f32 %v566_v52, %v554_v49 }
 0x181   : > { %v580_v54 = vadd.f32 %v579_v19, %v567_v48 }
 0x183   : > { %v897_v55 = vmul.f32 -1.442695, %v580_v54  ;;  %v733_v54 = vperm.slane %v729_v33, 2 }
 0x185   : > { %929 = vpow2.f32 %v897_v55  ;;  %v607_v10 = vpop.f32.mrf.mxu2 }
 0x186   : > { %v618_v57 = vpop.f32.mrf.mxu0  ;;  %v568_v11 = vpop.f32.mrf.mxu1 }
 0x187   : > { %v619_v58 = vadd.f32 %v618_v57, %v606_v56  ;;  %v728_v57 = vld [vmem:[%s1217_s22 + $0x8] sm:$0x7] }
 0x189   : > { %v898_v59 = vmul.f32 -1.442695, %v619_v58 }
 0x18b   : > { %v930_v61 = vpop.eup %929  ;;  %931 = vpow2.f32 %v898_v59 }
 0x18c   : > { %v644_v60 = vpop.f32.mrf.mxu3  ;;  %v670_v62 = vadd.f32 1.0, %v930_v61 }
 0x18d   : > { %v657_v63 = vpop.f32.mrf.mxu2 }
 0x18e   : > { %933 = vrcp.f32 %v670_v62  ;;  %v620_v0 = vpop.f32.mrf.mxu0  ;;  %vm678_vm10 = vweird.f32 %v670_v62  ;;  %v682_v26 = vand.u32 2147483647, %v670_v62  ;;  %v684_v27 = vand.u32 2147483648, %v670_v62 }
 0x190   : > { %v685_v37 = vor.u32 1.1754944e-38, %v684_v27  ;;  %vm683_vm15 = vcmp.eq.f32.partialorder %v682_v26, 8.507059e+37 }
 0x191   : > { %v932_v1 = vpop.eup %931 }
 0x192   : > { %v671_v4 = vadd.f32 1.0, %v932_v1 }
 0x194   : > { %v646_v2 = vpop.f32.mrf.mxu3  ;;  %v934_v6 = vpop.eup %933  ;;  %935 = vrcp.f32 %v671_v4  ;;  %v699_v18 = vand.u32 2147483648, %v671_v4  ;;  %vm693_vm11 = vweird.f32 %v671_v4  ;;  %v697_v30 = vand.u32 2147483647, %v671_v4 }
 0x195   : > { %v674_v7 = vmul.f32 %v934_v6, %v670_v62  ;;  %v659_v8 = vpop.f32.mrf.mxu2  ;;  %vm679_vm9 = vweird.f32 %v934_v6 }
 0x196   : > { %vm1207_vm13 = vmor %vm678_vm10, %vm679_vm9  ;;  %v700_v3 = vor.u32 1.1754944e-38, %v699_v18  ;;  %vm698_vm0 = vcmp.eq.f32.partialorder %v697_v30, 8.507059e+37 }
 0x197   : > { %v675_v9 = vsub.f32 1.0, %v674_v7 }
 0x199   : > { %v676_v12 = vmul.f32 %v934_v6, %v675_v9 }
 0x19a   : > { %v936_v13 = vpop.eup %935 }
 0x19b   : > { %v689_v15 = vmul.f32 %v936_v13, %v671_v4  ;;  %v677_v21 = vadd.f32 %v934_v6, %v676_v12  ;;  %vm694_vm12 = vweird.f32 %v936_v13 }
 0x19c   : > { %vm695_vm14 = vmor %vm693_vm11, %vm694_vm12 }
 0x19d   : > { %v690_v22 = vsub.f32 1.0, %v689_v15  ;;  %v681_v36 = vsel %vm1207_vm13, %v934_v6, %v677_v21 }
 0x19e   : > { %v631_v16 = vpop.f32.mrf.mxu1  ;;  %v686_v42 = vsel %vm683_vm15, %v685_v37, %v681_v36 }
 0x19f   : > { %v632_v20 = vadd.f32 %v631_v16, %v532_v47  ;;  %v691_v29 = vmul.f32 %v936_v13, %v690_v22  ;;  %v737_v40 = vmul.f32 %v731_v39, %v686_v42 }
 0x1a1   : > { %v645_v28 = vadd.f32 %v644_v60, %v632_v20  ;;  %v692_v5 = vadd.f32 %v936_v13, %v691_v29 }
 0x1a3   : > { %v658_v34 = vadd.f32 %v657_v63, %v645_v28  ;;  %v696_v35 = vsel %vm695_vm14, %v936_v13, %v692_v5 }
 0x1a4   : > { %v701_v43 = vsel %vm698_vm0, %v700_v3, %v696_v35 }
 0x1a5   : > { %v899_v38 = vmul.f32 -1.442695, %v658_v34  ;;  %v720_v14 = vrot.slane %v701_v43, 4  ;;  %v738_v44 = vmul.f32 %v732_v24, %v701_v43 }
 0x1a6   : > { %v633_v41 = vpop.f32.mrf.mxu1 }
 0x1a7   : > { %937 = vpow2.f32 %v899_v38  ;;  %v722_v45 = vsel %vm721_vm1, %v686_v42, %v720_v14  ;;  %v742_v19 = vrot.slane %v738_v44, 4 }
 0x1a8   : > { %724 = vst [vmem:[%s1222_s26] sm:$0x77] %v722_v45 }
 0x1a9   : > { %v743_v25 = vsel %vm721_vm1, %v737_v40, %v742_v19 }
 0x1aa   : > { %v745_v31 = vadd.f32 %v743_v25, %v727_v17 }
 0x1ac   : > { %747 = vst [vmem:[%s296_s29] sm:$0x77] %v745_v31 }
 0x1ad   : > { %v938_v23 = vpop.eup %937 }
 0x1ae   : > { %v672_v46 = vadd.f32 1.0, %v938_v23 }
 0x1b0   : > { %939 = vrcp.f32 %v672_v46  ;;  %v714_v51 = vand.u32 2147483648, %v672_v46  ;;  %v712_v48 = vand.u32 2147483647, %v672_v46  ;;  %vm708_vm3 = vweird.f32 %v672_v46 }
 0x1b2   : > { %v715_v55 = vor.u32 1.1754944e-38, %v714_v51  ;;  %vm713_vm6 = vcmp.eq.f32.partialorder %v712_v48, 8.507059e+37 }
 0x1b6   : > { %v940_v47 = vpop.eup %939 }
 0x1b7   : > { %v704_v49 = vmul.f32 %v940_v47, %v672_v46  ;;  %vm709_vm2 = vweird.f32 %v940_v47 }
 0x1b8   : > { %vm710_vm4 = vmor %vm708_vm3, %vm709_vm2 }
 0x1b9   : > { %v705_v50 = vsub.f32 1.0, %v704_v49 }
 0x1bb   : > { %v706_v52 = vmul.f32 %v940_v47, %v705_v50 }
 0x1bd   : > { %v707_v53 = vadd.f32 %v940_v47, %v706_v52 }
 0x1bf   : > { %v711_v56 = vsel %vm710_vm4, %v940_v47, %v707_v53 }
 0x1c0   : > { %v716_v10 = vsel %vm713_vm6, %v715_v55, %v711_v56 }
 0x1c1   : > { %726 = vst.msk [vmem:[%s1222_s26 + $0x8] sm:$0x7] %vm725_vm5, %v716_v10  ;;  %v739_v11 = vmul.f32 %v733_v54, %v716_v10 }
 0x1c3   : > { %v746_v58 = vadd.f32 %v739_v11, %v728_v57 }
 0x1c5   : > { %748 = vst.msk [vmem:[%s296_s29 + $0x8] sm:$0x7] %vm725_vm5, %v746_v58 }
 0x1c6 PF: > { %s17_s21 = sadd.s32 1, %s947_s21  }
 0x1c7   : > { %p14_p4 = scmp.ge.s32.totalorder %s17_s21, 4  }
 0x1c9   :  { %16 = sbr.rel (!%p14_p4) target bundleno = 1 (0x1), region = 88 }

</bundles_post_ra>
